<compile_context>
chip_gen: v6e
topology: v6e:2x2x1
jax: 0.10.0
libtpu: 0.0.40
codegen_flags: <defaults>
</compile_context>

<pallas_src>
import functools

import jax
import jax.numpy as jnp
from jax.experimental import pallas as pl
from jax.experimental.pallas import tpu as pltpu


def _conv_bn_relu_kernel(x_ref, w_ref, shift_ref, o_ref, acc_ref, *,
                         KH, KW, stride):
    # x_ref:     (TN, S2, Hs, Ws, TCI) bf16  stride-phase (space-to-depth) activation
    # w_ref:     (1, KH*KW, TCI, Co)   bf16  BN-scale-folded weights for group g
    # shift_ref: (1, 1, Co)            f32   folded BN shift (bias/mean/beta)
    # o_ref:     (TN, OH, OW, Co)      bf16
    # acc_ref:   (TN*OH*OW, Co)        f32   accumulator across Cin tiles
    TN, OH, OW, Co = o_ref.shape
    TCI = x_ref.shape[-1]
    Ws = x_ref.shape[3]
    M = TN * OH * OW
    s = stride
    ci = pl.program_id(2)

    @pl.when(ci == 0)
    def _init():
        acc_ref[...] = jnp.zeros_like(acc_ref)

    acc = acc_ref[...]
    # kw shift via XLU roll only when the lane dim is vreg/MXU aligned; small or
    # unaligned contractions (e.g. the demo) keep plain slices.
    use_roll = (s == 1) and (TCI % 128 == 0)
    for kh in range(KH):
        if s == 1:
            # Hoisted kh slice: H is a leading (non-sublane) dim -> cheap offset.
            x_row = x_ref[:, 0, pl.ds(kh, OH), :, :]            # (TN, OH, Ws, TCI)
        for kw in range(KW):
            if s == 1:
                if use_roll and kw > 0:
                    shifted = pltpu.roll(x_row, shift=Ws - kw, axis=2)
                    xs = shifted[:, :, :OW, :]
                else:
                    xs = x_row[:, :, kw:kw + OW, :]
            else:
                # Space-to-depth phases -> unit-stride reads even for stride=2.
                ph = (kh % s) * s + (kw % s)
                xs = x_ref[:, ph, pl.ds(kh // s, OH), pl.ds(kw // s, OW), :]
            lhs = xs.reshape(M, TCI)                            # bf16
            rhs = w_ref[0, kh * KW + kw]                        # (TCI, Co) bf16
            acc = acc + jnp.dot(lhs, rhs,
                                preferred_element_type=jnp.float32)
    acc_ref[...] = acc

    @pl.when(ci == pl.num_programs(2) - 1)
    def _finalize():
        y = acc_ref[...] + shift_ref[0]                         # (M,Co)+(1,Co)
        y = jnp.maximum(y, 0.0)
        o_ref[...] = y.reshape(TN, OH, OW, Co).astype(o_ref.dtype)


def _vmem_capacity_bytes():
    try:
        return int(pltpu.get_tpu_info().vmem_capacity_bytes)
    except Exception:
        return 64 << 20   # conservative fallback (v7x-class sizing)


def conv_block_forward(x, weight, bias, gamma, beta, running_mean, running_var,
                       *, stride=1, padding=1, groups=1, eps=1e-5):
    """ConvBlock forward. x: (N, Cin, H, W) f32 -> (N, Cout, OH, OW) bf16."""
    N, Cin, H, W = x.shape
    Cout, Cin_g, KH, KW = weight.shape
    G = groups
    assert Cin == Cin_g * G and Cout % G == 0
    Co = Cout // G
    s, p = stride, padding
    OH = (H + 2 * p - KH) // s + 1
    OW = (W + 2 * p - KW) // s + 1
    Hp, Wp = H + 2 * p, W + 2 * p
    # Pad the padded plane up to a multiple of the stride so the space-to-depth
    # phase split below is exact.
    Hp_pad = -(-Hp // s) * s
    Wp_pad = -(-Wp // s) * s
    Hs, Ws = Hp_pad // s, Wp_pad // s
    S2 = s * s

    # ---- generation-aware VMEM sizing --------------------------------------
    vmem_cap = _vmem_capacity_bytes()
    if vmem_cap >= (100 << 20):          # v5e / v6e : 128 MiB physical VMEM
        vmem_budget_bytes = 56 << 20
        vmem_limit_bytes = 96 << 20
    else:                                # v7x-class : 64 MiB physical VMEM
        vmem_budget_bytes = 26 << 20
        vmem_limit_bytes = 52 << 20

    # ---- glue: bf16 first, then NCHW -> padded, phase-split NHWC -----------
    x_bf = x.astype(jnp.bfloat16)                       # cast BEFORE transpose/pad
    x_nhwc = jnp.transpose(x_bf, (0, 2, 3, 1))
    x_pad = jnp.pad(x_nhwc, ((0, 0), (p, Hp_pad - H - p),
                             (p, Wp_pad - W - p), (0, 0)))
    # Space-to-depth: phase (kh % s, kw % s) gives unit-stride in-kernel reads.
    x_ph = (x_pad.reshape(N, Hs, s, Ws, s, Cin)
            .transpose(0, 2, 4, 1, 3, 5)
            .reshape(N, S2, Hs, Ws, Cin))

    # ---- glue: fold BN (inference stats) into weights + per-channel shift ---
    scale = gamma / jnp.sqrt(running_var + eps)                 # (Cout,)
    shift = (bias - running_mean) * scale + beta                # (Cout,)
    w_eff = weight * scale[:, None, None, None]                 # (Cout,Cin_g,KH,KW)
    w_g = w_eff.reshape(G, Co, Cin_g, KH, KW).transpose(0, 3, 4, 2, 1)
    w_bf = w_g.reshape(G, KH * KW, Cin_g, Co).astype(jnp.bfloat16)
    shift_g = shift.reshape(G, 1, Co).astype(jnp.float32)

    # ---- tiling --------------------------------------------------------------
    def _vmem_bytes(tn, tci):
        x_blk = tn * S2 * Hs * Ws * tci * 2          # bf16, double-buffered
        w_blk = KH * KW * tci * Co * 2               # bf16, double-buffered
        out_blk = tn * OH * OW * Co * 2              # bf16, double-buffered
        acc = tn * OH * OW * Co * 4                  # f32 scratch, single
        return 2 * x_blk + 2 * w_blk + 2 * out_blk + acc

    # Contraction tile: prefer the full per-group Cin (n_ci == 1 keeps the weight
    # block resident across batch tiles); shrink only if a TN=1 block does not
    # fit, keeping the lane dim >= 128.
    TCI = Cin_g
    while (_vmem_bytes(1, TCI) > vmem_budget_bytes and TCI > 128
           and TCI % 2 == 0):
        TCI //= 2
    n_ci = Cin_g // TCI

    # Batch tile: largest divisor of N that fits the budget.  With G == 1, cap at
    # N // 2 so the "parallel" batch axis has extent >= 2 (v7x has 2 TensorCores).
    tn_cap = N if G > 1 else max(1, N // 2)
    TN = 0
    for t in range(1, tn_cap + 1):
        if N % t == 0 and _vmem_bytes(t, TCI) <= vmem_budget_bytes:
            TN = t
    if TN == 0:
        raise ValueError(
            f"ConvBlock tile sizing: TN=1 working set "
            f"{_vmem_bytes(1, TCI) / 2**20:.1f} MiB exceeds the "
            f"{vmem_budget_bytes / 2**20:.0f} MiB VMEM budget "
            f"(vmem_capacity={vmem_cap / 2**20:.0f} MiB); spatial (OH) tiling "
            f"needed.")  # TODO(synk): OH halo tiling for large-spatial layers.

    grid = (G, N // TN, n_ci)
    kernel = functools.partial(_conv_bn_relu_kernel, KH=KH, KW=KW, stride=s)

    out = pl.pallas_call(
        kernel,
        out_shape=jax.ShapeDtypeStruct((N, OH, OW, Cout), jnp.bfloat16),
        grid_spec=pltpu.PrefetchScalarGridSpec(
            num_scalar_prefetch=0,
            grid=grid,
            in_specs=[
                pl.BlockSpec((TN, S2, Hs, Ws, TCI),
                             lambda g, nb, cb: (nb, 0, 0, 0, g * n_ci + cb)),
                pl.BlockSpec((1, KH * KW, TCI, Co),
                             lambda g, nb, cb: (g, 0, cb, 0)),
                pl.BlockSpec((1, 1, Co),
                             lambda g, nb, cb: (g, 0, 0)),
            ],
            out_specs=pl.BlockSpec((TN, OH, OW, Co),
                                   lambda g, nb, cb: (nb, 0, 0, g)),
            scratch_shapes=[pltpu.VMEM((TN * OH * OW, Co), jnp.float32)],
        ),
        compiler_params=pltpu.CompilerParams(
            dimension_semantics=("parallel", "parallel", "arbitrary"),
            vmem_limit_bytes=vmem_limit_bytes),
    )(x_ph, w_bf, shift_g)

    # NHWC -> NCHW to match the PyTorch module's output layout (bf16 output;
    # downstream MobileNet layers consume bf16 activations).
    return jnp.transpose(out, (0, 3, 1, 2))


def _reference(x, weight, bias, gamma, beta, mean, var, *, stride, padding,
               groups, eps=1e-5):
    # Same BN folding and the same bf16 quantization of the matmul operands as
    # the kernel (f32 accumulation); the kernel additionally rounds its output
    # to bf16, so the comparison uses a bf16-level tolerance.
    scale = gamma / jnp.sqrt(var + eps)
    shift = (bias - mean) * scale + beta
    w_eff = (weight * scale[:, None, None, None]).astype(jnp.bfloat16)
    y = jax.lax.conv_general_dilated(
        x.astype(jnp.bfloat16), w_eff,
        window_strides=(stride, stride),
        padding=[(padding, padding), (padding, padding)],
        dimension_numbers=("NCHW", "OIHW", "NCHW"),
        feature_group_count=groups,
        preferred_element_type=jnp.float32)
    return jnp.maximum(y + shift[None, :, None, None], 0.0)


def _run_case(key, *, N, Cin, H, W, Cout, KH, KW, stride, padding, groups):
    kx, kw, kb, kg, kbt, km, kv = jax.random.split(key, 7)
    x = jax.random.normal(kx, (N, Cin, H, W), jnp.float32)
    weight = 0.1 * jax.random.normal(kw, (Cout, Cin // groups, KH, KW),
                                     jnp.float32)
    bias = 0.1 * jax.random.normal(kb, (Cout,), jnp.float32)
    gamma = 1.0 + 0.1 * jax.random.normal(kg, (Cout,), jnp.float32)
    beta = 0.1 * jax.random.normal(kbt, (Cout,), jnp.float32)
    running_mean = 0.1 * jax.random.normal(km, (Cout,), jnp.float32)
    running_var = jax.nn.softplus(jax.random.normal(kv, (Cout,), jnp.float32)) + 0.5

    fwd = jax.jit(functools.partial(conv_block_forward, stride=stride,
                                    padding=padding, groups=groups))
    out = jax.block_until_ready(fwd(x, weight, bias, gamma, beta,
                                    running_mean, running_var))
    ref = _reference(x, weight, bias, gamma, beta, running_mean, running_var,
                     stride=stride, padding=padding, groups=groups)
    OH = (H + 2 * padding - KH) // stride + 1
    OW = (W + 2 * padding - KW) // stride + 1
    assert out.shape == (N, Cout, OH, OW), out.shape
    err = jnp.max(jnp.abs(out.astype(jnp.float32) - ref))
    assert err < 2e-2, f"max err {err}"


if __name__ == "__main__":
    # ConvBlock(in_channels=4, out_channels=8, kernel_size=3, stride=1, padding=1)
    _run_case(jax.random.PRNGKey(0), N=2, Cin=4, H=16, W=16, Cout=8,
              KH=3, KW=3, stride=1, padding=1, groups=1)
    # Downsampling ConvBlock (stride=2) exercises the space-to-depth phase path.
    _run_case(jax.random.PRNGKey(0), N=2, Cin=4, H=16, W=16, Cout=8,
              KH=3, KW=3, stride=2, padding=1, groups=1)
    print("KERNEL_OK")
</pallas_src>

<mosaic_0001>
module attributes {stable_mosaic.version = 11 : i64} {
  func.func @_conv_bn_relu_kernel(%arg0: i32, %arg1: i32, %arg2: i32, %arg3: memref<1x1x18x18x4xbf16, #tpu.memory_space<vmem>>, %arg4: memref<1x9x4x8xbf16, #tpu.memory_space<vmem>>, %arg5: memref<1x1x8xf32, #tpu.memory_space<vmem>>, %arg6: memref<1x16x16x8xbf16, #tpu.memory_space<vmem>>, %arg7: memref<256x8xf32, #tpu.memory_space<vmem>>) attributes {dimension_semantics = [#tpu.dimension_semantics<parallel>, #tpu.dimension_semantics<parallel>, #tpu.dimension_semantics<arbitrary>], iteration_bounds = array<i64: 1, 2, 1>, scalar_prefetch = 0 : i64, scratch_operands = 1 : i64, tpu.core_type = #tpu.core_type<tc>, window_params = [{transform_indices = @transform_0, window_bounds = array<i64: 1, 1, 18, 18, 4>}, {transform_indices = @transform_1, window_bounds = array<i64: 1, 9, 4, 8>}, {transform_indices = @transform_2, window_bounds = array<i64: 1, 1, 8>}, {transform_indices = @transform_3, window_bounds = array<i64: 1, 16, 16, 8>}]} {
    %c0_i32 = arith.constant 0 : i32
    %0 = arith.cmpi eq, %arg2, %c0_i32 : i32
    %1 = arith.extui %0 : i1 to i32
    %c0_i32_0 = arith.constant 0 : i32
    %2 = arith.cmpi ne, %1, %c0_i32_0 : i32
    scf.if %2 {
      %cst_57 = arith.constant 0.000000e+00 : f32
      %68 = vector.broadcast %cst_57 : f32 to vector<256x8xf32>
      %c0_58 = arith.constant 0 : index
      %c0_59 = arith.constant 0 : index
      %69 = vector.load %arg7[%c0_58, %c0_59] : memref<256x8xf32, #tpu.memory_space<vmem>>, vector<256x8xf32>
      tpu.vector_store %arg7[%c0_58, %c0_59], %68 {strides = array<i32>} : memref<256x8xf32, #tpu.memory_space<vmem>>, vector<256x8xf32>,
    } else {
    }
    %c0 = arith.constant 0 : index
    %c0_1 = arith.constant 0 : index
    %3 = vector.load %arg7[%c0, %c0_1] : memref<256x8xf32, #tpu.memory_space<vmem>>, vector<256x8xf32>
    %c0_2 = arith.constant 0 : index
    %c0_3 = arith.constant 0 : index
    %c0_4 = arith.constant 0 : index
    %c0_5 = arith.constant 0 : index
    %c0_6 = arith.constant 0 : index
    %4 = vector.load %arg3[%c0_2, %c0_3, %c0_4, %c0_5, %c0_6] : memref<1x1x18x18x4xbf16, #tpu.memory_space<vmem>>, vector<1x1x16x18x4xbf16>
    %5 = vector.shape_cast %4 : vector<1x1x16x18x4xbf16> to vector<1x16x18x4xbf16>
    %6 = vector.extract_strided_slice %5 {offsets = [0, 0, 0, 0], sizes = [1, 16, 16, 4], strides = [1, 1, 1, 1]} : vector<1x16x18x4xbf16> to vector<1x16x16x4xbf16>
    %7 = vector.shape_cast %6 : vector<1x16x16x4xbf16> to vector<256x4xbf16>
    %c0_7 = arith.constant 0 : index
    %c0_8 = arith.constant 0 : index
    %c0_9 = arith.constant 0 : index
    %c0_10 = arith.constant 0 : index
    %8 = vector.load %arg4[%c0_7, %c0_8, %c0_9, %c0_10] : memref<1x9x4x8xbf16, #tpu.memory_space<vmem>>, vector<1x1x4x8xbf16>
    %9 = vector.shape_cast %8 : vector<1x1x4x8xbf16> to vector<4x8xbf16>
    %cst = arith.constant dense<0.000000e+00> : vector<256x8xf32>
    %10 = tpu.matmul %7, %9, %cst {dimension_numbers = #tpu.dot_dimension_numbers<[1], [0], [0], [1], [0, 0, 1, 1], [], []>} : vector<256x4xbf16>, vector<4x8xbf16>, vector<256x8xf32> -> vector<256x8xf32>
    %11 = arith.addf %3, %10 : vector<256x8xf32>
    %12 = vector.extract_strided_slice %5 {offsets = [0, 0, 1, 0], sizes = [1, 16, 16, 4], strides = [1, 1, 1, 1]} : vector<1x16x18x4xbf16> to vector<1x16x16x4xbf16>
    %13 = vector.shape_cast %12 : vector<1x16x16x4xbf16> to vector<256x4xbf16>
    %c0_11 = arith.constant 0 : index
    %c1 = arith.constant 1 : index
    %c0_12 = arith.constant 0 : index
    %c0_13 = arith.constant 0 : index
    %14 = vector.load %arg4[%c0_11, %c1, %c0_12, %c0_13] : memref<1x9x4x8xbf16, #tpu.memory_space<vmem>>, vector<1x1x4x8xbf16>
    %15 = vector.shape_cast %14 : vector<1x1x4x8xbf16> to vector<4x8xbf16>
    %cst_14 = arith.constant dense<0.000000e+00> : vector<256x8xf32>
    %16 = tpu.matmul %13, %15, %cst_14 {dimension_numbers = #tpu.dot_dimension_numbers<[1], [0], [0], [1], [0, 0, 1, 1], [], []>} : vector<256x4xbf16>, vector<4x8xbf16>, vector<256x8xf32> -> vector<256x8xf32>
    %17 = arith.addf %11, %16 : vector<256x8xf32>
    %18 = vector.extract_strided_slice %5 {offsets = [0, 0, 2, 0], sizes = [1, 16, 16, 4], strides = [1, 1, 1, 1]} : vector<1x16x18x4xbf16> to vector<1x16x16x4xbf16>
    %19 = vector.shape_cast %18 : vector<1x16x16x4xbf16> to vector<256x4xbf16>
    %c0_15 = arith.constant 0 : index
    %c2 = arith.constant 2 : index
    %c0_16 = arith.constant 0 : index
    %c0_17 = arith.constant 0 : index
    %20 = vector.load %arg4[%c0_15, %c2, %c0_16, %c0_17] : memref<1x9x4x8xbf16, #tpu.memory_space<vmem>>, vector<1x1x4x8xbf16>
    %21 = vector.shape_cast %20 : vector<1x1x4x8xbf16> to vector<4x8xbf16>
    %cst_18 = arith.constant dense<0.000000e+00> : vector<256x8xf32>
    %22 = tpu.matmul %19, %21, %cst_18 {dimension_numbers = #tpu.dot_dimension_numbers<[1], [0], [0], [1], [0, 0, 1, 1], [], []>} : vector<256x4xbf16>, vector<4x8xbf16>, vector<256x8xf32> -> vector<256x8xf32>
    %23 = arith.addf %17, %22 : vector<256x8xf32>
    %c0_19 = arith.constant 0 : index
    %c0_20 = arith.constant 0 : index
    %c1_21 = arith.constant 1 : index
    %c0_22 = arith.constant 0 : index
    %c0_23 = arith.constant 0 : index
    %24 = vector.load %arg3[%c0_19, %c0_20, %c1_21, %c0_22, %c0_23] : memref<1x1x18x18x4xbf16, #tpu.memory_space<vmem>>, vector<1x1x16x18x4xbf16>
    %25 = vector.shape_cast %24 : vector<1x1x16x18x4xbf16> to vector<1x16x18x4xbf16>
    %26 = vector.extract_strided_slice %25 {offsets = [0, 0, 0, 0], sizes = [1, 16, 16, 4], strides = [1, 1, 1, 1]} : vector<1x16x18x4xbf16> to vector<1x16x16x4xbf16>
    %27 = vector.shape_cast %26 : vector<1x16x16x4xbf16> to vector<256x4xbf16>
    %c0_24 = arith.constant 0 : index
    %c3 = arith.constant 3 : index
    %c0_25 = arith.constant 0 : index
    %c0_26 = arith.constant 0 : index
    %28 = vector.load %arg4[%c0_24, %c3, %c0_25, %c0_26] : memref<1x9x4x8xbf16, #tpu.memory_space<vmem>>, vector<1x1x4x8xbf16>
    %29 = vector.shape_cast %28 : vector<1x1x4x8xbf16> to vector<4x8xbf16>
    %cst_27 = arith.constant dense<0.000000e+00> : vector<256x8xf32>
    %30 = tpu.matmul %27, %29, %cst_27 {dimension_numbers = #tpu.dot_dimension_numbers<[1], [0], [0], [1], [0, 0, 1, 1], [], []>} : vector<256x4xbf16>, vector<4x8xbf16>, vector<256x8xf32> -> vector<256x8xf32>
    %31 = arith.addf %23, %30 : vector<256x8xf32>
    %32 = vector.extract_strided_slice %25 {offsets = [0, 0, 1, 0], sizes = [1, 16, 16, 4], strides = [1, 1, 1, 1]} : vector<1x16x18x4xbf16> to vector<1x16x16x4xbf16>
    %33 = vector.shape_cast %32 : vector<1x16x16x4xbf16> to vector<256x4xbf16>
    %c0_28 = arith.constant 0 : index
    %c4 = arith.constant 4 : index
    %c0_29 = arith.constant 0 : index
    %c0_30 = arith.constant 0 : index
    %34 = vector.load %arg4[%c0_28, %c4, %c0_29, %c0_30] : memref<1x9x4x8xbf16, #tpu.memory_space<vmem>>, vector<1x1x4x8xbf16>
    %35 = vector.shape_cast %34 : vector<1x1x4x8xbf16> to vector<4x8xbf16>
    %cst_31 = arith.constant dense<0.000000e+00> : vector<256x8xf32>
    %36 = tpu.matmul %33, %35, %cst_31 {dimension_numbers = #tpu.dot_dimension_numbers<[1], [0], [0], [1], [0, 0, 1, 1], [], []>} : vector<256x4xbf16>, vector<4x8xbf16>, vector<256x8xf32> -> vector<256x8xf32>
    %37 = arith.addf %31, %36 : vector<256x8xf32>
    %38 = vector.extract_strided_slice %25 {offsets = [0, 0, 2, 0], sizes = [1, 16, 16, 4], strides = [1, 1, 1, 1]} : vector<1x16x18x4xbf16> to vector<1x16x16x4xbf16>
    %39 = vector.shape_cast %38 : vector<1x16x16x4xbf16> to vector<256x4xbf16>
    %c0_32 = arith.constant 0 : index
    %c5 = arith.constant 5 : index
    %c0_33 = arith.constant 0 : index
    %c0_34 = arith.constant 0 : index
    %40 = vector.load %arg4[%c0_32, %c5, %c0_33, %c0_34] : memref<1x9x4x8xbf16, #tpu.memory_space<vmem>>, vector<1x1x4x8xbf16>
    %41 = vector.shape_cast %40 : vector<1x1x4x8xbf16> to vector<4x8xbf16>
    %cst_35 = arith.constant dense<0.000000e+00> : vector<256x8xf32>
    %42 = tpu.matmul %39, %41, %cst_35 {dimension_numbers = #tpu.dot_dimension_numbers<[1], [0], [0], [1], [0, 0, 1, 1], [], []>} : vector<256x4xbf16>, vector<4x8xbf16>, vector<256x8xf32> -> vector<256x8xf32>
    %43 = arith.addf %37, %42 : vector<256x8xf32>
    %c0_36 = arith.constant 0 : index
    %c0_37 = arith.constant 0 : index
    %c2_38 = arith.constant 2 : index
    %c0_39 = arith.constant 0 : index
    %c0_40 = arith.constant 0 : index
    %44 = vector.load %arg3[%c0_36, %c0_37, %c2_38, %c0_39, %c0_40] : memref<1x1x18x18x4xbf16, #tpu.memory_space<vmem>>, vector<1x1x16x18x4xbf16>
    %45 = vector.shape_cast %44 : vector<1x1x16x18x4xbf16> to vector<1x16x18x4xbf16>
    %46 = vector.extract_strided_slice %45 {offsets = [0, 0, 0, 0], sizes = [1, 16, 16, 4], strides = [1, 1, 1, 1]} : vector<1x16x18x4xbf16> to vector<1x16x16x4xbf16>
    %47 = vector.shape_cast %46 : vector<1x16x16x4xbf16> to vector<256x4xbf16>
    %c0_41 = arith.constant 0 : index
    %c6 = arith.constant 6 : index
    %c0_42 = arith.constant 0 : index
    %c0_43 = arith.constant 0 : index
    %48 = vector.load %arg4[%c0_41, %c6, %c0_42, %c0_43] : memref<1x9x4x8xbf16, #tpu.memory_space<vmem>>, vector<1x1x4x8xbf16>
    %49 = vector.shape_cast %48 : vector<1x1x4x8xbf16> to vector<4x8xbf16>
    %cst_44 = arith.constant dense<0.000000e+00> : vector<256x8xf32>
    %50 = tpu.matmul %47, %49, %cst_44 {dimension_numbers = #tpu.dot_dimension_numbers<[1], [0], [0], [1], [0, 0, 1, 1], [], []>} : vector<256x4xbf16>, vector<4x8xbf16>, vector<256x8xf32> -> vector<256x8xf32>
    %51 = arith.addf %43, %50 : vector<256x8xf32>
    %52 = vector.extract_strided_slice %45 {offsets = [0, 0, 1, 0], sizes = [1, 16, 16, 4], strides = [1, 1, 1, 1]} : vector<1x16x18x4xbf16> to vector<1x16x16x4xbf16>
    %53 = vector.shape_cast %52 : vector<1x16x16x4xbf16> to vector<256x4xbf16>
    %c0_45 = arith.constant 0 : index
    %c7 = arith.constant 7 : index
    %c0_46 = arith.constant 0 : index
    %c0_47 = arith.constant 0 : index
    %54 = vector.load %arg4[%c0_45, %c7, %c0_46, %c0_47] : memref<1x9x4x8xbf16, #tpu.memory_space<vmem>>, vector<1x1x4x8xbf16>
    %55 = vector.shape_cast %54 : vector<1x1x4x8xbf16> to vector<4x8xbf16>
    %cst_48 = arith.constant dense<0.000000e+00> : vector<256x8xf32>
    %56 = tpu.matmul %53, %55, %cst_48 {dimension_numbers = #tpu.dot_dimension_numbers<[1], [0], [0], [1], [0, 0, 1, 1], [], []>} : vector<256x4xbf16>, vector<4x8xbf16>, vector<256x8xf32> -> vector<256x8xf32>
    %57 = arith.addf %51, %56 : vector<256x8xf32>
    %58 = vector.extract_strided_slice %45 {offsets = [0, 0, 2, 0], sizes = [1, 16, 16, 4], strides = [1, 1, 1, 1]} : vector<1x16x18x4xbf16> to vector<1x16x16x4xbf16>
    %59 = vector.shape_cast %58 : vector<1x16x16x4xbf16> to vector<256x4xbf16>
    %c0_49 = arith.constant 0 : index
    %c8 = arith.constant 8 : index
    %c0_50 = arith.constant 0 : index
    %c0_51 = arith.constant 0 : index
    %60 = vector.load %arg4[%c0_49, %c8, %c0_50, %c0_51] : memref<1x9x4x8xbf16, #tpu.memory_space<vmem>>, vector<1x1x4x8xbf16>
    %61 = vector.shape_cast %60 : vector<1x1x4x8xbf16> to vector<4x8xbf16>
    %cst_52 = arith.constant dense<0.000000e+00> : vector<256x8xf32>
    %62 = tpu.matmul %59, %61, %cst_52 {dimension_numbers = #tpu.dot_dimension_numbers<[1], [0], [0], [1], [0, 0, 1, 1], [], []>} : vector<256x4xbf16>, vector<4x8xbf16>, vector<256x8xf32> -> vector<256x8xf32>
    %63 = arith.addf %57, %62 : vector<256x8xf32>
    %c0_53 = arith.constant 0 : index
    %c0_54 = arith.constant 0 : index
    %64 = vector.load %arg7[%c0_53, %c0_54] : memref<256x8xf32, #tpu.memory_space<vmem>>, vector<256x8xf32>
    tpu.vector_store %arg7[%c0_53, %c0_54], %63 {strides = array<i32>} : memref<256x8xf32, #tpu.memory_space<vmem>>, vector<256x8xf32>,
    %c0_i32_55 = arith.constant 0 : i32
    %65 = arith.cmpi eq, %arg2, %c0_i32_55 : i32
    %66 = arith.extui %65 : i1 to i32
    %c0_i32_56 = arith.constant 0 : i32
    %67 = arith.cmpi ne, %66, %c0_i32_56 : i32
    scf.if %67 {
      %c0_57 = arith.constant 0 : index
      %c0_58 = arith.constant 0 : index
      %68 = vector.load %arg7[%c0_57, %c0_58] : memref<256x8xf32, #tpu.memory_space<vmem>>, vector<256x8xf32>
      %c0_59 = arith.constant 0 : index
      %c0_60 = arith.constant 0 : index
      %c0_61 = arith.constant 0 : index
      %69 = vector.load %arg5[%c0_59, %c0_60, %c0_61] : memref<1x1x8xf32, #tpu.memory_space<vmem>>, vector<1x1x8xf32>
      %70 = vector.shape_cast %69 : vector<1x1x8xf32> to vector<1x8xf32>
      %71 = vector.broadcast %70 : vector<1x8xf32> to vector<256x8xf32>
      %72 = arith.addf %68, %71 : vector<256x8xf32>
      %cst_62 = arith.constant 0.000000e+00 : f32
      %73 = vector.broadcast %cst_62 : f32 to vector<256x8xf32>
      %74 = arith.maximumf %72, %73 : vector<256x8xf32>
      %75 = vector.shape_cast %74 : vector<256x8xf32> to vector<1x16x16x8xf32>
      %76 = arith.truncf %75 : vector<1x16x16x8xf32> to vector<1x16x16x8xbf16>
      %c0_63 = arith.constant 0 : index
      %c0_64 = arith.constant 0 : index
      %c0_65 = arith.constant 0 : index
      %c0_66 = arith.constant 0 : index
      %77 = vector.load %arg6[%c0_63, %c0_64, %c0_65, %c0_66] : memref<1x16x16x8xbf16, #tpu.memory_space<vmem>>, vector<1x16x16x8xbf16>
      tpu.vector_store %arg6[%c0_63, %c0_64, %c0_65, %c0_66], %76 {strides = array<i32>} : memref<1x16x16x8xbf16, #tpu.memory_space<vmem>>, vector<1x16x16x8xbf16>,
    } else {
    }
    return
  }
  func.func @transform_0(%arg0: i32, %arg1: i32, %arg2: i32) -> (i32, i32, i32, i32, i32) {
    %c1_i32 = arith.constant 1 : i32
    %0 = arith.muli %arg0, %c1_i32 : i32
    %1 = arith.addi %0, %arg2 : i32
    %c0_i32 = arith.constant 0 : i32
    %c0_i32_0 = arith.constant 0 : i32
    %c0_i32_1 = arith.constant 0 : i32
    %c0_i32_2 = arith.constant 0 : i32
    return %arg1, %c0_i32, %c0_i32_0, %c0_i32_1, %1 : i32, i32, i32, i32, i32
  }
  func.func @transform_1(%arg0: i32, %arg1: i32, %arg2: i32) -> (i32, i32, i32, i32) {
    %c0_i32 = arith.constant 0 : i32
    %c0_i32_0 = arith.constant 0 : i32
    %c0_i32_1 = arith.constant 0 : i32
    return %arg0, %c0_i32, %arg2, %c0_i32_0 : i32, i32, i32, i32
  }
  func.func @transform_2(%arg0: i32, %arg1: i32, %arg2: i32) -> (i32, i32, i32) {
    %c0_i32 = arith.constant 0 : i32
    %c0_i32_0 = arith.constant 0 : i32
    %c0_i32_1 = arith.constant 0 : i32
    return %arg0, %c0_i32, %c0_i32_0 : i32, i32, i32
  }
  func.func @transform_3(%arg0: i32, %arg1: i32, %arg2: i32) -> (i32, i32, i32, i32) {
    %c0_i32 = arith.constant 0 : i32
    %c0_i32_0 = arith.constant 0 : i32
    %c0_i32_1 = arith.constant 0 : i32
    return %arg1, %c0_i32, %c0_i32_0, %arg0 : i32, i32, i32, i32
  }
}

</mosaic_0001>

<bundles_post_ra>
// kernel: conv_block_forward.1
= control target key start
LH: loop header
LB: loop body
LE: loop exit
PB: predicated region body
PF: predicated region fallthrough
CT: control target
= control target key end

     0   :  { %s6296_s12 = smov 0   ;;  %s6298_s13 = smov 0   ;;  %s8889_s0 = inlined_call_operand.vmem [shape: bf16[2,1,18,18,4], index: 0, kind: input, shape index: {}]   ;;  %s8890_s1 = inlined_call_operand.vmem [shape: bf16[1,9,4,8], index: 1, kind: input, shape index: {}]   ;;  %s8891_s2 = inlined_call_operand.vmem [shape: f32[1,1,8], index: 2, kind: input, shape index: {}]   ;;  %s8892_s3 = inlined_call_operand.vmem [shape: bf16[2,16,16,8], index: 3, kind: output, shape index: {}]  }
   0x1   :  { %s6300_s14 = smov 0  }
   0x2 LB: > { %s28_s15 = sadd.s32 1, %s6269_s13  ;;  %p5188_p0 = scmp.ge.s32.totalorder %s6273_s14, 1  ;;  %s6273_s14 = sphi %s6300_s14, %s13_s14   ;;  %s6269_s13 = sphi %s6298_s13, %s9225_s13   ;;  %s6265_s12 = sphi %s6296_s12, %s9224_s12  }
   0x3   : > { %p30_p1 = scmp.ge.s32.totalorder %s28_s15, 2  ;;  %p190_p2 = scmp.lt.s32.totalorder %s6273_s14, 3 }
   0x5   : > { %s9227_s15 = smov (%p30_p1, %s28_s15), 0  ;;  %p191_p3 = pnand %p5188_p0, %p190_p2 }
   0x7   : > { %194 = sbr.rel (%p191_p3) target bundleno = 582 (0x246), region = 32 }
   0xc   : > { %v379_v0 = vld [vmem:[%s8890_s1] sm:$0x3]  ;;  %vm509_vm0 = vcmask 1041408   ;;  %p233_p4 = scmp.lt.s32.totalorder %s6265_s12, 1  ;;  %v5224_v2 = vld [vmem:[%s8890_s1 + $0x2] sm:$0x3] }
   0xd   : > { %6162 = vmatprep.subr.msk.bf16.mxu1 %vm509_vm0, %v379_v0  ;;  %6161 = vmatprep.subr.msk.bf16.mxu0 %vm509_vm0, %v379_v0  ;;  %v511_v1 = vsel %vm509_vm0, %v379_v0, 0  ;;  %v5273_v3 = vld [vmem:[%s8890_s1 + $0x4] sm:$0x3]  ;;  %v6333_v4 = vld [vmem:[%s8890_s1 + $0x6] sm:$0x3]  ;;  %vm460_vm1 = vcmask 31744  }
   0xe   : > { %6160 = vmatpush3.bf16.msra.mxu1 %v511_v1  ;;  %5854 = vmatpush3.bf16.msra.mxu0 %v511_v1  ;;  %s9229_s12 = smov (!%p233_p4, %s6265_s12), 1  ;;  %v6338_v5 = vld [vmem:[%s8890_s1 + $0x8] sm:$0x3]  ;;  %v6344_v6 = vld [vmem:[%s8890_s1 + $0xa] sm:$0x3]  ;;  %v6347_v7 = vsel %vm509_vm0, %v5224_v2, 0 }
   0xf   : > { %6163 = vmatprep.subr.msk.bf16.mxu1 %vm509_vm0, %v5224_v2  ;;  %6164 = vmatprep.subr.msk.bf16.mxu0 %vm509_vm0, %v5273_v3  ;;  %s6171_s26 = smul.u32 216, %s9229_s12  ;;  %v6350_v8 = vsel %vm509_vm0, %v5273_v3, 0  ;;  %v6355_v9 = vld [vmem:[%s8890_s1 + $0xc] sm:$0x3]  ;;  %v6364_v10 = vsel %vm509_vm0, %v6333_v4, 0  ;;  %v6368_v11 = vsel %vm509_vm0, %v6338_v5, 0 }
  0x10   : > { %v6372_v12 = vsel %vm509_vm0, %v6344_v6, 0  ;;  %v6376_v13 = vsel %vm509_vm0, %v6355_v9, 0  ;;  %vm1403_vm2 = vcmask 1042432   ;;  %vm1404_vm3 = vcmask 1046532   ;;  %s5667_s17 = sshll.u32 %s9229_s12, 7 }
  0x11   : > { %s6360_s6 = scalar_lea.vmem %s8889_s0, %s6171_s26  ;;  %8949 = vst [vmem:[#allocation3_spill] sm:$0xff] %v6372_v12  ;;  %8950 = vst [vmem:[#allocation4_spill] sm:$0xff] %v6376_v13  ;;  %vm706_vm4 = vsmask.f32 3328  ;;  %vm707_vm5 = vsmask.f32 7440  ;;  %s8733_s12 = scalar_lea.vmem %s8892_s3, %s5667_s17 }
  0x12   : > { %v6379_v14 = vld [vmem:[%s6360_s6] sm:$0xf]  ;;  %v6382_v15 = vld [vmem:[%s6360_s6 + $0x4] sm:$0xf]  ;;  %v6405_v30 = vld [vmem:[%s6360_s6 + $0xc] sm:$0xf] }
  0x13   : > { %v6385_v16 = vld [vmem:[%s6360_s6 + $0x60] sm:$0xf]  ;;  %v5192_v17 = vcombine.low %v6379_v14, %v6382_v15  ;;  %v710_v18 = vshrl.u32 %v6379_v14, 16  ;;  %v713_v19 = vshll.u32 %v6379_v14, 16  ;;  %v719_v20 = vshll.u32 %v6382_v15, 16  ;;  %vm6546_vm6 = vmor %vm1403_vm2, %vm1404_vm3 }
  0x14   : > { %v6393_v21 = vld [vmem:[%s6360_s6 + $0x64] sm:$0xf]  ;;  %v723_v22 = vshrl.u32 %v6382_v15, 16  ;;  %v5257_v23 = vrot.slane %v6379_v14, 9  ;;  %v1408_v24 = vrot.slane %v6382_v15, 5  ;;  %v902_v29 = vshrl.u32 %v6385_v16, 16  ;;  %vm6560_vm7 = vmor %vm706_vm4, %vm707_vm5 }
  0x15   : > { %v5200_v25 = vcombine.low %v6385_v16, %v6393_v21  ;;  %5855 = vmatprep.mubr.msk.bf16.mxu0 %vm460_vm1, %v5192_v17  ;;  %v712_v26 = vrot.slane %v710_v18, 4  ;;  %v715_v27 = vrot.slane %v713_v19, 5  ;;  %v6401_v28 = vrot.slane %v719_v20, 5  ;;  %v6415_v35 = vld [vmem:[%s6360_s6 + $0x10] sm:$0xf] }
  0x16   : > { %v725_v31 = vrot.slane %v723_v22, 4  ;;  %v6409_v32 = vrot.slane %v1408_v24, 4  ;;  %v905_v33 = vshll.u32 %v6385_v16, 16  ;;  %v911_v34 = vshll.u32 %v6393_v21, 16  ;;  %v6424_v44 = vld [vmem:[%s6360_s6 + $0x6c] sm:$0xf] }
  0x17   : > { %5871 = vmatprep.mubr.msk.bf16.mxu1 %vm460_vm1, %v5200_v25  ;;  %v716_v36 = vor.u32 %v715_v27, %v712_v26  ;;  %v904_v37 = vrot.slane %v902_v29, 4  ;;  %v915_v38 = vshrl.u32 %v6393_v21, 16  ;;  %v5265_v39 = vrot.slane %v6385_v16, 9  ;;  %v6432_v49 = vld [vmem:[%s6360_s6 + $0x70] sm:$0xf] }
  0x18   : > { %v726_v40 = vor.u32 %v725_v31, %v6401_v28  ;;  %v907_v41 = vrot.slane %v905_v33, 5  ;;  %v6420_v42 = vrot.slane %v911_v34, 5  ;;  %v1464_v43 = vrot.slane %v6393_v21, 5  ;;  %v6442_v54 = vld [vmem:[%s6360_s6 + $0x18] sm:$0xf] }
  0x19   : > { %v6426_v45 = vrot.slane %v716_v36, 4  ;;  %v917_v46 = vrot.slane %v915_v38, 4  ;;  %v5193_v47 = vcombine.low %v6405_v30, %v6415_v35  ;;  %v734_v48 = vshrl.u32 %v6405_v30, 16  ;;  %v6445_v55 = vld [vmem:[%s6360_s6 + $0x1c] sm:$0xf] }
  0x1a   : > { %v6434_v50 = vrot.slane %v726_v40, 4  ;;  %v908_v51 = vor.u32 %v907_v41, %v904_v37  ;;  %v6438_v52 = vrot.slane %v1464_v43, 4  ;;  %v737_v53 = vshll.u32 %v6405_v30, 16  ;;  %v6452_v60 = vld [vmem:[%s6360_s6 + $0x78] sm:$0xf] }
  0x1b   : > { %v918_v56 = vor.u32 %v917_v46, %v6420_v42  ;;  %5856 = vmatmul.mubr.msk.bf16.vlgmr.msra.gmra.mxu0 %vm460_vm1, %v5193_v47  ;;  %v736_v57 = vrot.slane %v734_v48, 4  ;;  %v743_v58 = vshll.u32 %v6415_v35, 16  ;;  %v747_v59 = vshrl.u32 %v6415_v35, 16  ;;  %v6460_v1 = vld [vmem:[%s6360_s6 + $0x7c] sm:$0xf] }
  0x1c   : > { %v6454_v61 = vrot.slane %v908_v51, 4  ;;  %v739_v62 = vrot.slane %v737_v53, 5  ;;  %v5258_v63 = vrot.slane %v6405_v30, 9  ;;  %v1415_v0 = vrot.slane %v6415_v35, 5  ;;  %5922 = vmatpush3.bf16.msra.mxu0 %v6350_v8  ;;  %v6469_v19 = vld [vmem:[%s6360_s6 + $0x24] sm:$0xf] }
  0x1d   : > { %v6462_v2 = vrot.slane %v918_v56, 4  ;;  %v6464_v3 = vrot.slane %v743_v58, 5  ;;  %v749_v17 = vrot.slane %v747_v59, 4  ;;  %v5201_v18 = vcombine.low %v6424_v44, %v6432_v49  ;;  %v6472_v20 = vld [vmem:[%s6360_s6 + $0x28] sm:$0xf]  ;;  %6166 = vmatprep.subr.msk.bf16.mxu0 %vm509_vm0, %v6338_v5 }
  0x1e   : > { %v740_v8 = vor.u32 %v739_v62, %v736_v57  ;;  %v6478_v22 = vrot.slane %v1415_v0, 4  ;;  %v6483_v27 = vld [vmem:[%s6360_s6 + $0x84] sm:$0xf]  ;;  %v5194_v5 = vcombine.low %v6442_v54, %v6445_v55  ;;  %v6492_v34 = vld [vmem:[%s6360_s6 + $0x88] sm:$0xf]  ;;  %v5202_v41 = vcombine.low %v6452_v60, %v6460_v1 }
  0x1f   : > { %v750_v29 = vor.u32 %v749_v17, %v6464_v3  ;;  %5872 = vmatmul.mubr.msk.bf16.vlgmr.msra.gmra.mxu1 %vm460_vm1, %v5201_v18  ;;  %v6495_v36 = vld [vmem:[%s6360_s6 + $0x30] sm:$0xf]  ;;  %v6505_v46 = vld [vmem:[%s6360_s6 + $0x34] sm:$0xf]  ;;  %v5195_v56 = vcombine.low %v6469_v19, %v6472_v20  ;;  %v5203_v17 = vcombine.low %v6483_v27, %v6492_v34  ;;  %v6542_v48 = vld [vmem:[%s6360_s6 + $0x40] sm:$0xf]  ;;  %v722_v59 = vsel %vm6560_vm7, %v6426_v45, %v6401_v28 }
  0x20   : > { %v6497_v37 = vrot.slane %v740_v8, 4  ;;  %5888 = vmatpush3.bf16.msra.mxu1 %v6347_v7  ;;  %5859 = vmatprep.mubr.msk.bf16.mxu0 %vm460_vm1, %v5194_v5  ;;  %v6514_v53 = vld [vmem:[%s6360_s6 + $0x90] sm:$0xf]  ;;  %v6525_v62 = vld [vmem:[%s6360_s6 + $0x94] sm:$0xf]  ;;  %v5196_v5 = vcombine.low %v6495_v36, %v6505_v46  ;;  %v6630_v28 = vsel %vm6546_vm6, %v5258_v63, %v1415_v0  ;;  %v8957_v21 = vshrl.u32 %v6442_v54, 16 }
  0x21   : > { %v6507_v47 = vrot.slane %v750_v29, 4  ;;  %6165 = vmatprep.subr.msk.bf16.mxu1 %vm509_vm0, %v6333_v4  ;;  %5875 = vmatprep.mubr.msk.bf16.mxu1 %vm460_vm1, %v5202_v41  ;;  %v6533_v29 = vld [vmem:[%s6360_s6 + $0x3c] sm:$0xf]  ;;  %v6571_v7 = vld [vmem:[%s6360_s6 + $0xa0] sm:$0xf]  ;;  %v8958_v13 = vshll.u32 %v6442_v54, 16 }
  0x22   : > { %v6556_v26 = vld [vmem:[%s6360_s6 + $0x9c] sm:$0xf]  ;;  %v5197_v18 = vcombine.low %v6533_v29, %v6542_v48  ;;  %v6580_v51 = vld [vmem:[%s6360_s6 + $0x48] sm:$0xf]  ;;  %v6584_v31 = vld [vmem:[%s6360_s6 + $0x4c] sm:$0xf]  ;;  %v746_v45 = vsel %vm6560_vm7, %v6497_v37, %v6464_v3  ;;  %v6657_v37 = vsel %vm6546_vm6, %v5265_v39, %v1464_v43 }
  0x23   : > { %5860 = vmatmul.mubr.msk.bf16.gmra.mxu0 %vm460_vm1, %v5195_v56  ;;  %v5204_v56 = vcombine.low %v6514_v53, %v6525_v62  ;;  %v5205_v41 = vcombine.low %v6556_v26, %v6571_v7  ;;  %v6589_v57 = vld [vmem:[%s6360_s6 + $0xa8] sm:$0xf]  ;;  %v5198_v58 = vcombine.low %v6580_v51, %v6584_v31  ;;  %v6638_v38 = vld [vmem:[%s6360_s6 + $0xb4] sm:$0xf]  ;;  %v6642_v30 = vld [vmem:[%s6360_s6 + $0xb8] sm:$0xf] }
  0x24   : > { %5863 = vmatprep.mubr.msk.bf16.mxu0 %vm460_vm1, %v5196_v5  ;;  %8955 = vst [vmem:[#allocation5_spill] sm:$0xff] %v6638_v38  ;;  %8956 = vst [vmem:[#allocation6_spill] sm:$0xff] %v6642_v30  ;;  %v333_v0 = vld [vmem:[%s6360_s6 + $0x8] sm:$0x1]  ;;  %v336_v5 = vld [vmem:[%s6360_s6 + $0x14] sm:$0x1] }
  0x25   : > { %v729_v35 = vshll.u32 %v333_v0, 16  ;;  %v1411_v40 = vrot.slane %v333_v0, 5  ;;  %v753_v4 = vshll.u32 %v336_v5, 16  ;;  %v1418_v3 = vrot.slane %v336_v5, 5  ;;  %v339_v33 = vld [vmem:[%s6360_s6 + $0x20] sm:$0x1] }
  0x26   : > { %v760_v16 = vrot.slane %v8957_v21, 4  ;;  %v763_v39 = vrot.slane %v8958_v13, 5  ;;  %v767_v63 = vshll.u32 %v6445_v55, 16  ;;  %v8959_v0 = vshrl.u32 %v6445_v55, 16 }
  0x27   : > { %5876 = vmatmul.mubr.msk.bf16.gmra.mxu1 %vm460_vm1, %v5203_v17  ;;  %v6607_v17 = vld [vmem:[%s6360_s6 + $0xac] sm:$0xf]  ;;  %v731_v43 = vrot.slane %v729_v35, 5  ;;  %v755_v21 = vrot.slane %v753_v4, 5  ;;  %v1419_v13 = vsel %vm6546_vm6, %v6478_v22, %v1418_v3  ;;  %v5259_v4 = vrot.slane %v6442_v54, 9 }
  0x28   : > { %5879 = vmatprep.mubr.msk.bf16.mxu1 %vm460_vm1, %v5204_v56  ;;  %v6601_v56 = vsel %vm6546_vm6, %v5257_v23, %v1408_v24  ;;  %v5206_v14 = vcombine.low %v6589_v57, %v6607_v17  ;;  %v6615_v23 = vld [vmem:[%s6360_s6 + $0x54] sm:$0xf]  ;;  %v6618_v24 = vld [vmem:[%s6360_s6 + $0x58] sm:$0xf]  ;;  %v773_v12 = vrot.slane %v8959_v0, 4  ;;  %v769_v35 = vrot.slane %v767_v63, 5 }
  0x29   : > { %v5199_v15 = vcombine.low %v6615_v23, %v6618_v24  ;;  %v1422_v3 = vrot.slane %v6445_v55, 5  ;;  %vm266_vm8 = vcmask 64512   ;;  %vm5029_vm9 = vcmask 60416  }
  0x2b   : > { %5864 = vmatmul.mubr.msk.bf16.gmra.mxu0 %vm460_vm1, %v5197_v18  ;;  %v5207_v18 = vcombine.low %v6638_v38, %v6642_v30  ;;  %v777_v30 = vshll.u32 %v339_v33, 16  ;;  %v774_v38 = vor.u32 %v773_v12, %v769_v35  ;;  %v1423_v12 = vsel %vm6546_vm6, %v5259_v4, %v1422_v3  ;;  %v345_v4 = vld [vmem:[%s6360_s6 + $0x38] sm:$0x1] }
  0x2c   : > { %5867 = vmatprep.mubr.msk.bf16.mxu0 %vm460_vm1, %v5198_v58  ;;  %v1412_v58 = vsel %vm6546_vm6, %v6409_v32, %v1411_v40  ;;  %v732_v32 = vsel %vm6560_vm7, %v6434_v50, %v731_v43  ;;  %v5275_v40 = vcombine.low %v6630_v28, %v1419_v13  ;;  %v1425_v28 = vrot.slane %v339_v33, 5 }
  0x2d   : > { %v5274_v5 = vcombine.low %v6601_v56, %v1412_v58  ;;  %v5225_v0 = vcombine.low %v722_v59, %v732_v32  ;;  %v756_v56 = vsel %vm6560_vm7, %v6507_v47, %v755_v21  ;;  %v779_v22 = vrot.slane %v777_v30, 5 }
  0x2e   : > { %v5226_v58 = vcombine.low %v746_v45, %v756_v56  ;;  %v8960_v59 = vshrl.u32 %v6469_v19, 16  ;;  %v8961_v47 = vshll.u32 %v6469_v19, 16  ;;  %v775_v54 = vrot.slane %v774_v38, 4 }
  0x2f   : > { %5880 = vmatmul.mubr.msk.bf16.gmra.mxu1 %vm460_vm1, %v5205_v41  ;;  %v764_v41 = vor.u32 %v763_v39, %v760_v16  ;;  %v342_v16 = vld [vmem:[%s6360_s6 + $0x2c] sm:$0x1]  ;;  %v1424_v55 = vrot.slane %v1422_v3, 4  ;;  %v8962_v30 = vshrl.u32 %v6472_v20, 16  ;;  %v5260_v21 = vrot.slane %v6469_v19, 9 }
  0x30   : > { %5883 = vmatprep.mubr.msk.bf16.mxu1 %vm460_vm1, %v5206_v14  ;;  %v784_v63 = vrot.slane %v8960_v59, 4  ;;  %v787_v39 = vrot.slane %v8961_v47, 5  ;;  %v801_v43 = vshll.u32 %v342_v16, 16  ;;  %v1432_v59 = vrot.slane %v342_v16, 5 }
  0x31   : > { %v765_v14 = vrot.slane %v764_v41, 4  ;;  %v797_v33 = vrot.slane %v8962_v30, 4  ;;  %v1426_v38 = vsel %vm6546_vm6, %v1424_v55, %v1425_v28  ;;  %v1429_v41 = vrot.slane %v6472_v20, 5 }
  0x32   : > { %v788_v45 = vor.u32 %v787_v39, %v784_v63  ;;  %v8963_v28 = vshrl.u32 %v6495_v36, 16  ;;  %v825_v16 = vshll.u32 %v345_v4, 16  ;;  %v5261_v30 = vrot.slane %v6495_v36, 9 }
  0x33   : > { %5868 = vmatmul.mubr.msk.bf16.gmra.mxu0 %vm460_vm1, %v5199_v15  ;;  %v770_v50 = vsel %vm6560_vm7, %v765_v14, %v769_v35  ;;  %v791_v15 = vshll.u32 %v6472_v20, 16  ;;  %v5276_v35 = vcombine.low %v1423_v12, %v1426_v38  ;;  %v803_v14 = vrot.slane %v801_v43, 5  ;;  %v348_v38 = vld [vmem:[%s6360_s6 + $0x44] sm:$0x1] }
  0x34   : > { %5923 = vmatprep.mubr.msk.bf16.mxu0 %vm460_vm1, %v5274_v5  ;;  %v780_v5 = vsel %vm6560_vm7, %v775_v54, %v779_v22  ;;  %v789_v56 = vrot.slane %v788_v45, 4  ;;  %v1430_v19 = vsel %vm6546_vm6, %v5260_v21, %v1429_v41  ;;  %v808_v63 = vrot.slane %v8963_v28, 4 }
  0x35   : > { %v793_v13 = vrot.slane %v791_v15, 5  ;;  %v5227_v32 = vcombine.low %v770_v50, %v780_v5  ;;  %v8964_v20 = vshll.u32 %v6495_v36, 16  ;;  %v815_v50 = vshll.u32 %v6505_v46, 16 }
  0x36   : > { %v8965_v54 = vshrl.u32 %v6505_v46, 16  ;;  %v827_v43 = vrot.slane %v825_v16, 5  ;;  %v1436_v21 = vrot.slane %v6505_v46, 5  ;;  %v1439_v5 = vrot.slane %v345_v4, 5 }
  0x37   : > { %5884 = vmatmul.mubr.msk.bf16.gmra.mxu1 %vm460_vm1, %v5207_v18  ;;  %v798_v3 = vor.u32 %v797_v33, %v793_v13  ;;  %v1431_v18 = vrot.slane %v1429_v41, 4  ;;  %v794_v22 = vsel %vm6560_vm7, %v789_v56, %v793_v13  ;;  %v817_v45 = vrot.slane %v815_v50, 5 }
  0x38   : > { %5889 = vmatprep.mubr.msk.bf16.mxu1 %vm460_vm1, %v5225_v0  ;;  %v811_v0 = vrot.slane %v8964_v20, 5  ;;  %v821_v12 = vrot.slane %v8965_v54, 4  ;;  %v8966_v56 = vshrl.u32 %v6533_v29, 16  ;;  %v1438_v36 = vrot.slane %v1436_v21, 4 }
  0x39   : > { %v799_v47 = vrot.slane %v798_v3, 4  ;;  %v1433_v39 = vsel %vm6546_vm6, %v1431_v18, %v1432_v59  ;;  %v849_v18 = vshll.u32 %v348_v38, 16  ;;  %v1446_v54 = vrot.slane %v348_v38, 5 }
  0x3a   : > { %v5277_v55 = vcombine.low %v1430_v19, %v1433_v39  ;;  %v812_v15 = vor.u32 %v811_v0, %v808_v63  ;;  %v832_v3 = vrot.slane %v8966_v56, 4  ;;  %v1440_v59 = vsel %vm6546_vm6, %v1438_v36, %v1439_v5 }
  0x3b   : > { %5924 = vmatmul.mubr.msk.bf16.vlgmr.msra.gmra.mxu0 %vm460_vm1, %v5275_v40  ;;  %v804_v33 = vsel %vm6560_vm7, %v799_v47, %v803_v14  ;;  %v822_v40 = vor.u32 %v821_v12, %v817_v45  ;;  %v839_v14 = vshll.u32 %v6542_v48, 16  ;;  %v5262_v63 = vrot.slane %v6533_v29, 9  ;;  %v351_v12 = vld [vmem:[%s6360_s6 + $0x50] sm:$0x1] }
  0x3c   : > { %5990 = vmatpush3.bf16.msra.mxu0 %v6368_v11  ;;  %5927 = vmatprep.mubr.msk.bf16.mxu0 %vm460_vm1, %v5276_v35  ;;  %v5228_v13 = vcombine.low %v794_v22, %v804_v33  ;;  %v813_v41 = vrot.slane %v812_v15, 4  ;;  %v1437_v11 = vsel %vm6546_vm6, %v5261_v30, %v1436_v21  ;;  %v8967_v35 = vshll.u32 %v6533_v29, 16 }
  0x3d   : > { %6168 = vmatprep.subr.msk.bf16.mxu0 %vm509_vm0, %v6355_v9  ;;  %v823_v19 = vrot.slane %v822_v40, 4  ;;  %v8968_v9 = vshrl.u32 %v6542_v48, 16  ;;  %v841_v28 = vrot.slane %v839_v14, 5  ;;  %v851_v20 = vrot.slane %v849_v18, 5 }
  0x3e   : > { %v835_v46 = vrot.slane %v8967_v35, 5  ;;  %v818_v4 = vsel %vm6560_vm7, %v813_v41, %v817_v45  ;;  %v1443_v0 = vrot.slane %v6542_v48, 5  ;;  %v8970_v45 = vshll.u32 %v6580_v51, 16 }
  0x3f   : > { %5890 = vmatmul.mubr.msk.bf16.vlgmr.msra.gmra.mxu1 %vm460_vm1, %v5226_v58  ;;  %v845_v58 = vrot.slane %v8968_v9, 4  ;;  %v873_v41 = vshll.u32 %v351_v12, 16  ;;  %v5263_v40 = vrot.slane %v6580_v51, 9  ;;  %v1450_v36 = vrot.slane %v6584_v31, 5 }
  0x40   : > { %5956 = vmatpush3.bf16.msra.mxu1 %v6364_v10  ;;  %5893 = vmatprep.mubr.msk.bf16.mxu1 %vm460_vm1, %v5227_v32  ;;  %v836_v22 = vor.u32 %v835_v46, %v832_v3  ;;  %v828_v10 = vsel %vm6560_vm7, %v823_v19, %v827_v43  ;;  %v5278_v32 = vcombine.low %v1437_v11, %v1440_v59  ;;  %v1445_v16 = vrot.slane %v1443_v0, 4  ;;  %v354_v19 = vld [vmem:[%s6360_s6 + $0x5c] sm:$0x1] }
  0x41   : > { %6167 = vmatprep.subr.msk.bf16.mxu1 %vm509_vm0, %v6344_v6  ;;  %v5229_v50 = vcombine.low %v818_v4, %v828_v10  ;;  %v846_v39 = vor.u32 %v845_v58, %v841_v28  ;;  %v1444_v29 = vsel %vm6546_vm6, %v5262_v63, %v1443_v0  ;;  %v8969_v6 = vshrl.u32 %v6580_v51, 16 }
  0x42   : > { %v837_v47 = vrot.slane %v836_v22, 4  ;;  %v859_v30 = vrot.slane %v8970_v45, 5  ;;  %v863_v43 = vshll.u32 %v6584_v31, 16  ;;  %v1447_v5 = vsel %vm6546_vm6, %v1445_v16, %v1446_v54 }
  0x43   : > { %5928 = vmatmul.mubr.msk.bf16.gmra.mxu0 %vm460_vm1, %v5277_v55  ;;  %v856_v15 = vrot.slane %v8969_v6, 4  ;;  %v847_v33 = vrot.slane %v846_v39, 4  ;;  %v8971_v55 = vshrl.u32 %v6584_v31, 16  ;;  %v5279_v3 = vcombine.low %v1444_v29, %v1447_v5 }
  0x44   : > { %5931 = vmatprep.mubr.msk.bf16.mxu0 %vm460_vm1, %v5278_v32  ;;  %v842_v48 = vsel %vm6560_vm7, %v837_v47, %v841_v28  ;;  %v865_v11 = vrot.slane %v863_v43, 5  ;;  %v875_v14 = vrot.slane %v873_v41, 5  ;;  %v1453_v4 = vrot.slane %v351_v12, 5  ;;  %v357_v32 = vld [vmem:[%s6360_s6 + $0x68] sm:$0x1] }
  0x45   : > { %v869_v21 = vrot.slane %v8971_v55, 4  ;;  %v860_v38 = vor.u32 %v859_v30, %v856_v15  ;;  %v852_v56 = vsel %vm6560_vm7, %v847_v33, %v851_v20  ;;  %v1451_v51 = vsel %vm6546_vm6, %v5263_v40, %v1450_v36  ;;  %v360_v40 = vld [vmem:[%s6360_s6 + $0x74] sm:$0x1] }
  0x46   : > { %v5230_v35 = vcombine.low %v842_v48, %v852_v56  ;;  %v8972_v58 = vshrl.u32 %v6615_v23, 16  ;;  %v8973_v31 = vshll.u32 %v6615_v23, 16  ;;  %v887_v28 = vshll.u32 %v6618_v24, 16 }
  0x47   : > { %5894 = vmatmul.mubr.msk.bf16.gmra.mxu1 %vm460_vm1, %v5228_v13  ;;  %v861_v46 = vrot.slane %v860_v38, 4  ;;  %v870_v9 = vor.u32 %v869_v21, %v865_v11  ;;  %v1452_v13 = vrot.slane %v1450_v36, 4  ;;  %v8974_v63 = vshrl.u32 %v6618_v24, 16 }
  0x48   : > { %5897 = vmatprep.mubr.msk.bf16.mxu1 %vm460_vm1, %v5229_v50  ;;  %v880_v18 = vrot.slane %v8972_v58, 4  ;;  %v883_v22 = vrot.slane %v8973_v31, 5  ;;  %v897_v50 = vshll.u32 %v354_v19, 16  ;;  %v5264_v47 = vrot.slane %v6615_v23, 9 }
  0x49   : > { %v866_v59 = vsel %vm6560_vm7, %v861_v46, %v865_v11  ;;  %v893_v10 = vrot.slane %v8974_v63, 4  ;;  %v871_v20 = vrot.slane %v870_v9, 4  ;;  %v1454_v0 = vsel %vm6546_vm6, %v1452_v13, %v1453_v4  ;;  %v363_v63 = vld [vmem:[%s6360_s6 + $0x80] sm:$0x1] }
  0x4a   : > { %v5280_v39 = vcombine.low %v1451_v51, %v1454_v0  ;;  %v884_v54 = vor.u32 %v883_v22, %v880_v18  ;;  %v889_v12 = vrot.slane %v887_v28, 5  ;;  %v1457_v29 = vrot.slane %v6618_v24, 5 }
  0x4b   : > { %5932 = vmatmul.mubr.msk.bf16.gmra.mxu0 %vm460_vm1, %v5279_v3  ;;  %v876_v16 = vsel %vm6560_vm7, %v871_v20, %v875_v14  ;;  %v899_v6 = vrot.slane %v897_v50, 5  ;;  %v1460_v15 = vrot.slane %v354_v19, 5  ;;  %v921_v45 = vshll.u32 %v357_v32, 16 }
  0x4c   : > { %v5231_v30 = vcombine.low %v866_v59, %v876_v16  ;;  %5935 = vmatprep.mubr.msk.bf16.mxu0 %vm460_vm1, %v5280_v39  ;;  %v885_v48 = vrot.slane %v884_v54, 4  ;;  %v894_v33 = vor.u32 %v893_v10, %v889_v12  ;;  %v1458_v23 = vsel %vm6546_vm6, %v5264_v47, %v1457_v29 }
  0x4d   : > { %v1459_v43 = vrot.slane %v1457_v29, 4  ;;  %v923_v55 = vrot.slane %v921_v45, 5  ;;  %v1467_v24 = vrot.slane %v357_v32, 5  ;;  %v8975_v21 = vshrl.u32 %v6424_v44, 16 }
  0x4e   : > { %v890_v38 = vsel %vm6560_vm7, %v885_v48, %v889_v12  ;;  %v895_v41 = vrot.slane %v894_v33, 4  ;;  %v8976_v56 = vshll.u32 %v6424_v44, 16  ;;  %v935_v11 = vshll.u32 %v6432_v49, 16 }
  0x4f   : > { %5898 = vmatmul.mubr.msk.bf16.gmra.mxu1 %vm460_vm1, %v5230_v35  ;;  %v928_v5 = vrot.slane %v8975_v21, 4  ;;  %v1461_v36 = vsel %vm6546_vm6, %v1459_v43, %v1460_v15  ;;  %v924_v35 = vsel %vm6560_vm7, %v6462_v2, %v923_v55  ;;  %v1468_v46 = vsel %vm6546_vm6, %v6438_v52, %v1467_v24  ;;  %v366_v55 = vld [vmem:[%s6360_s6 + $0x8c] sm:$0x1] }
  0x50   : > { %5901 = vmatprep.mubr.msk.bf16.mxu1 %vm460_vm1, %v5231_v30  ;;  %v931_v3 = vrot.slane %v8976_v56, 5  ;;  %v8977_v14 = vshrl.u32 %v6432_v49, 16  ;;  %v900_v19 = vsel %vm6560_vm7, %v895_v41, %v899_v6  ;;  %v5281_v9 = vcombine.low %v1458_v23, %v1461_v36 }
  0x51   : > { %v8978_v51 = vsel %vm6560_vm7, %v6454_v61, %v6420_v42  ;;  %v5282_v58 = vcombine.low %v6657_v37, %v1468_v46  ;;  %v5232_v2 = vcombine.low %v890_v38, %v900_v19  ;;  %v937_v59 = vrot.slane %v935_v11, 5 }
  0x52   : > { %v941_v4 = vrot.slane %v8977_v14, 4  ;;  %v5233_v13 = vcombine.low %v8978_v51, %v924_v35  ;;  %v932_v18 = vor.u32 %v931_v3, %v928_v5  ;;  %v945_v31 = vshll.u32 %v360_v40, 16 }
  0x53   : > { %5936 = vmatmul.mubr.msk.bf16.gmra.mxu0 %vm460_vm1, %v5281_v9  ;;  %v5266_v52 = vrot.slane %v6424_v44, 9  ;;  %v1471_v22 = vrot.slane %v6432_v49, 5  ;;  %v1474_v28 = vrot.slane %v360_v40, 5  ;;  %v8979_v10 = vshrl.u32 %v6452_v60, 16 }
  0x54   : > { %5939 = vmatprep.mubr.msk.bf16.mxu0 %vm460_vm1, %v5282_v58  ;;  %v933_v42 = vrot.slane %v932_v18, 4  ;;  %v942_v61 = vor.u32 %v941_v4, %v937_v59  ;;  %v947_v37 = vrot.slane %v945_v31, 5  ;;  %v8980_v20 = vshll.u32 %v6452_v60, 16 }
  0x55   : > { %v952_v32 = vrot.slane %v8979_v10, 4  ;;  %v1472_v50 = vsel %vm6546_vm6, %v5266_v52, %v1471_v22  ;;  %v1473_v47 = vrot.slane %v1471_v22, 4  ;;  %v959_v44 = vshll.u32 %v6460_v1, 16 }
  0x56   : > { %v955_v0 = vrot.slane %v8980_v20, 5  ;;  %v8981_v49 = vshrl.u32 %v6460_v1, 16  ;;  %v938_v54 = vsel %vm6560_vm7, %v933_v42, %v937_v59  ;;  %v943_v12 = vrot.slane %v942_v61, 4  ;;  %v369_v59 = vld [vmem:[%s6360_s6 + $0x98] sm:$0x1] }
  0x57   : > { %5902 = vmatmul.mubr.msk.bf16.gmra.mxu1 %vm460_vm1, %v5232_v2  ;;  %v969_v16 = vshll.u32 %v363_v63, 16  ;;  %v1475_v6 = vsel %vm6546_vm6, %v1473_v47, %v1474_v28  ;;  %v961_v15 = vrot.slane %v959_v44, 5  ;;  %v5267_v45 = vrot.slane %v6452_v60, 9 }
  0x58   : > { %v965_v39 = vrot.slane %v8981_v49, 4  ;;  %v956_v29 = vor.u32 %v955_v0, %v952_v32  ;;  %5905 = vmatprep.mubr.msk.bf16.mxu1 %vm460_vm1, %v5233_v13  ;;  %v1478_v30 = vrot.slane %v6460_v1, 5  ;;  %v948_v48 = vsel %vm6560_vm7, %v943_v12, %v947_v37 }
  0x59   : > { %v5283_v33 = vcombine.low %v1472_v50, %v1475_v6  ;;  %v971_v43 = vrot.slane %v969_v16, 5  ;;  %v5234_v24 = vcombine.low %v938_v54, %v948_v48  ;;  %v1481_v40 = vrot.slane %v363_v63, 5 }
  0x5a   : > { %v957_v23 = vrot.slane %v956_v29, 4  ;;  %v966_v21 = vor.u32 %v965_v39, %v961_v15  ;;  %v1479_v5 = vsel %vm6546_vm6, %v5267_v45, %v1478_v30  ;;  %v1480_v38 = vrot.slane %v1478_v30, 4  ;;  %v372_v30 = vld [vmem:[%s6360_s6 + $0xa4] sm:$0x1] }
  0x5b   : > { %v8982_v60 = vshrl.u32 %v6483_v27, 16  ;;  %v8983_v56 = vshll.u32 %v6483_v27, 16  ;;  %5940 = vmatmul.mubr.msk.bf16.gmra.mxu0 %vm460_vm1, %v5283_v33  ;;  %v983_v36 = vshll.u32 %v6492_v34, 16  ;;  %v8984_v35 = vshrl.u32 %v6492_v34, 16 }
  0x5c   : > { %v962_v41 = vsel %vm6560_vm7, %v957_v23, %v961_v15  ;;  %v967_v11 = vrot.slane %v966_v21, 4  ;;  %v993_v14 = vshll.u32 %v366_v55, 16  ;;  %v1482_v4 = vsel %vm6546_vm6, %v1480_v38, %v1481_v40 }
  0x5d   : > { %v976_v1 = vrot.slane %v8982_v60, 4  ;;  %v979_v3 = vrot.slane %v8983_v56, 5  ;;  %v989_v46 = vrot.slane %v8984_v35, 4  ;;  %v5268_v9 = vrot.slane %v6483_v27, 9 }
  0x5e   : > { %v1485_v51 = vrot.slane %v6492_v34, 5  ;;  %v972_v13 = vsel %vm6560_vm7, %v967_v11, %v971_v43  ;;  %v5284_v58 = vcombine.low %v1479_v5, %v1482_v4  ;;  %v985_v2 = vrot.slane %v983_v36, 5 }
  0x5f   : > { %v980_v19 = vor.u32 %v979_v3, %v976_v1  ;;  %v995_v18 = vrot.slane %v993_v14, 5  ;;  %5906 = vmatmul.mubr.msk.bf16.gmra.mxu1 %vm460_vm1, %v5234_v24  ;;  %v5235_v31 = vcombine.low %v962_v41, %v972_v13  ;;  %v1488_v63 = vrot.slane %v366_v55, 5 }
  0x60   : > { %v1486_v22 = vsel %vm6546_vm6, %v5268_v9, %v1485_v51  ;;  %v1487_v28 = vrot.slane %v1485_v51, 4  ;;  %5943 = vmatprep.mubr.msk.bf16.mxu0 %vm460_vm1, %v5284_v58  ;;  %v990_v27 = vor.u32 %v989_v46, %v985_v2  ;;  %v8985_v34 = vshrl.u32 %v6514_v53, 16 }
  0x61   : > { %v981_v52 = vrot.slane %v980_v19, 4  ;;  %v8986_v32 = vshll.u32 %v6514_v53, 16  ;;  %5909 = vmatprep.mubr.msk.bf16.mxu1 %vm460_vm1, %v5235_v31  ;;  %v1007_v37 = vshll.u32 %v6525_v62, 16  ;;  %v8987_v20 = vshrl.u32 %v6525_v62, 16  ;;  %v375_v19 = vld [vmem:[%s6360_s6 + $0xb0] sm:$0x1] }
  0x62   : > { %v1000_v10 = vrot.slane %v8985_v34, 4  ;;  %v1017_v50 = vshll.u32 %v369_v59, 16  ;;  %v991_v47 = vrot.slane %v990_v27, 4  ;;  %v1489_v44 = vsel %vm6546_vm6, %v1487_v28, %v1488_v63 }
  0x63   : > { %v1003_v42 = vrot.slane %v8986_v32, 5  ;;  %v986_v61 = vsel %vm6560_vm7, %v981_v52, %v985_v2  ;;  %v1013_v0 = vrot.slane %v8987_v20, 4  ;;  %v5269_v39 = vrot.slane %v6514_v53, 9 }
  0x64   : > { %v5285_v54 = vcombine.low %v1486_v22, %v1489_v44  ;;  %v1009_v12 = vrot.slane %v1007_v37, 5  ;;  %v1019_v29 = vrot.slane %v1017_v50, 5  ;;  %v1492_v16 = vrot.slane %v6525_v62, 5 }
  0x65   : > { %v1004_v49 = vor.u32 %v1003_v42, %v1000_v10  ;;  %v996_v6 = vsel %vm6560_vm7, %v991_v47, %v995_v18  ;;  %v1495_v45 = vrot.slane %v369_v59, 5  ;;  %v8988_v48 = vshrl.u32 %v6556_v26, 16  ;;  %v378_v47 = vld [vmem:[%s6360_s6 + $0xbc] sm:$0x1] }
  0x66   : > { %v5236_v23 = vcombine.low %v986_v61, %v996_v6  ;;  %5944 = vmatmul.mubr.msk.bf16.gmra.mxu0 %vm460_vm1, %v5285_v54  ;;  %v1014_v43 = vor.u32 %v1013_v0, %v1009_v12  ;;  %v1493_v53 = vsel %vm6546_vm6, %v5269_v39, %v1492_v16  ;;  %v1494_v55 = vrot.slane %v1492_v16, 4 }
  0x67   : > { %v1005_v15 = vrot.slane %v1004_v49, 4  ;;  %v1024_v33 = vrot.slane %v8988_v48, 4  ;;  %v8989_v24 = vshll.u32 %v6556_v26, 16  ;;  %v1031_v5 = vshll.u32 %v6571_v7, 16 }
  0x68   : > { %v8990_v38 = vshrl.u32 %v6571_v7, 16  ;;  %5910 = vmatmul.mubr.msk.bf16.gmra.mxu1 %vm460_vm1, %v5236_v23  ;;  %v1015_v40 = vrot.slane %v1014_v43, 4  ;;  %v1496_v60 = vsel %vm6546_vm6, %v1494_v55, %v1495_v45  ;;  %v1041_v1 = vshll.u32 %v372_v30, 16 }
  0x69   : > { %v1010_v62 = vsel %vm6560_vm7, %v1005_v15, %v1009_v12  ;;  %v1027_v21 = vrot.slane %v8989_v24, 5  ;;  %v5270_v56 = vrot.slane %v6556_v26, 9  ;;  %v5286_v3 = vcombine.low %v1493_v53, %v1496_v60  ;;  %v8994_v12 = vld [vmem:[#allocation5_spill] sm:$0xff]  ;;  %v8997_v15 = vld [vmem:[#allocation6_spill] sm:$0xff] }
  0x6a   : > { %v1037_v41 = vrot.slane %v8990_v38, 4  ;;  %v1033_v36 = vrot.slane %v1031_v5, 5  ;;  %v1499_v35 = vrot.slane %v6571_v7, 5  ;;  %v1020_v46 = vsel %vm6560_vm7, %v1015_v40, %v1019_v29  ;;  %v6959_v60 = vld [vmem:[%s6360_s6 + $0x10] sm:$0xf] }
  0x6b   : > { %v1028_v11 = vor.u32 %v1027_v21, %v1024_v33  ;;  %v1043_v14 = vrot.slane %v1041_v1, 5  ;;  %v1502_v4 = vrot.slane %v372_v30, 5  ;;  %v8991_v9 = vshrl.u32 %v6589_v57, 16  ;;  %5947 = vmatprep.mubr.msk.bf16.mxu0 %vm460_vm1, %v5286_v3  ;;  %v6953_v21 = vld [vmem:[%s6360_s6 + $0xc] sm:$0xf] }
  0x6c   : > { %v5237_v13 = vcombine.low %v1010_v62, %v1020_v46  ;;  %v1038_v2 = vor.u32 %v1037_v41, %v1033_v36  ;;  %v1500_v26 = vsel %vm6546_vm6, %v5270_v56, %v1499_v35  ;;  %v1501_v18 = vrot.slane %v1499_v35, 4 }
  0x6d   : > { %v1048_v51 = vrot.slane %v8991_v9, 4  ;;  %v1029_v58 = vrot.slane %v1028_v11, 4  ;;  %v8992_v7 = vshll.u32 %v6589_v57, 16  ;;  %v1055_v31 = vshll.u32 %v6607_v17, 16 }
  0x6e   : > { %v8993_v52 = vshrl.u32 %v6607_v17, 16  ;;  %5913 = vmatprep.mubr.msk.bf16.mxu1 %vm460_vm1, %v5237_v13  ;;  %v1039_v27 = vrot.slane %v1038_v2, 4  ;;  %v1065_v63 = vshll.u32 %v375_v19, 16  ;;  %v5271_v34 = vrot.slane %v6589_v57, 9 }
  0x6f   : > { %v1051_v59 = vrot.slane %v8992_v7, 5  ;;  %v1034_v28 = vsel %vm6560_vm7, %v1029_v58, %v1033_v36  ;;  %v1503_v10 = vsel %vm6546_vm6, %v1501_v18, %v1502_v4  ;;  %v1057_v42 = vrot.slane %v1055_v31, 5  ;;  %v6962_v36 = vld [vmem:[%s6360_s6 + $0x14] sm:$0x1]  ;;  %v6976_v58 = vld [vmem:[%s6360_s6 + $0x18] sm:$0xf] }
  0x70   : > { %v1061_v22 = vrot.slane %v8993_v52, 4  ;;  %v1506_v61 = vrot.slane %v6607_v17, 5  ;;  %v1044_v37 = vsel %vm6560_vm7, %v1039_v27, %v1043_v14  ;;  %v5287_v20 = vcombine.low %v1500_v26, %v1503_v10  ;;  %v6988_v27 = vld [vmem:[%s6360_s6 + $0x20] sm:$0x1] }
  0x71   : > { %v1052_v32 = vor.u32 %v1051_v59, %v1048_v51  ;;  %v1067_v0 = vrot.slane %v1065_v63, 5  ;;  %v1509_v50 = vrot.slane %v375_v19, 5  ;;  %v5238_v44 = vcombine.low %v1034_v28, %v1044_v37  ;;  %v6983_v59 = vld [vmem:[%s6360_s6 + $0x1c] sm:$0xf] }
  0x72   : > { %v1062_v39 = vor.u32 %v1061_v22, %v1057_v42  ;;  %v1507_v57 = vsel %vm6546_vm6, %v5271_v34, %v1506_v61  ;;  %5948 = vmatmul.mubr.msk.bf16.gmra.mxu0 %vm460_vm1, %v5287_v20  ;;  %v1508_v54 = vrot.slane %v1506_v61, 4  ;;  %v8995_v29 = vshrl.u32 %v8994_v12, 16 }
  0x73   : > { %v1053_v49 = vrot.slane %v1052_v32, 4  ;;  %v8996_v16 = vshll.u32 %v8994_v12, 16  ;;  %v1079_v45 = vshll.u32 %v8997_v15, 16  ;;  %5914 = vmatmul.mubr.msk.bf16.gmra.mxu1 %vm460_vm1, %v5238_v44  ;;  %v8998_v33 = vshrl.u32 %v8997_v15, 16 }
  0x74   : > { %v1072_v17 = vrot.slane %v8995_v29, 4  ;;  %v1063_v48 = vrot.slane %v1062_v39, 4  ;;  %v1089_v43 = vshll.u32 %v378_v47, 16  ;;  %v1510_v53 = vsel %vm6546_vm6, %v1508_v54, %v1509_v50  ;;  %v7000_v50 = vld [vmem:[%s6360_s6 + $0x28] sm:$0xf] }
  0x75   : > { %v1075_v6 = vrot.slane %v8996_v16, 5  ;;  %v1058_v30 = vsel %vm6560_vm7, %v1053_v49, %v1057_v42  ;;  %v1085_v23 = vrot.slane %v8998_v33, 4  ;;  %v1081_v62 = vrot.slane %v1079_v45, 5  ;;  %v6993_v42 = vld [vmem:[%s6360_s6 + $0x24] sm:$0xf] }
  0x76   : > { %v5272_v24 = vrot.slane %v8994_v12, 9  ;;  %v1068_v5 = vsel %vm6560_vm7, %v1063_v48, %v1067_v0  ;;  %v5288_v38 = vcombine.low %v1507_v57, %v1510_v53  ;;  %v1091_v41 = vrot.slane %v1089_v43, 5 }
  0x77   : > { %v1076_v55 = vor.u32 %v1075_v6, %v1072_v17  ;;  %v1513_v40 = vrot.slane %v8997_v15, 5  ;;  %v5239_v1 = vcombine.low %v1058_v30, %v1068_v5  ;;  %v1086_v3 = vor.u32 %v1085_v23, %v1081_v62  ;;  %v7014_v23 = vld [vmem:[%s6360_s6 + $0x2c] sm:$0x1] }
  0x78   : > { %v1516_v11 = vrot.slane %v378_v47, 5  ;;  %5951 = vmatprep.mubr.msk.bf16.mxu0 %vm460_vm1, %v5288_v38  ;;  %v5355_v14 = vcombine.low %v6953_v21, %v6959_v60  ;;  %v2188_v4 = vshrl.u32 %v6953_v21, 16  ;;  %v2191_v51 = vshll.u32 %v6953_v21, 16 }
  0x79   : > { %v1077_v56 = vrot.slane %v1076_v55, 4  ;;  %v1514_v35 = vsel %vm6546_vm6, %v5272_v24, %v1513_v40  ;;  %v1515_v46 = vrot.slane %v1513_v40, 4  ;;  %5917 = vmatprep.mubr.msk.bf16.mxu1 %vm460_vm1, %v5239_v1  ;;  %v1087_v9 = vrot.slane %v1086_v3, 4  ;;  %v7020_v24 = vld [vmem:[%s6360_s6 + $0x30] sm:$0xf] }
  0x7a   : > { %v2201_v13 = vshrl.u32 %v6959_v60, 16  ;;  %v2190_v26 = vrot.slane %v2188_v4, 4  ;;  %v2197_v18 = vshll.u32 %v6959_v60, 16  ;;  %v2207_v7 = vshll.u32 %v6962_v36, 16  ;;  %v7023_v1 = vld [vmem:[%s6360_s6 + $0x34] sm:$0xf] }
  0x7b   : > { %v1082_v19 = vsel %vm6560_vm7, %v1077_v56, %v1081_v62  ;;  %v1517_v2 = vsel %vm6546_vm6, %v1515_v46, %v1516_v11  ;;  %v1092_v31 = vsel %vm6560_vm7, %v1087_v9, %v1091_v41  ;;  %v2193_v22 = vrot.slane %v2191_v51, 5  ;;  %v7034_v9 = vld [vmem:[%s6360_s6 + $0x38] sm:$0x1]  ;;  %v7039_v51 = vld [vmem:[%s8890_s1 + $0xe] sm:$0x3] }
  0x7c   : > { %v5289_v52 = vcombine.low %v1514_v35, %v1517_v2  ;;  %v2203_v28 = vrot.slane %v2201_v13, 4  ;;  %v5240_v63 = vcombine.low %v1082_v19, %v1092_v31  ;;  %v2199_v34 = vrot.slane %v2197_v18, 5 }
  0x7d   : > { %v2209_v10 = vrot.slane %v2207_v7, 5  ;;  %v5356_v32 = vcombine.low %v6976_v58, %v6983_v59  ;;  %v2194_v61 = vor.u32 %v2193_v22, %v2190_v26  ;;  %v2212_v37 = vshrl.u32 %v6976_v58, 16  ;;  %v7046_v7 = vld [vmem:[%s6360_s6 + $0x3c] sm:$0xf] }
  0x7e   : > { %5952 = vmatmul.mubr.msk.bf16.gmra.mxu0 %vm460_vm1, %v5289_v52  ;;  %v2215_v20 = vshll.u32 %v6976_v58, 16  ;;  %v2225_v0 = vshrl.u32 %v6983_v59, 16  ;;  %5918 = vmatmul.mubr.msk.bf16.gmra.mxu1 %vm460_vm1, %v5240_v63  ;;  %v2204_v47 = vor.u32 %v2203_v28, %v2199_v34  ;;  %v2221_v44 = vshll.u32 %v6983_v59, 16  ;;  %v8999_v52 = vld [vmem:[#allocation3_spill] sm:$0xff] }
  0x7f   : > { %v2231_v49 = vshll.u32 %v6988_v27, 16  ;;  %v5357_v39 = vcombine.low %v6993_v42, %v7000_v50  ;;  %5957 = vmatprep.mubr.msk.bf16.mxu1 %vm460_vm1, %v5355_v14  ;;  %v2195_v57 = vrot.slane %v2194_v61, 4  ;;  %v2214_v54 = vrot.slane %v2212_v37, 4 }
  0x80   : > { %v2217_v12 = vrot.slane %v2215_v20, 5  ;;  %v2227_v29 = vrot.slane %v2225_v0, 4  ;;  %v2205_v17 = vrot.slane %v2204_v47, 4  ;;  %v2223_v16 = vrot.slane %v2221_v44, 5  ;;  %v7060_v20 = vld [vmem:[%s8890_s1 + $0x10] sm:$0x3] }
  0x81   : > { %v2233_v6 = vrot.slane %v2231_v49, 5  ;;  %v2236_v15 = vshrl.u32 %v6993_v42, 16  ;;  %v2200_v45 = vsel %vm6560_vm7, %v2195_v57, %v2199_v34  ;;  %v2239_v48 = vshll.u32 %v6993_v42, 16  ;;  %v7051_v34 = vld [vmem:[%s6360_s6 + $0x40] sm:$0xf]  ;;  %v9000_v57 = vld [vmem:[#allocation4_spill] sm:$0xff] }
  0x82   : > { %v2218_v30 = vor.u32 %v2217_v12, %v2214_v54  ;;  %v2249_v33 = vshrl.u32 %v7000_v50, 16  ;;  %v2210_v43 = vsel %vm6560_vm7, %v2205_v17, %v2209_v10  ;;  %v2228_v53 = vor.u32 %v2227_v29, %v2223_v16 }
  0x83   : > { %v2238_v55 = vrot.slane %v2236_v15, 4  ;;  %v2245_v62 = vshll.u32 %v7000_v50, 16  ;;  %v5388_v5 = vcombine.low %v2200_v45, %v2210_v43  ;;  %v2241_v41 = vrot.slane %v2239_v48, 5 }
  0x84   : > { %v2219_v38 = vrot.slane %v2218_v30, 4  ;;  %v2251_v40 = vrot.slane %v2249_v33, 4  ;;  %v2229_v56 = vrot.slane %v2228_v53, 4  ;;  %v2255_v11 = vshll.u32 %v7014_v23, 16 }
  0x85   : > { %v2247_v3 = vrot.slane %v2245_v62, 5  ;;  %v5358_v35 = vcombine.low %v7020_v24, %v7023_v1  ;;  %5991 = vmatprep.mubr.msk.bf16.mxu0 %vm460_vm1, %v5388_v5  ;;  %v2242_v14 = vor.u32 %v2241_v41, %v2238_v55  ;;  %v2260_v4 = vshrl.u32 %v7020_v24, 16  ;;  %v7084_v55 = vld [vmem:[%s6360_s6 + $0x4c] sm:$0xf] }
  0x86   : > { %v2224_v46 = vsel %vm6560_vm7, %v2219_v38, %v2223_v16  ;;  %v2263_v19 = vshll.u32 %v7020_v24, 16  ;;  %5958 = vmatmul.mubr.msk.bf16.vlgmr.msra.gmra.mxu1 %vm460_vm1, %v5356_v32  ;;  %v2234_v13 = vsel %vm6560_vm7, %v2229_v56, %v2233_v6  ;;  %v2257_v26 = vrot.slane %v2255_v11, 5  ;;  %v7076_v16 = vld [vmem:[%s6360_s6 + $0x48] sm:$0xf] }
  0x87   : > { %v2252_v2 = vor.u32 %v2251_v40, %v2247_v3  ;;  %v2273_v18 = vshrl.u32 %v7023_v1, 16  ;;  %v5389_v31 = vcombine.low %v2224_v46, %v2234_v13  ;;  %6024 = vmatpush3.bf16.msra.mxu1 %v8999_v52  ;;  %5961 = vmatprep.mubr.msk.bf16.mxu1 %vm460_vm1, %v5357_v39  ;;  %v2243_v22 = vrot.slane %v2242_v14, 4  ;;  %v7069_v39 = vld [vmem:[%s6360_s6 + $0x44] sm:$0x1]  ;;  %v7093_v40 = vld [vmem:[%s6360_s6 + $0x50] sm:$0x1] }
  0x88   : > { %v2262_v28 = vrot.slane %v2260_v4, 4  ;;  %v2265_v63 = vrot.slane %v2263_v19, 5  ;;  %v2269_v32 = vshll.u32 %v7023_v1, 16  ;;  %v2279_v37 = vshll.u32 %v7034_v9, 16  ;;  %6169 = vmatprep.subr.msk.bf16.mxu1 %vm509_vm0, %v7039_v51  ;;  %v7107_v52 = vld [vmem:[%s6360_s6 + $0x58] sm:$0xf] }
  0x89   : > { %v2253_v10 = vrot.slane %v2252_v2, 4  ;;  %v2275_v61 = vrot.slane %v2273_v18, 4  ;;  %5992 = vmatmul.mubr.msk.bf16.vlgmr.msra.gmra.mxu0 %vm460_vm1, %v5389_v31  ;;  %v2248_v0 = vsel %vm6560_vm7, %v2243_v22, %v2247_v3  ;;  %v5359_v44 = vcombine.low %v7046_v7, %v7051_v34  ;;  %v7104_v31 = vld [vmem:[%s6360_s6 + $0x54] sm:$0xf] }
  0x8a   : > { %v2266_v47 = vor.u32 %v2265_v63, %v2262_v28  ;;  %v2284_v49 = vshrl.u32 %v7046_v7, 16  ;;  %6058 = vmatpush3.bf16.msra.mxu0 %v9000_v57  ;;  %v2271_v12 = vrot.slane %v2269_v32, 5  ;;  %v2281_v29 = vrot.slane %v2279_v37, 5  ;;  %v7110_v32 = vld [vmem:[%s6360_s6 + $0x5c] sm:$0x1] }
  0x8b   : > { %v2258_v54 = vsel %vm6560_vm7, %v2253_v10, %v2257_v26  ;;  %v2287_v17 = vshll.u32 %v7046_v7, 16  ;;  %v2297_v45 = vshrl.u32 %v7051_v34, 16  ;;  %6170 = vmatprep.subr.msk.bf16.mxu0 %vm509_vm0, %v7060_v20  ;;  %v2293_v43 = vshll.u32 %v7051_v34, 16 }
  0x8c   : > { %v5390_v6 = vcombine.low %v2248_v0, %v2258_v54  ;;  %v2267_v15 = vrot.slane %v2266_v47, 4  ;;  %v2286_v30 = vrot.slane %v2284_v49, 4  ;;  %v2276_v48 = vor.u32 %v2275_v61, %v2271_v12 }
  0x8d   : > { %v2289_v33 = vrot.slane %v2287_v17, 5  ;;  %v2303_v53 = vshll.u32 %v7069_v39, 16  ;;  %v2299_v5 = vrot.slane %v2297_v45, 4  ;;  %v5360_v38 = vcombine.low %v7076_v16, %v7084_v55 }
  0x8e   : > { %5995 = vmatprep.mubr.msk.bf16.mxu0 %vm460_vm1, %v5390_v6  ;;  %v2272_v62 = vsel %vm6560_vm7, %v2267_v15, %v2271_v12  ;;  %v2308_v41 = vshrl.u32 %v7076_v16, 16  ;;  %5962 = vmatmul.mubr.msk.bf16.gmra.mxu1 %vm460_vm1, %v5358_v35  ;;  %v2277_v56 = vrot.slane %v2276_v48, 4  ;;  %v2295_v11 = vrot.slane %v2293_v43, 5  ;;  %v7125_v15 = vld [vmem:[%s6360_s6 + $0x60] sm:$0xf] }
  0x8f   : > { %v2290_v3 = vor.u32 %v2289_v33, %v2286_v30  ;;  %v2305_v46 = vrot.slane %v2303_v53, 5  ;;  %5965 = vmatprep.mubr.msk.bf16.mxu1 %vm460_vm1, %v5359_v44  ;;  %v2311_v14 = vshll.u32 %v7076_v16, 16  ;;  %v2321_v4 = vshrl.u32 %v7084_v55, 16  ;;  %v7128_v43 = vld [vmem:[%s6360_s6 + $0x64] sm:$0xf] }
  0x90   : > { %v2310_v19 = vrot.slane %v2308_v41, 4  ;;  %v2317_v13 = vshll.u32 %v7084_v55, 16  ;;  %v2282_v2 = vsel %vm6560_vm7, %v2277_v56, %v2281_v29  ;;  %v2300_v18 = vor.u32 %v2299_v5, %v2295_v11  ;;  %v7132_v56 = vld [vmem:[%s6360_s6 + $0x68] sm:$0x1] }
  0x91   : > { %v2291_v26 = vrot.slane %v2290_v3, 4  ;;  %v2327_v35 = vshll.u32 %v7093_v40, 16  ;;  %v5391_v22 = vcombine.low %v2272_v62, %v2282_v2  ;;  %v2313_v28 = vrot.slane %v2311_v14, 5  ;;  %v7145_v2 = vld [vmem:[%s6360_s6 + $0x6c] sm:$0xf] }
  0x92   : > { %v2319_v63 = vrot.slane %v2317_v13, 5  ;;  %v2323_v10 = vrot.slane %v2321_v4, 4  ;;  %v2301_v37 = vrot.slane %v2300_v18, 4  ;;  %v5361_v47 = vcombine.low %v7104_v31, %v7107_v52 }
  0x93   : > { %v2296_v61 = vsel %vm6560_vm7, %v2291_v26, %v2295_v11  ;;  %v2329_v0 = vrot.slane %v2327_v35, 5  ;;  %5996 = vmatmul.mubr.msk.bf16.gmra.mxu0 %vm460_vm1, %v5391_v22  ;;  %v2314_v44 = vor.u32 %v2313_v28, %v2310_v19  ;;  %v2332_v57 = vshrl.u32 %v7104_v31, 16  ;;  %v7151_v28 = vld [vmem:[%s6360_s6 + $0x70] sm:$0xf] }
  0x94   : > { %v2324_v49 = vor.u32 %v2323_v10, %v2319_v63  ;;  %v2335_v54 = vshll.u32 %v7104_v31, 16  ;;  %v2306_v12 = vsel %vm6560_vm7, %v2301_v37, %v2305_v46  ;;  %v2345_v29 = vshrl.u32 %v7107_v52, 16 }
  0x95   : > { %v2341_v17 = vshll.u32 %v7107_v52, 16  ;;  %v2351_v6 = vshll.u32 %v7110_v32, 16  ;;  %v5392_v45 = vcombine.low %v2296_v61, %v2306_v12  ;;  %v2315_v30 = vrot.slane %v2314_v44, 4 }
  0x96   : > { %v2325_v48 = vrot.slane %v2324_v49, 4  ;;  %v2334_v33 = vrot.slane %v2332_v57, 4  ;;  %5966 = vmatmul.mubr.msk.bf16.gmra.mxu1 %vm460_vm1, %v5360_v38  ;;  %v2337_v53 = vrot.slane %v2335_v54, 5  ;;  %v2347_v5 = vrot.slane %v2345_v29, 4  ;;  %v7158_v57 = vld [vmem:[%s6360_s6 + $0x74] sm:$0x1] }
  0x97   : > { %v2343_v62 = vrot.slane %v2341_v17, 5  ;;  %v2353_v41 = vrot.slane %v2351_v6, 5  ;;  %5999 = vmatprep.mubr.msk.bf16.mxu0 %vm460_vm1, %v5392_v45  ;;  %v2320_v3 = vsel %vm6560_vm7, %v2315_v30, %v2319_v63  ;;  %5969 = vmatprep.mubr.msk.bf16.mxu1 %vm460_vm1, %v5361_v47  ;;  %v5362_v38 = vcombine.low %v7125_v15, %v7128_v43  ;;  %v7166_v6 = vld [vmem:[%s6360_s6 + $0x78] sm:$0xf] }
  0x98   : > { %v2330_v11 = vsel %vm6560_vm7, %v2325_v48, %v2329_v0  ;;  %v2356_v46 = vshrl.u32 %v7125_v15, 16  ;;  %v2338_v4 = vor.u32 %v2337_v53, %v2334_v33  ;;  %v2359_v13 = vshll.u32 %v7125_v15, 16 }
  0x99   : > { %v5393_v14 = vcombine.low %v2320_v3, %v2330_v11  ;;  %v2348_v19 = vor.u32 %v2347_v5, %v2343_v62  ;;  %v2369_v26 = vshrl.u32 %v7128_v43, 16  ;;  %v2365_v35 = vshll.u32 %v7128_v43, 16 }
  0x9a   : > { %v2358_v18 = vrot.slane %v2356_v46, 4  ;;  %v2375_v22 = vshll.u32 %v7132_v56, 16  ;;  %v2339_v63 = vrot.slane %v2338_v4, 4  ;;  %v2361_v61 = vrot.slane %v2359_v13, 5 }
  0x9b   : > { %v2349_v10 = vrot.slane %v2348_v19, 4  ;;  %v5363_v37 = vcombine.low %v7145_v2, %v7151_v28  ;;  %6000 = vmatmul.mubr.msk.bf16.gmra.mxu0 %vm460_vm1, %v5393_v14  ;;  %v2367_v0 = vrot.slane %v2365_v35, 5  ;;  %v2371_v47 = vrot.slane %v2369_v26, 4 }
  0x9c   : > { %v2377_v44 = vrot.slane %v2375_v22, 5  ;;  %v2380_v49 = vshrl.u32 %v7145_v2, 16  ;;  %v2344_v54 = vsel %vm6560_vm7, %v2339_v63, %v2343_v62  ;;  %v2362_v29 = vor.u32 %v2361_v61, %v2358_v18  ;;  %v7183_v18 = vld [vmem:[%s6360_s6 + $0x80] sm:$0x1]  ;;  %v7190_v61 = vld [vmem:[%s6360_s6 + $0x84] sm:$0xf] }
  0x9d   : > { %v2354_v12 = vsel %vm6560_vm7, %v2349_v10, %v2353_v41  ;;  %v2383_v17 = vshll.u32 %v7145_v2, 16  ;;  %v2372_v30 = vor.u32 %v2371_v47, %v2367_v0  ;;  %v2393_v48 = vshrl.u32 %v7151_v28, 16  ;;  %v7173_v41 = vld [vmem:[%s6360_s6 + $0x7c] sm:$0xf] }
  0x9e   : > { %v5394_v45 = vcombine.low %v2344_v54, %v2354_v12  ;;  %v2382_v33 = vrot.slane %v2380_v49, 4  ;;  %5970 = vmatmul.mubr.msk.bf16.gmra.mxu1 %vm460_vm1, %v5362_v38  ;;  %v2363_v53 = vrot.slane %v2362_v29, 4  ;;  %v2389_v62 = vshll.u32 %v7151_v28, 16  ;;  %v7194_v54 = vld [vmem:[%s6360_s6 + $0x88] sm:$0xf] }
  0x9f   : > { %v2385_v5 = vrot.slane %v2383_v17, 5  ;;  %v2399_v3 = vshll.u32 %v7158_v57, 16  ;;  %v2373_v11 = vrot.slane %v2372_v30, 4  ;;  %5973 = vmatprep.mubr.msk.bf16.mxu1 %vm460_vm1, %v5363_v37  ;;  %v2395_v46 = vrot.slane %v2393_v48, 4 }
  0xa0   : > { %6003 = vmatprep.mubr.msk.bf16.mxu0 %vm460_vm1, %v5394_v45  ;;  %v5364_v14 = vcombine.low %v7166_v6, %v7173_v41  ;;  %v2404_v38 = vshrl.u32 %v7166_v6, 16  ;;  %v2368_v4 = vsel %vm6560_vm7, %v2363_v53, %v2367_v0  ;;  %v2391_v13 = vrot.slane %v2389_v62, 5 }
  0xa1   : > { %v2386_v19 = vor.u32 %v2385_v5, %v2382_v33  ;;  %v2401_v26 = vrot.slane %v2399_v3, 5  ;;  %v2378_v35 = vsel %vm6560_vm7, %v2373_v11, %v2377_v44  ;;  %v2407_v22 = vshll.u32 %v7166_v6, 16  ;;  %v7206_v11 = vld [vmem:[%s6360_s6 + $0x8c] sm:$0x1] }
  0xa2   : > { %v2417_v63 = vshrl.u32 %v7173_v41, 16  ;;  %v2406_v10 = vrot.slane %v2404_v38, 4  ;;  %v5395_v37 = vcombine.low %v2368_v4, %v2378_v35  ;;  %v2396_v49 = vor.u32 %v2395_v46, %v2391_v13 }
  0xa3   : > { %v2387_v47 = vrot.slane %v2386_v19, 4  ;;  %v2413_v0 = vshll.u32 %v7173_v41, 16  ;;  %v2409_v12 = vrot.slane %v2407_v22, 5  ;;  %v2423_v17 = vshll.u32 %v7183_v18, 16 }
  0xa4   : > { %v2419_v29 = vrot.slane %v2417_v63, 4  ;;  %v5365_v44 = vcombine.low %v7190_v61, %v7194_v54  ;;  %6004 = vmatmul.mubr.msk.bf16.gmra.mxu0 %vm460_vm1, %v5395_v37  ;;  %v2397_v30 = vrot.slane %v2396_v49, 4  ;;  %v2428_v33 = vshrl.u32 %v7190_v61, 16  ;;  %v7217_v37 = vld [vmem:[%s6360_s6 + $0x94] sm:$0xf] }
  0xa5   : > { %v2392_v45 = vsel %vm6560_vm7, %v2387_v47, %v2391_v13  ;;  %v2415_v48 = vrot.slane %v2413_v0, 5  ;;  %v2410_v53 = vor.u32 %v2409_v12, %v2406_v10  ;;  %v2425_v5 = vrot.slane %v2423_v17, 5  ;;  %v7213_v13 = vld [vmem:[%s6360_s6 + $0x90] sm:$0xf]  ;;  %9001 = vst [vmem:[#allocation5_spill] sm:$0xff] %v7217_v37 }
  0xa6   : > { %v2431_v62 = vshll.u32 %v7190_v61, 16  ;;  %v2441_v3 = vshrl.u32 %v7194_v54, 16  ;;  %v2402_v46 = vsel %vm6560_vm7, %v2397_v30, %v2401_v26  ;;  %5974 = vmatmul.mubr.msk.bf16.gmra.mxu1 %vm460_vm1, %v5364_v14  ;;  %v2430_v4 = vrot.slane %v2428_v33, 4 }
  0xa7   : > { %v2420_v38 = vor.u32 %v2419_v29, %v2415_v48  ;;  %v2437_v19 = vshll.u32 %v7194_v54, 16  ;;  %v5396_v35 = vcombine.low %v2392_v45, %v2402_v46  ;;  %v2411_v22 = vrot.slane %v2410_v53, 4  ;;  %5977 = vmatprep.mubr.msk.bf16.mxu1 %vm460_vm1, %v5365_v44  ;;  %v7228_v44 = vld [vmem:[%s6360_s6 + $0x98] sm:$0x1] }
  0xa8   : > { %v2433_v63 = vrot.slane %v2431_v62, 5  ;;  %v2443_v10 = vrot.slane %v2441_v3, 4  ;;  %v2447_v14 = vshll.u32 %v7206_v11, 16  ;;  %v5366_v49 = vcombine.low %v7213_v13, %v7217_v37  ;;  %9002 = vst [vmem:[#allocation6_spill] sm:$0xff] %v7228_v44  ;;  %v7234_v62 = vld [vmem:[%s6360_s6 + $0x9c] sm:$0xf] }
  0xa9   : > { %v2421_v47 = vrot.slane %v2420_v38, 4  ;;  %v2439_v26 = vrot.slane %v2437_v19, 5  ;;  %6007 = vmatprep.mubr.msk.bf16.mxu0 %vm460_vm1, %v5396_v35  ;;  %v2416_v0 = vsel %vm6560_vm7, %v2411_v22, %v2415_v48  ;;  %v2452_v29 = vshrl.u32 %v7213_v13, 16  ;;  %9003 = vst [vmem:[#allocation3_spill] sm:$0xff] %v7234_v62 }
  0xaa   : > { %v2434_v12 = vor.u32 %v2433_v63, %v2430_v4  ;;  %v2455_v17 = vshll.u32 %v7213_v13, 16  ;;  %v2449_v33 = vrot.slane %v2447_v14, 5  ;;  %v2465_v53 = vshrl.u32 %v7217_v37, 16  ;;  %v7239_v63 = vld [vmem:[%s6360_s6 + $0xa0] sm:$0xf] }
  0xab   : > { %v2426_v45 = vsel %vm6560_vm7, %v2421_v47, %v2425_v5  ;;  %v2444_v30 = vor.u32 %v2443_v10, %v2439_v26  ;;  %v2454_v46 = vrot.slane %v2452_v29, 4  ;;  %v2461_v19 = vshll.u32 %v7217_v37, 16  ;;  %9004 = vst [vmem:[#allocation4_spill] sm:$0xff] %v7239_v63  ;;  %v7280_v37 = vld [vmem:[%s6360_s6 + $0xb4] sm:$0xf] }
  0xac   : > { %v5397_v3 = vcombine.low %v2416_v0, %v2426_v45  ;;  %v2435_v48 = vrot.slane %v2434_v12, 4  ;;  %v2457_v38 = vrot.slane %v2455_v17, 5  ;;  %v2467_v35 = vrot.slane %v2465_v53, 4  ;;  %v7248_v0 = vld [vmem:[%s6360_s6 + $0xa4] sm:$0x1]  ;;  %9008 = vst [vmem:[#allocation10_spill] sm:$0xff] %v7280_v37 }
  0xad   : > { %v2445_v4 = vrot.slane %v2444_v30, 4  ;;  %v2471_v22 = vshll.u32 %v7228_v44, 16  ;;  %v5367_v47 = vcombine.low %v7234_v62, %v7239_v63  ;;  %v2476_v14 = vshrl.u32 %v7234_v62, 16  ;;  %9005 = vst [vmem:[#allocation7_spill] sm:$0xff] %v7248_v0  ;;  %v7255_v30 = vld [vmem:[%s6360_s6 + $0xa8] sm:$0xf] }
  0xae   : > { %6008 = vmatmul.mubr.msk.bf16.gmra.mxu0 %vm460_vm1, %v5397_v3  ;;  %v2440_v5 = vsel %vm6560_vm7, %v2435_v48, %v2439_v26  ;;  %v2458_v10 = vor.u32 %v2457_v38, %v2454_v46  ;;  %5978 = vmatmul.mubr.msk.bf16.gmra.mxu1 %vm460_vm1, %v5366_v49  ;;  %v2463_v29 = vrot.slane %v2461_v19, 5  ;;  %v2479_v45 = vshll.u32 %v7234_v62, 16  ;;  %9006 = vst [vmem:[#allocation8_spill] sm:$0xff] %v7255_v30 }
  0xaf   : > { %v2450_v12 = vsel %vm6560_vm7, %v2445_v4, %v2449_v33  ;;  %v2473_v17 = vrot.slane %v2471_v22, 5  ;;  %5981 = vmatprep.mubr.msk.bf16.mxu1 %vm460_vm1, %v5367_v47  ;;  %v2489_v3 = vshrl.u32 %v7239_v63, 16  ;;  %v2478_v48 = vrot.slane %v2476_v14, 4  ;;  %v7262_v4 = vld [vmem:[%s6360_s6 + $0xac] sm:$0xf] }
  0xb0   : > { %v5398_v26 = vcombine.low %v2440_v5, %v2450_v12  ;;  %v2459_v53 = vrot.slane %v2458_v10, 4  ;;  %v2468_v46 = vor.u32 %v2467_v35, %v2463_v29  ;;  %v2481_v38 = vrot.slane %v2479_v45, 5  ;;  %9007 = vst [vmem:[#allocation9_spill] sm:$0xff] %v7262_v4  ;;  %v7271_v10 = vld [vmem:[%s6360_s6 + $0xb0] sm:$0x1] }
  0xb1   : > { %v2485_v33 = vshll.u32 %v7239_v63, 16  ;;  %v2495_v49 = vshll.u32 %v7248_v0, 16  ;;  %v2491_v22 = vrot.slane %v2489_v3, 4  ;;  %v5368_v5 = vcombine.low %v7255_v30, %v7262_v4 }
  0xb2   : > { %6011 = vmatprep.mubr.msk.bf16.mxu0 %vm460_vm1, %v5398_v26  ;;  %v2464_v19 = vsel %vm6560_vm7, %v2459_v53, %v2463_v29  ;;  %v2500_v35 = vshrl.u32 %v7255_v30, 16  ;;  %v2469_v47 = vrot.slane %v2468_v46, 4  ;;  %v2482_v14 = vor.u32 %v2481_v38, %v2478_v48  ;;  %v7283_v48 = vld [vmem:[%s6360_s6 + $0xb8] sm:$0xf] }
  0xb3   : > { %v2487_v12 = vrot.slane %v2485_v33, 5  ;;  %v2497_v45 = vrot.slane %v2495_v49, 5  ;;  %v2503_v26 = vshll.u32 %v7255_v30, 16  ;;  %v2513_v0 = vshrl.u32 %v7262_v4, 16  ;;  %v7286_v30 = vld [vmem:[%s6360_s6 + $0xbc] sm:$0x1] }
  0xb4   : > { %v2502_v29 = vrot.slane %v2500_v35, 4  ;;  %v2509_v53 = vshll.u32 %v7262_v4, 16  ;;  %v2474_v3 = vsel %vm6560_vm7, %v2469_v47, %v2473_v17  ;;  %v2483_v63 = vrot.slane %v2482_v14, 4  ;;  %9009 = vst [vmem:[#allocation11_spill] sm:$0xff] %v7286_v30 }
  0xb5   : > { %v2492_v62 = vor.u32 %v2491_v22, %v2487_v12  ;;  %v2519_v44 = vshll.u32 %v7271_v10, 16  ;;  %v5399_v46 = vcombine.low %v2464_v19, %v2474_v3  ;;  %v2505_v38 = vrot.slane %v2503_v26, 5 }
  0xb6   : > { %v2511_v33 = vrot.slane %v2509_v53, 5  ;;  %v2515_v49 = vrot.slane %v2513_v0, 4  ;;  %v2488_v35 = vsel %vm6560_vm7, %v2483_v63, %v2487_v12  ;;  %5982 = vmatmul.mubr.msk.bf16.gmra.mxu1 %vm460_vm1, %v5368_v5  ;;  %v5369_v22 = vcombine.low %v7280_v37, %v7283_v48  ;;  %v7303_v12 = vld [vmem:[%s6360_s6 + $0xc0] sm:$0xf] }
  0xb7   : > { %v2493_v4 = vrot.slane %v2492_v62, 4  ;;  %v2521_v17 = vrot.slane %v2519_v44, 5  ;;  %6012 = vmatmul.mubr.msk.bf16.gmra.mxu0 %vm460_vm1, %v5399_v46  ;;  %v2506_v19 = vor.u32 %v2505_v38, %v2502_v29  ;;  %v2524_v0 = vshrl.u32 %v7280_v37, 16  ;;  %v7306_v46 = vld [vmem:[%s6360_s6 + $0xc4] sm:$0xf] }
  0xb8   : > { %v2516_v47 = vor.u32 %v2515_v49, %v2511_v33  ;;  %v2527_v14 = vshll.u32 %v7280_v37, 16  ;;  %5985 = vmatprep.mubr.msk.bf16.mxu1 %vm460_vm1, %v5369_v22  ;;  %v2537_v44 = vshrl.u32 %v7283_v48, 16  ;;  %v2533_v62 = vshll.u32 %v7283_v48, 16 }
  0xb9   : > { %v2498_v63 = vsel %vm6560_vm7, %v2493_v4, %v2497_v45  ;;  %v2543_v5 = vshll.u32 %v7286_v30, 16  ;;  %v2507_v29 = vrot.slane %v2506_v19, 4  ;;  %v2526_v3 = vrot.slane %v2524_v0, 4  ;;  %v7309_v45 = vld [vmem:[%s6360_s6 + $0xc8] sm:$0x1] }
  0xba   : > { %v5400_v26 = vcombine.low %v2488_v35, %v2498_v63  ;;  %v2517_v53 = vrot.slane %v2516_v47, 4  ;;  %v2529_v38 = vrot.slane %v2527_v14, 5  ;;  %v2535_v49 = vrot.slane %v2533_v62, 5  ;;  %9010 = vst [vmem:[#allocation12_spill] sm:$0xff] %v7309_v45 }
  0xbb   : > { %v2539_v37 = vrot.slane %v2537_v44, 4  ;;  %v2545_v4 = vrot.slane %v2543_v5, 5  ;;  %v2512_v22 = vsel %vm6560_vm7, %v2507_v29, %v2511_v33  ;;  %v5370_v35 = vcombine.low %v7303_v12, %v7306_v46 }
  0xbc   : > { %6015 = vmatprep.mubr.msk.bf16.mxu0 %vm460_vm1, %v5400_v26  ;;  %v2522_v30 = vsel %vm6560_vm7, %v2517_v53, %v2521_v17  ;;  %v2548_v19 = vshrl.u32 %v7303_v12, 16  ;;  %v2530_v0 = vor.u32 %v2529_v38, %v2526_v3  ;;  %v2551_v63 = vshll.u32 %v7303_v12, 16 }
  0xbd   : > { %v5401_v47 = vcombine.low %v2512_v22, %v2522_v30  ;;  %v2540_v14 = vor.u32 %v2539_v37, %v2535_v49  ;;  %v2561_v44 = vshrl.u32 %v7306_v46, 16  ;;  %v2557_v33 = vshll.u32 %v7306_v46, 16  ;;  %v7326_v30 = vld [vmem:[%s6360_s6 + $0x18] sm:$0xf] }
  0xbe   : > { %v2550_v62 = vrot.slane %v2548_v19, 4  ;;  %v2567_v5 = vshll.u32 %v7309_v45, 16  ;;  %v2531_v17 = vrot.slane %v2530_v0, 4  ;;  %5986 = vmatmul.mubr.msk.bf16.gmra.mxu1 %vm460_vm1, %v5370_v35  ;;  %v2553_v29 = vrot.slane %v2551_v63, 5  ;;  %v7331_v19 = vld [vmem:[%s6360_s6 + $0x1c] sm:$0xf] }
  0xbf   : > { %v2541_v26 = vrot.slane %v2540_v14, 4  ;;  %v5420_v53 = vrot.slane %v6953_v21, 9  ;;  %6016 = vmatmul.mubr.msk.bf16.gmra.mxu0 %vm460_vm1, %v5401_v47  ;;  %v2559_v37 = vrot.slane %v2557_v33, 5  ;;  %v2563_v3 = vrot.slane %v2561_v44, 4  ;;  %v7341_v33 = vld [vmem:[%s6360_s6 + $0x24] sm:$0xf] }
  0xc0   : > { %v2569_v38 = vrot.slane %v2567_v5, 5  ;;  %v2883_v22 = vrot.slane %v6959_v60, 5  ;;  %v2536_v0 = vsel %vm6560_vm7, %v2531_v17, %v2535_v49  ;;  %v2554_v21 = vor.u32 %v2553_v29, %v2550_v62  ;;  %v7486_v17 = vld [vmem:[%s6360_s6 + $0x64] sm:$0xf]  ;;  %v7535_v49 = vld [vmem:[%s6360_s6 + $0x7c] sm:$0xf] }
  0xc1   : > { %v2546_v35 = vsel %vm6560_vm7, %v2541_v26, %v2545_v4  ;;  %v2886_v14 = vrot.slane %v6962_v36, 5  ;;  %v2564_v45 = vor.u32 %v2563_v3, %v2559_v37  ;;  %v5518_v5 = vcombine.low %v7326_v30, %v7331_v19  ;;  %v7348_v4 = vld [vmem:[%s6360_s6 + $0x28] sm:$0xf]  ;;  %9016 = vst [vmem:[#allocation18_spill] sm:$0xff] %v7486_v17  ;;  %9023 = vst [vmem:[#allocation25_spill] sm:$0xff] %v7535_v49 }
  0xc2   : > { %v5402_v63 = vcombine.low %v2536_v0, %v2546_v35  ;;  %v2884_v47 = vsel %vm6546_vm6, %v5420_v53, %v2883_v22  ;;  %v2885_v44 = vrot.slane %v2883_v22, 4  ;;  %v2555_v60 = vrot.slane %v2554_v21, 4 }
  0xc3   : > { %v2565_v36 = vrot.slane %v2564_v45, 4  ;;  %v5421_v29 = vrot.slane %v6976_v58, 9  ;;  %v2890_v22 = vrot.slane %v6983_v59, 5  ;;  %v2893_v0 = vrot.slane %v6988_v27, 5 }
  0xc4   : > { %6019 = vmatprep.mubr.msk.bf16.mxu0 %vm460_vm1, %v5402_v63  ;;  %v2887_v62 = vsel %vm6546_vm6, %v2885_v44, %v2886_v14  ;;  %v2560_v53 = vsel %vm6560_vm7, %v2555_v60, %v2559_v37  ;;  %v5519_v45 = vcombine.low %v7341_v33, %v7348_v4  ;;  %v3687_v21 = vshrl.u32 %v7341_v33, 16  ;;  %v7372_v60 = vld [vmem:[%s6360_s6 + $0x30] sm:$0xf] }
  0xc5   : > { %v5437_v3 = vcombine.low %v2884_v47, %v2887_v62  ;;  %v2570_v35 = vsel %vm6560_vm7, %v2565_v36, %v2569_v38  ;;  %v3690_v14 = vshll.u32 %v7341_v33, 16  ;;  %v2891_v37 = vsel %vm6546_vm6, %v5421_v29, %v2890_v22 }
  0xc6   : > { %v5403_v58 = vcombine.low %v2560_v53, %v2570_v35  ;;  %v2892_v59 = vrot.slane %v2890_v22, 4  ;;  %v3696_v27 = vshll.u32 %v7348_v4, 16  ;;  %v3689_v63 = vrot.slane %v3687_v21, 4 }
  0xc7   : > { %6025 = vmatprep.mubr.msk.bf16.mxu1 %vm460_vm1, %v5437_v3  ;;  %v3692_v47 = vrot.slane %v3690_v14, 5  ;;  %v3700_v38 = vshrl.u32 %v7348_v4, 16  ;;  %v8907_v29 = vrot.slane %v7348_v4, 5  ;;  %v4145_v53 = vsel %vm509_vm0, %v7039_v51, 0  ;;  %v7383_v3 = vld [vmem:[%s6360_s6 + $0x34] sm:$0xf] }
  0xc8   : > { %6020 = vmatmul.mubr.msk.bf16.gmra.mxu0 %vm460_vm1, %v5403_v58  ;;  %v2894_v36 = vsel %vm6546_vm6, %v2892_v59, %v2893_v0  ;;  %v7377_v62 = vrot.slane %v3696_v27, 5  ;;  %v4567_v14 = vsel %vm509_vm0, %v7060_v20, 0  ;;  %v5422_v58 = vrot.slane %v6993_v42, 9  ;;  %v7427_v20 = vld [vmem:[%s6360_s6 + $0x48] sm:$0xf] }
  0xc9   : > { %6059 = vmatprep.mubr.msk.bf16.mxu0 %vm460_vm1, %v5518_v5  ;;  %v5438_v22 = vcombine.low %v2891_v37, %v2894_v36  ;;  %v3693_v35 = vor.u32 %v3692_v47, %v3689_v63  ;;  %v3702_v21 = vrot.slane %v3700_v38, 4  ;;  %v7390_v0 = vrot.slane %v8907_v29, 4  ;;  %v7403_v63 = vld [vmem:[%s6360_s6 + $0x3c] sm:$0xf]  ;;  %v7406_v47 = vld [vmem:[%s6360_s6 + $0x40] sm:$0xf] }
  0xca   : > { %v2897_v51 = vrot.slane %v7000_v50, 5  ;;  %v2900_v59 = vrot.slane %v7014_v23, 5  ;;  %v5520_v37 = vcombine.low %v7372_v60, %v7383_v3  ;;  %v3738_v23 = vshll.u32 %v7403_v63, 16  ;;  %v7455_v29 = vld [vmem:[%s6360_s6 + $0x58] sm:$0xf] }
  0xcb   : > { %6026 = vmatmul.mubr.msk.bf16.vlgmr.msra.gmra.mxu1 %vm460_vm1, %v5438_v22  ;;  %v7396_v27 = vrot.slane %v3693_v35, 4  ;;  %v3703_v5 = vor.u32 %v3702_v21, %v7377_v62  ;;  %v5423_v22 = vrot.slane %v7020_v24, 9  ;;  %v2904_v35 = vrot.slane %v7023_v1, 5  ;;  %9012 = vst [vmem:[#allocation14_spill] sm:$0xff] %v7455_v29 }
  0xcc   : > { %6092 = vmatpush3.bf16.msra.mxu1 %v4145_v53  ;;  %v2898_v42 = vsel %vm6546_vm6, %v5422_v58, %v2897_v51  ;;  %v2899_v50 = vrot.slane %v2897_v51, 4  ;;  %v2907_v21 = vrot.slane %v7034_v9, 5  ;;  %v5521_v58 = vcombine.low %v7403_v63, %v7406_v47 }
  0xcd   : > { %v7412_v36 = vrot.slane %v3703_v5, 4  ;;  %v3735_v51 = vshrl.u32 %v7403_v63, 16  ;;  %v2905_v5 = vsel %vm6546_vm6, %v5423_v22, %v2904_v35  ;;  %v2906_v24 = vrot.slane %v2904_v35, 4 }
  0xce   : > { %v2901_v53 = vsel %vm6546_vm6, %v2899_v50, %v2900_v59  ;;  %v3744_v1 = vshll.u32 %v7406_v47, 16  ;;  %v7432_v59 = vrot.slane %v3738_v23, 5  ;;  %v3748_v50 = vshrl.u32 %v7406_v47, 16 }
  0xcf   : > { %v5439_v38 = vcombine.low %v2898_v42, %v2901_v53  ;;  %v7430_v9 = vrot.slane %v3735_v51, 4  ;;  %v7437_v53 = vld [vmem:[%s6360_s6 + $0x4c] sm:$0xf]  ;;  %v2908_v22 = vsel %vm6546_vm6, %v2906_v24, %v2907_v21  ;;  %v5424_v23 = vrot.slane %v7046_v7, 9  ;;  %v7447_v51 = vld [vmem:[%s6360_s6 + $0x54] sm:$0xf] }
  0xd0   : > { %6060 = vmatmul.mubr.msk.bf16.vlgmr.msra.gmra.mxu0 %vm460_vm1, %v5519_v45  ;;  %v7442_v35 = vrot.slane %v3744_v1, 5  ;;  %9011 = vst [vmem:[#allocation13_spill] sm:$0xff] %v7447_v51  ;;  %v5440_v44 = vcombine.low %v2905_v5, %v2908_v22  ;;  %v7450_v42 = vrot.slane %v3748_v50, 4  ;;  %v5522_v21 = vcombine.low %v7427_v20, %v7437_v53 }
  0xd1   : > { %6126 = vmatpush3.bf16.msra.mxu0 %v4567_v14  ;;  %6029 = vmatprep.mubr.msk.bf16.mxu1 %vm460_vm1, %v5439_v38  ;;  %v2911_v14 = vrot.slane %v7051_v34, 5  ;;  %v2914_v38 = vrot.slane %v7069_v39, 5  ;;  %v5425_v39 = vrot.slane %v7076_v16, 9  ;;  %v2918_v5 = vrot.slane %v7084_v55, 5  ;;  %v7478_v55 = vld [vmem:[%s6360_s6 + $0x60] sm:$0xf] }
  0xd2   : > { %6063 = vmatprep.mubr.msk.bf16.mxu0 %vm460_vm1, %v5520_v37  ;;  %v2921_v50 = vrot.slane %v7093_v40, 5  ;;  %v5523_v22 = vcombine.low %v7447_v51, %v7455_v29  ;;  %v3783_v7 = vshrl.u32 %v7447_v51, 16  ;;  %v3786_v1 = vshll.u32 %v7447_v51, 16  ;;  %9013 = vst [vmem:[#allocation15_spill] sm:$0xff] %v7478_v55 }
  0xd3   : > { %6030 = vmatmul.mubr.msk.bf16.gmra.mxu1 %vm460_vm1, %v5440_v44  ;;  %v2912_v37 = vsel %vm6546_vm6, %v5424_v23, %v2911_v14  ;;  %v2913_v34 = vrot.slane %v2911_v14, 4  ;;  %v2919_v23 = vsel %vm6546_vm6, %v5425_v39, %v2918_v5  ;;  %v2920_v14 = vrot.slane %v2918_v5, 4 }
  0xd4   : > { %v3792_v16 = vshll.u32 %v7455_v29, 16  ;;  %v7480_v24 = vrot.slane %v3783_v7, 4  ;;  %v7482_v45 = vrot.slane %v3786_v1, 5  ;;  %v3796_v26 = vshrl.u32 %v7455_v29, 16  ;;  %v7496_v7 = vld [vmem:[%s6360_s6 + $0x6c] sm:$0xf] }
  0xd5   : > { %v2915_v44 = vsel %vm6546_vm6, %v2913_v34, %v2914_v38  ;;  %v2922_v38 = vsel %vm6546_vm6, %v2920_v14, %v2921_v50  ;;  %9018 = vst [vmem:[#allocation20_spill] sm:$0xff] %v7496_v7  ;;  %v7505_v50 = vld [vmem:[%s6360_s6 + $0x70] sm:$0xf]  ;;  %v2928_v14 = vrot.slane %v7110_v32, 5  ;;  %v2932_v32 = vrot.slane %v7128_v43, 5 }
  0xd6   : > { %v5441_v40 = vcombine.low %v2912_v37, %v2915_v44  ;;  %9014 = vst [vmem:[#allocation16_spill] sm:$0xff] %v7480_v24  ;;  %9015 = vst [vmem:[#allocation17_spill] sm:$0xff] %v7482_v45  ;;  %v7491_v34 = vrot.slane %v3792_v16, 5  ;;  %v5442_v1 = vcombine.low %v2919_v23, %v2922_v38  ;;  %v7500_v5 = vrot.slane %v3796_v26, 4  ;;  %v7532_v37 = vld [vmem:[%s6360_s6 + $0x78] sm:$0xf] }
  0xd7   : > { %v2925_v44 = vrot.slane %v7107_v52, 5  ;;  %9020 = vst [vmem:[#allocation22_spill] sm:$0xff] %v7505_v50  ;;  %v5524_v16 = vcombine.low %v7478_v55, %v7486_v17  ;;  %v5427_v52 = vrot.slane %v7125_v15, 9  ;;  %v2935_v23 = vrot.slane %v7132_v56, 5  ;;  %9022 = vst [vmem:[#allocation24_spill] sm:$0xff] %v7532_v37 }
  0xd8   : > { %6064 = vmatmul.mubr.msk.bf16.gmra.mxu0 %vm460_vm1, %v5521_v58  ;;  %9017 = vst [vmem:[#allocation19_spill] sm:$0xff] %v7491_v34  ;;  %6033 = vmatprep.mubr.msk.bf16.mxu1 %vm460_vm1, %v5441_v40  ;;  %9019 = vst [vmem:[#allocation21_spill] sm:$0xff] %v7500_v5  ;;  %v5426_v58 = vrot.slane %v7104_v31, 9  ;;  %v3831_v40 = vshrl.u32 %v7496_v7, 16  ;;  %v3840_v31 = vshll.u32 %v7505_v50, 16  ;;  %v3844_v15 = vshrl.u32 %v7505_v50, 16 }
  0xd9   : > { %6067 = vmatprep.mubr.msk.bf16.mxu0 %vm460_vm1, %v5522_v21  ;;  %v2927_v26 = vrot.slane %v2925_v44, 4  ;;  %v2933_v43 = vsel %vm6546_vm6, %v5427_v52, %v2932_v32 }
  0xda   : > { %v2926_v21 = vsel %vm6546_vm6, %v5426_v58, %v2925_v44  ;;  %v3834_v44 = vshll.u32 %v7496_v7, 16  ;;  %v7529_v56 = vrot.slane %v3831_v40, 4  ;;  %v7543_v17 = vrot.slane %v3844_v15, 4 }
  0xdb   : > { %6034 = vmatmul.mubr.msk.bf16.gmra.mxu1 %vm460_vm1, %v5442_v1  ;;  %v2929_v58 = vsel %vm6546_vm6, %v2927_v26, %v2928_v14  ;;  %v2934_v1 = vrot.slane %v2932_v32, 4  ;;  %v7537_v38 = vpop.f32.mrf.mxu0  ;;  %v7541_v26 = vrot.slane %v3840_v31, 5  ;;  %v5428_v32 = vrot.slane %v7145_v2, 9 }
  0xdc   : > { %v5443_v39 = vcombine.low %v2926_v21, %v2929_v58  ;;  %9021 = vst [vmem:[#allocation23_spill] sm:$0xff] %v7529_v56  ;;  %v7539_v14 = vrot.slane %v3834_v44, 5  ;;  %9026 = vst [vmem:[#allocation28_spill] sm:$0xff] %v7543_v17  ;;  %v2939_v58 = vrot.slane %v7151_v28, 5  ;;  %v2942_v15 = vrot.slane %v7158_v57, 5 }
  0xdd   : > { %9025 = vst [vmem:[#allocation27_spill] sm:$0xff] %v7541_v26  ;;  %v2936_v40 = vsel %vm6546_vm6, %v2934_v1, %v2935_v23  ;;  %v7553_v31 = vpop.f32.mrf.mxu0  ;;  %v7561_v21 = vld [vmem:[%s6360_s6 + $0x84] sm:$0xf]  ;;  %v7564_v23 = vld [vmem:[%s6360_s6 + $0x88] sm:$0xf]  ;;  %v9034_v26 = vcombine.low %v7496_v7, %v7505_v50  ;;  %v9040_v50 = vld [vmem:[#allocation6_spill] sm:$0xff] }
  0xde   : > { %9024 = vst [vmem:[#allocation26_spill] sm:$0xff] %v7539_v14  ;;  %6037 = vmatprep.mubr.msk.bf16.mxu1 %vm460_vm1, %v5443_v39  ;;  %v5444_v44 = vcombine.low %v2933_v43, %v2936_v40  ;;  %9027 = vst [vmem:[#allocation29_spill] sm:$0xff] %v7561_v21  ;;  %v2940_v2 = vsel %vm6546_vm6, %v5428_v32, %v2939_v58  ;;  %v2941_v28 = vrot.slane %v2939_v58, 4  ;;  %v5429_v40 = vrot.slane %v7166_v6, 9  ;;  %v7619_v17 = vld [vmem:[%s6360_s6 + $0x90] sm:$0xf] }
  0xdf   : > { %9028 = vst [vmem:[#allocation30_spill] sm:$0xff] %v7564_v23  ;;  %v7570_v43 = vpop.f32.mrf.mxu1  ;;  %v7572_v57 = vpop.f32.mrf.mxu0  ;;  %v2946_v39 = vrot.slane %v7173_v41, 5  ;;  %v6275_v32 = vmov 0.0   ;;  %v2949_v6 = vrot.slane %v7183_v18, 5  ;;  %v3879_v58 = vshrl.u32 %v7561_v21, 16  ;;  %9029 = vst [vmem:[#allocation31_spill] sm:$0xff] %v7619_v17 }
  0xe0   : > { %6068 = vmatmul.mubr.msk.bf16.gmra.mxu0 %vm460_vm1, %v5523_v22  ;;  %v2943_v52 = vsel %vm6546_vm6, %v2941_v28, %v2942_v15  ;;  %269 = vst.msk [vmem:[#allocation2 + $0x10] sm:$0xff] %vm266_vm8, %v6275_v32  ;;  %267 = vst.msk [vmem:[#allocation2] sm:$0xff] %vm266_vm8, %v6275_v32  ;;  %v3882_v22 = vshll.u32 %v7561_v21, 16  ;;  %v3888_v18 = vshll.u32 %v7564_v23, 16  ;;  %v3892_v41 = vshrl.u32 %v7564_v23, 16 }
  0xe1   : > { %6071 = vmatprep.mubr.msk.bf16.mxu0 %vm460_vm1, %v5524_v16  ;;  %268 = vst.msk [vmem:[#allocation2 + $0x8] sm:$0xff] %vm266_vm8, %v6275_v32  ;;  %270 = vst.msk [vmem:[#allocation2 + $0x18] sm:$0xff] %vm266_vm8, %v6275_v32  ;;  %v550_v15 = vpop.f32.mrf.mxu0  ;;  %v5445_v28 = vcombine.low %v2940_v2, %v2943_v52  ;;  %v2947_v16 = vsel %vm6546_vm6, %v5429_v40, %v2946_v39  ;;  %v2948_v1 = vrot.slane %v2946_v39, 4  ;;  %v7627_v52 = vld [vmem:[%s6360_s6 + $0x94] sm:$0xf]  ;;  %v2956_v40 = vrot.slane %v7206_v11, 5 }
  0xe2   : > { %271 = vst.msk [vmem:[#allocation2 + $0x20] sm:$0xff] %vm266_vm8, %v6275_v32  ;;  %272 = vst.msk [vmem:[#allocation2 + $0x28] sm:$0xff] %vm266_vm8, %v6275_v32  ;;  %v7632_v2 = vrot.slane %v3882_v22, 5  ;;  %v7637_v56 = vld [vmem:[%s6360_s6 + $0x9c] sm:$0xf]  ;;  %v7643_v51 = vrot.slane %v3888_v18, 5 }
  0xe3   : > { %6038 = vmatmul.mubr.msk.bf16.gmra.mxu1 %vm460_vm1, %v5444_v44  ;;  %273 = vst.msk [vmem:[#allocation2 + $0x30] sm:$0xff] %vm266_vm8, %v6275_v32  ;;  %274 = vst.msk [vmem:[#allocation2 + $0x38] sm:$0xff] %vm266_vm8, %v6275_v32  ;;  %v611_v44 = vpop.f32.mrf.mxu1  ;;  %v2950_v39 = vsel %vm6546_vm6, %v2948_v1, %v2949_v6  ;;  %v2953_v22 = vrot.slane %v7194_v54, 5  ;;  %v7649_v6 = vld [vmem:[%s6360_s6 + $0xa0] sm:$0xf]  ;;  %v2963_v29 = vrot.slane %v9040_v50, 5 }
  0xe4   : > { %275 = vst.msk [vmem:[#allocation2 + $0x40] sm:$0xff] %vm266_vm8, %v6275_v32  ;;  %276 = vst.msk [vmem:[#allocation2 + $0x48] sm:$0xff] %vm266_vm8, %v6275_v32  ;;  %6041 = vmatprep.mubr.msk.bf16.mxu1 %vm460_vm1, %v5445_v28  ;;  %v5446_v55 = vcombine.low %v2947_v16, %v2950_v39  ;;  %v7645_v28 = vrot.slane %v3892_v41, 4  ;;  %v3927_v16 = vshrl.u32 %v7637_v56, 16 }
  0xe5   : > { %277 = vst.msk [vmem:[#allocation2 + $0x50] sm:$0xff] %vm266_vm8, %v6275_v32  ;;  %278 = vst.msk [vmem:[#allocation2 + $0x58] sm:$0xff] %vm266_vm8, %v6275_v32  ;;  %v5874_v14 = vpop.f32.mrf.mxu1  ;;  %v2955_v39 = vrot.slane %v2953_v22, 4 }
  0xe6   : > { %279 = vst.msk [vmem:[#allocation2 + $0x60] sm:$0xff] %vm266_vm8, %v6275_v32  ;;  %280 = vst.msk [vmem:[#allocation2 + $0x68] sm:$0xff] %vm266_vm8, %v6275_v32 }
  0xe7   : > { %281 = vst.msk [vmem:[#allocation2 + $0x70] sm:$0xff] %vm266_vm8, %v6275_v32  ;;  %282 = vst.msk [vmem:[#allocation2 + $0x78] sm:$0xff] %vm266_vm8, %v6275_v32  ;;  %v614_v1 = vpop.f32.mrf.mxu1  ;;  %v299_v11 = vld [vmem:[#allocation2] sm:$0xff]  ;;  %v2957_v41 = vsel %vm6546_vm6, %v2955_v39, %v2956_v40 }
  0xe8   : > { %283 = vst.msk [vmem:[#allocation2 + $0x80] sm:$0xff] %vm266_vm8, %v6275_v32  ;;  %284 = vst.msk [vmem:[#allocation2 + $0x88] sm:$0xff] %vm266_vm8, %v6275_v32  ;;  %6072 = vmatmul.mubr.msk.bf16.gmra.mxu0 %vm460_vm1, %v9034_v26  ;;  %v5528_v26 = vcombine.low %v7619_v17, %v7627_v52 }
  0xe9   : > { %285 = vst.msk [vmem:[#allocation2 + $0x90] sm:$0xff] %vm266_vm8, %v6275_v32  ;;  %286 = vst.msk [vmem:[#allocation2 + $0x98] sm:$0xff] %vm266_vm8, %v6275_v32  ;;  %v303_v39 = vld [vmem:[#allocation2 + $0x20] sm:$0xff] }
  0xea   : > { %287 = vst.msk [vmem:[#allocation2 + $0xa0] sm:$0xff] %vm266_vm8, %v6275_v32  ;;  %288 = vst.msk [vmem:[#allocation2 + $0xa8] sm:$0xff] %vm266_vm8, %v6275_v32 }
  0xeb   : > { %289 = vst.msk [vmem:[#allocation2 + $0xb0] sm:$0xff] %vm266_vm8, %v6275_v32  ;;  %290 = vst.msk [vmem:[#allocation2 + $0xb8] sm:$0xff] %vm266_vm8, %v6275_v32  ;;  %6042 = vmatmul.mubr.msk.bf16.gmra.mxu1 %vm460_vm1, %v5446_v55 }
  0xec   : > { %291 = vst.msk [vmem:[#allocation2 + $0xc0] sm:$0xff] %vm266_vm8, %v6275_v32  ;;  %292 = vst.msk [vmem:[#allocation2 + $0xc8] sm:$0xff] %vm266_vm8, %v6275_v32 }
  0xed   : > { %293 = vst.msk [vmem:[#allocation2 + $0xd0] sm:$0xff] %vm266_vm8, %v6275_v32  ;;  %294 = vst.msk [vmem:[#allocation2 + $0xd8] sm:$0xff] %vm266_vm8, %v6275_v32 }
  0xee   : > { %295 = vst.msk [vmem:[#allocation2 + $0xe0] sm:$0xff] %vm266_vm8, %v6275_v32  ;;  %296 = vst.msk [vmem:[#allocation2 + $0xe8] sm:$0xff] %vm266_vm8, %v6275_v32 }
  0xef   : > { %297 = vst.msk [vmem:[#allocation2 + $0xf0] sm:$0xff] %vm266_vm8, %v6275_v32  ;;  %298 = vst.msk [vmem:[#allocation2 + $0xf8] sm:$0xff] %vm266_vm8, %v6275_v32  ;;  %v7621_v32 = vrot.slane %v3879_v58, 4  ;;  %v5430_v58 = vrot.slane %v7190_v61, 9  ;;  %v9038_v61 = vcombine.low %v7532_v37, %v7535_v49  ;;  %v9039_v37 = vld [vmem:[#allocation5_spill] sm:$0xff] }
  0xf0   : > { %9031 = vst [vmem:[#allocation33_spill] sm:$0xff] %v7627_v52  ;;  %9032 = vst [vmem:[#allocation34_spill] sm:$0xff] %v7632_v2  ;;  %v5431_v2 = vrot.slane %v7213_v13, 9  ;;  %v317_v49 = vld [vmem:[#allocation2 + $0x90] sm:$0xff]  ;;  %v2960_v7 = vrot.slane %v9039_v37, 5  ;;  %v7677_v13 = vadd.f32 %v7553_v31, %v299_v11  ;;  %v315_v37 = vld [vmem:[#allocation2 + $0x80] sm:$0xff] }
  0xf1   : > { %9030 = vst [vmem:[#allocation32_spill] sm:$0xff] %v7621_v32  ;;  %v5861_v32 = vpop.f32.mrf.mxu0  ;;  %9033 = vst [vmem:[#allocation35_spill] sm:$0xff] %v7637_v56  ;;  %6075 = vmatprep.mubr.msk.bf16.mxu0 %vm460_vm1, %v9038_v61  ;;  %v2954_v54 = vsel %vm6546_vm6, %v5430_v58, %v2953_v22  ;;  %v301_v61 = vld [vmem:[#allocation2 + $0x10] sm:$0xff]  ;;  %v7673_v22 = vadd.f32 %v7570_v43, %v317_v49  ;;  %v318_v50 = vld [vmem:[#allocation2 + $0x98] sm:$0xff]  ;;  %v7681_v5 = vadd.f32 %v611_v44, %v315_v37 }
  0xf2   : > { %9035 = vst [vmem:[#allocation36_spill] sm:$0xff] %v7643_v51  ;;  %9036 = vst [vmem:[#allocation37_spill] sm:$0xff] %v7645_v28  ;;  %v5877_v51 = vpop.f32.mrf.mxu1  ;;  %v7670_v58 = vadd.f32 %v7537_v38, %v301_v61  ;;  %v302_v28 = vld [vmem:[#allocation2 + $0x18] sm:$0xff]  ;;  %v7686_v61 = vadd.f32 %v5874_v14, %v318_v50  ;;  %v300_v49 = vld [vmem:[#allocation2 + $0x8] sm:$0xff]  ;;  %v5447_v55 = vcombine.low %v2954_v54, %v2957_v41  ;;  %v2962_v41 = vrot.slane %v2960_v7, 4 }
  0xf3   : > { %9037 = vst [vmem:[#allocation38_spill] sm:$0xff] %v7649_v6  ;;  %v563_v18 = vpop.f32.mrf.mxu0  ;;  %9041 = vst [vmem:[#allocation5_spill] sm:$0xff] %v7673_v22  ;;  %v7684_v38 = vadd.f32 %v7572_v57, %v302_v28  ;;  %v316_v43 = vld [vmem:[#allocation2 + $0x88] sm:$0xff]  ;;  %v305_v22 = vld [vmem:[#allocation2 + $0x30] sm:$0xff]  ;;  %v7688_v11 = vadd.f32 %v550_v15, %v300_v49  ;;  %v2961_v44 = vsel %vm6546_vm6, %v5431_v2, %v2960_v7  ;;  %v7699_v54 = vrot.slane %v3927_v16, 4 }
  0xf4   : > { %v627_v52 = vpop.f32.mrf.mxu1  ;;  %9042 = vst [vmem:[#allocation6_spill] sm:$0xff] %v7681_v5  ;;  %9043 = vst [vmem:[#allocation39_spill] sm:$0xff] %v7686_v61  ;;  %v7690_v34 = vadd.f32 %v614_v1, %v316_v43  ;;  %v7692_v45 = vadd.f32 %v5861_v32, %v305_v22  ;;  %v321_v40 = vld [vmem:[#allocation2 + $0xb0] sm:$0xff]  ;;  %v319_v57 = vld [vmem:[#allocation2 + $0xa0] sm:$0xff]  ;;  %6045 = vmatprep.mubr.msk.bf16.mxu1 %vm460_vm1, %v5447_v55  ;;  %v3930_v15 = vshll.u32 %v7637_v56, 16  ;;  %v3936_v37 = vshll.u32 %v7649_v6, 16 }
  0xf5   : > { %v5862_v17 = vpop.f32.mrf.mxu0  ;;  %v7697_v14 = vadd.f32 %v5877_v51, %v321_v40  ;;  %9046 = vst [vmem:[#allocation42_spill] sm:$0xff] %v7699_v54  ;;  %v306_v1 = vld [vmem:[#allocation2 + $0x38] sm:$0xff]  ;;  %v9047_v2 = vcombine.low %v7561_v21, %v7564_v23  ;;  %v3940_v51 = vshrl.u32 %v7649_v6, 16  ;;  %v304_v50 = vld [vmem:[#allocation2 + $0x28] sm:$0xff]  ;;  %v2964_v55 = vsel %vm6546_vm6, %v2962_v41, %v2963_v29  ;;  %v309_v41 = vld [vmem:[#allocation2 + $0x50] sm:$0xff] }
  0xf6   : > { %9044 = vst [vmem:[#allocation40_spill] sm:$0xff] %v7690_v34  ;;  %v5878_v28 = vpop.f32.mrf.mxu1  ;;  %v322_v32 = vld [vmem:[#allocation2 + $0xb8] sm:$0xff]  ;;  %v320_v49 = vld [vmem:[#allocation2 + $0xa8] sm:$0xff]  ;;  %v7713_v40 = vrot.slane %v3930_v15, 5  ;;  %v7715_v54 = vadd.f32 %v563_v18, %v303_v39  ;;  %v5448_v34 = vcombine.low %v2961_v44, %v2964_v55  ;;  %v7727_v61 = vrot.slane %v3936_v37, 5  ;;  %v325_v18 = vld [vmem:[#allocation2 + $0xd0] sm:$0xff] }
  0xf7   : > { %v566_v31 = vpop.f32.mrf.mxu0  ;;  %9045 = vst [vmem:[#allocation41_spill] sm:$0xff] %v7697_v14  ;;  %6076 = vmatmul.mubr.msk.bf16.gmra.mxu0 %vm460_vm1, %v9047_v2  ;;  %v7717_v2 = vadd.f32 %v627_v52, %v319_v57  ;;  %v7720_v14 = vld [vmem:[%s6360_s6 + $0xa8] sm:$0xf]  ;;  %v7723_v7 = vld [vmem:[%s6360_s6 + $0xac] sm:$0xf]  ;;  %v7731_v29 = vadd.f32 %v5862_v17, %v306_v1  ;;  %v7733_v15 = vadd.f32 %v5878_v28, %v322_v32  ;;  %v9059_v17 = vld [vmem:[#allocation7_spill] sm:$0xff] }
  0xf8   : > { %v630_v43 = vpop.f32.mrf.mxu1  ;;  %6079 = vmatprep.mubr.msk.bf16.mxu0 %vm460_vm1, %v5528_v26  ;;  %9048 = vst [vmem:[#allocation43_spill] sm:$0xff] %v7713_v40  ;;  %9050 = vst [vmem:[#allocation45_spill] sm:$0xff] %v7720_v14  ;;  %v7729_v26 = vrot.slane %v3940_v51, 4  ;;  %v7735_v52 = vadd.f32 %v566_v31, %v304_v50  ;;  %v7741_v5 = vld [vmem:[%s6360_s6 + $0xb4] sm:$0xf]  ;;  %6046 = vmatmul.mubr.msk.bf16.gmra.mxu1 %vm460_vm1, %v5448_v34  ;;  %v9058_v37 = vld [vmem:[#allocation4_spill] sm:$0xff]  ;;  %v5530_v55 = vcombine.low %v7720_v14, %v7723_v7 }
  0xf9   : > { %v5865_v22 = vpop.f32.mrf.mxu0  ;;  %9049 = vst [vmem:[#allocation44_spill] sm:$0xff] %v7717_v2  ;;  %9051 = vst [vmem:[#allocation46_spill] sm:$0xff] %v7723_v7  ;;  %v7737_v57 = vadd.f32 %v630_v43, %v320_v49  ;;  %v9056_v2 = vld [vmem:[#allocation3_spill] sm:$0xff]  ;;  %v2967_v51 = vrot.slane %v9058_v37, 5  ;;  %v2970_v1 = vrot.slane %v9059_v17, 5  ;;  %v2977_v21 = vrot.slane %v7271_v10, 5 }
  0xfa   : > { %9052 = vst [vmem:[#allocation47_spill] sm:$0xff] %v7727_v61  ;;  %9053 = vst [vmem:[#allocation48_spill] sm:$0xff] %v7729_v26  ;;  %v5881_v39 = vpop.f32.mrf.mxu1  ;;  %v5432_v40 = vrot.slane %v9056_v2, 9  ;;  %v7750_v31 = vld [vmem:[%s6360_s6 + $0xb8] sm:$0xf]  ;;  %v7754_v43 = vadd.f32 %v5865_v22, %v309_v41  ;;  %v9064_v26 = vld [vmem:[#allocation9_spill] sm:$0xff] }
  0xfb   : > { %v7725_v16 = vpop.f32.mrf.mxu0  ;;  %9054 = vst [vmem:[#allocation49_spill] sm:$0xff] %v7733_v15  ;;  %9055 = vst [vmem:[#allocation50_spill] sm:$0xff] %v7737_v57  ;;  %v7756_v2 = vadd.f32 %v5881_v39, %v325_v18  ;;  %v2969_v17 = vrot.slane %v2967_v51, 4  ;;  %v9063_v57 = vld [vmem:[#allocation8_spill] sm:$0xff]  ;;  %v2974_v28 = vrot.slane %v9064_v26, 5  ;;  %v5531_v49 = vcombine.low %v7741_v5, %v7750_v31  ;;  %v323_v50 = vld [vmem:[#allocation2 + $0xc0] sm:$0xff] }
  0xfc   : > { %9057 = vst [vmem:[#allocation3_spill] sm:$0xff] %v7741_v5  ;;  %9060 = vst [vmem:[#allocation4_spill] sm:$0xff] %v7750_v31  ;;  %v643_v32 = vpop.f32.mrf.mxu1  ;;  %v2968_v37 = vsel %vm6546_vm6, %v5432_v40, %v2967_v51  ;;  %v5433_v15 = vrot.slane %v9063_v57, 9  ;;  %v3975_v22 = vshrl.u32 %v7741_v5, 16  ;;  %v3978_v41 = vshll.u32 %v7741_v5, 16  ;;  %v307_v51 = vld [vmem:[#allocation2 + $0x40] sm:$0xff] }
  0xfd   : > { %v5866_v44 = vpop.f32.mrf.mxu0  ;;  %9061 = vst [vmem:[#allocation7_spill] sm:$0xff] %v7754_v43  ;;  %9062 = vst [vmem:[#allocation51_spill] sm:$0xff] %v7756_v2  ;;  %v9065_v40 = vcombine.low %v7637_v56, %v7649_v6  ;;  %v2971_v26 = vsel %vm6546_vm6, %v2969_v17, %v2970_v1  ;;  %v2976_v10 = vrot.slane %v2974_v28, 4  ;;  %v3984_v57 = vshll.u32 %v7750_v31, 16  ;;  %v310_v2 = vld [vmem:[#allocation2 + $0x58] sm:$0xff]  ;;  %v324_v17 = vld [vmem:[#allocation2 + $0xc8] sm:$0xff] }
  0xfe   : > { %v5882_v61 = vpop.f32.mrf.mxu1  ;;  %v2975_v39 = vsel %vm6546_vm6, %v5433_v15, %v2974_v28  ;;  %v7777_v14 = vld [vmem:[%s6360_s6 + $0xc0] sm:$0xf]  ;;  %v5449_v23 = vcombine.low %v2968_v37, %v2971_v26  ;;  %v7782_v56 = vrot.slane %v3978_v41, 5  ;;  %v3988_v1 = vshrl.u32 %v7750_v31, 16  ;;  %v326_v15 = vld [vmem:[#allocation2 + $0xd8] sm:$0xff]  ;;  %v308_v28 = vld [vmem:[#allocation2 + $0x48] sm:$0xff] }
  0xff   : > { %v582_v34 = vpop.f32.mrf.mxu0  ;;  %6080 = vmatmul.mubr.msk.bf16.gmra.mxu0 %vm460_vm1, %v9065_v40  ;;  %9066 = vst [vmem:[#allocation8_spill] sm:$0xff] %v7777_v14  ;;  %v7780_v40 = vrot.slane %v3975_v22, 4  ;;  %v2978_v24 = vsel %vm6546_vm6, %v2976_v10, %v2977_v21  ;;  %v7789_v43 = vrot.slane %v3984_v57, 5  ;;  %v7794_v22 = vld [vmem:[%s6360_s6 + $0xc4] sm:$0xf]  ;;  %v7802_v21 = vadd.f32 %v643_v32, %v323_v50  ;;  %v313_v10 = vld [vmem:[#allocation2 + $0x70] sm:$0xff] }
 0x100   : > { %v646_v7 = vpop.f32.mrf.mxu1  ;;  %6083 = vmatprep.mubr.msk.bf16.mxu0 %vm460_vm1, %v5530_v55  ;;  %9068 = vst [vmem:[#allocation52_spill] sm:$0xff] %v7782_v56  ;;  %9070 = vst [vmem:[#allocation54_spill] sm:$0xff] %v7794_v22  ;;  %6049 = vmatprep.mubr.msk.bf16.mxu1 %vm460_vm1, %v5449_v23  ;;  %v5450_v26 = vcombine.low %v2975_v39, %v2978_v24  ;;  %v7797_v56 = vrot.slane %v3988_v1, 4  ;;  %v7804_v37 = vadd.f32 %v5866_v44, %v310_v2  ;;  %v329_v23 = vld [vmem:[#allocation2 + $0xf0] sm:$0xff]  ;;  %v7813_v24 = vld [vmem:[%s6360_s6 + $0xcc] sm:$0xf] }
 0x101   : > { %v5869_v18 = vpop.f32.mrf.mxu0  ;;  %9067 = vst [vmem:[#allocation9_spill] sm:$0xff] %v7780_v40  ;;  %9069 = vst [vmem:[#allocation53_spill] sm:$0xff] %v7789_v43  ;;  %v7800_v40 = vadd.f32 %v7725_v16, %v307_v51  ;;  %v7806_v5 = vadd.f32 %v5882_v61, %v326_v15  ;;  %v7808_v55 = vadd.f32 %v582_v34, %v308_v28  ;;  %v9077_v16 = vld [vmem:[#allocation10_spill] sm:$0xff]  ;;  %v2981_v32 = vrot.slane %v7283_v48, 5  ;;  %v9078_v50 = vld [vmem:[#allocation11_spill] sm:$0xff] }
 0x102   : > { %v5885_v41 = vpop.f32.mrf.mxu1  ;;  %9071 = vst [vmem:[#allocation55_spill] sm:$0xff] %v7797_v56  ;;  %9072 = vst [vmem:[#allocation56_spill] sm:$0xff] %v7802_v21  ;;  %v7810_v31 = vadd.f32 %v646_v7, %v324_v17  ;;  %6050 = vmatmul.mubr.msk.bf16.gmra.mxu1 %vm460_vm1, %v5450_v26  ;;  %v5434_v51 = vrot.slane %v9077_v16, 9  ;;  %v2984_v1 = vrot.slane %v9078_v50, 5  ;;  %v5532_v61 = vcombine.low %v7777_v14, %v7794_v22  ;;  %v7822_v44 = vld [vmem:[%s6360_s6 + $0xd0] sm:$0xf] }
 0x103   : > { %v7785_v6 = vpop.f32.mrf.mxu0  ;;  %9073 = vst [vmem:[#allocation57_spill] sm:$0xff] %v7806_v5  ;;  %9074 = vst [vmem:[#allocation58_spill] sm:$0xff] %v7808_v55  ;;  %v7827_v28 = vadd.f32 %v5869_v18, %v313_v10  ;;  %v2983_v26 = vrot.slane %v2981_v32, 4  ;;  %v7831_v16 = vadd.f32 %v5885_v41, %v329_v23  ;;  %v5435_v50 = vrot.slane %v7303_v12, 9  ;;  %v9081_v34 = vld [vmem:[#allocation12_spill] sm:$0xff] }
 0x104   : > { %9075 = vst [vmem:[#allocation59_spill] sm:$0xff] %v7810_v31  ;;  %9076 = vst [vmem:[#allocation60_spill] sm:$0xff] %v7813_v24  ;;  %v659_v39 = vpop.f32.mrf.mxu1  ;;  %v2982_v48 = vsel %vm6546_vm6, %v5434_v51, %v2981_v32  ;;  %v2988_v7 = vrot.slane %v7306_v46, 5  ;;  %v2991_v14 = vrot.slane %v9081_v34, 5  ;;  %v5533_v18 = vcombine.low %v7813_v24, %v7822_v44  ;;  %v311_v46 = vld [vmem:[#allocation2 + $0x60] sm:$0xff] }
 0x105   : > { %v5870_v57 = vpop.f32.mrf.mxu0  ;;  %9079 = vst [vmem:[#allocation10_spill] sm:$0xff] %v7827_v28  ;;  %9080 = vst [vmem:[#allocation11_spill] sm:$0xff] %v7831_v16  ;;  %v4023_v10 = vshrl.u32 %v7813_v24, 16  ;;  %v2985_v41 = vsel %vm6546_vm6, %v2983_v26, %v2984_v1  ;;  %v4026_v12 = vshll.u32 %v7813_v24, 16  ;;  %v4032_v23 = vshll.u32 %v7822_v44, 16  ;;  %v327_v51 = vld [vmem:[#allocation2 + $0xe0] sm:$0xff] }
 0x106   : > { %v5886_v17 = vpop.f32.mrf.mxu1  ;;  %v5451_v34 = vcombine.low %v2982_v48, %v2985_v41  ;;  %v2989_v16 = vsel %vm6546_vm6, %v5435_v50, %v2988_v7  ;;  %v2990_v22 = vrot.slane %v2988_v7, 4  ;;  %v314_v1 = vld [vmem:[#allocation2 + $0x78] sm:$0xff]  ;;  %v312_v26 = vld [vmem:[#allocation2 + $0x68] sm:$0xff] }
 0x107   : > { %v598_v2 = vpop.f32.mrf.mxu0  ;;  %6084 = vmatmul.mubr.msk.bf16.gmra.mxu0 %vm460_vm1, %v5531_v49  ;;  %v4036_v49 = vshrl.u32 %v7822_v44, 16  ;;  %v7852_v5 = vrot.slane %v4023_v10, 4  ;;  %v7854_v56 = vrot.slane %v4026_v12, 5  ;;  %v7856_v43 = vrot.slane %v4032_v23, 5  ;;  %v328_v48 = vld [vmem:[#allocation2 + $0xe8] sm:$0xff] }
 0x108   : > { %v662_v15 = vpop.f32.mrf.mxu1  ;;  %6087 = vmatprep.mubr.msk.bf16.mxu0 %vm460_vm1, %v5532_v61  ;;  %v330_v61 = vld [vmem:[#allocation2 + $0xf8] sm:$0xff]  ;;  %6053 = vmatprep.mubr.msk.bf16.mxu1 %vm460_vm1, %v5451_v34  ;;  %v2992_v7 = vsel %vm6546_vm6, %v2990_v22, %v2991_v14  ;;  %v7868_v10 = vadd.f32 %v7785_v6, %v311_v46  ;;  %v7870_v12 = vadd.f32 %v659_v39, %v327_v51  ;;  %v5471_v23 = vld [vmem:[%s6360_s6 + $0x20] sm:$0x1]  ;;  %v9086_v14 = vshrl.u32 %v7326_v30, 16 }
 0x109   : > { %v7834_v31 = vpop.f32.mrf.mxu0  ;;  %9082 = vst [vmem:[#allocation12_spill] sm:$0xff] %v7854_v56  ;;  %9083 = vst [vmem:[#allocation61_spill] sm:$0xff] %v7856_v43  ;;  %v7858_v28 = vrot.slane %v4036_v49, 4  ;;  %v7873_v55 = vadd.f32 %v5870_v57, %v314_v1  ;;  %v7875_v24 = vadd.f32 %v5886_v17, %v330_v61  ;;  %v7877_v43 = vadd.f32 %v598_v2, %v312_v26  ;;  %v5474_v1 = vld [vmem:[%s6360_s6 + $0x2c] sm:$0x1] }
 0x10a   : > { %v5891_v21 = vpop.f32.mrf.mxu1  ;;  %v7879_v56 = vadd.f32 %v662_v15, %v328_v48  ;;  %v3665_v22 = vrot.slane %v9086_v14, 4  ;;  %v9087_v6 = vshll.u32 %v7326_v30, 16  ;;  %v3672_v46 = vshll.u32 %v7331_v19, 16 }
 0x10b   : > { %v7848_v32 = vpop.f32.mrf.mxu0  ;;  %9084 = vst [vmem:[#allocation62_spill] sm:$0xff] %v7858_v28  ;;  %v5452_v28 = vcombine.low %v2989_v16, %v2992_v7  ;;  %v9088_v57 = vshrl.u32 %v7331_v19, 16  ;;  %v3682_v16 = vshll.u32 %v5471_v23, 16  ;;  %v5583_v2 = vrot.slane %v7326_v30, 9 }
 0x10c   : > { %v1228_v49 = vpop.f32.mrf.mxu1  ;;  %9085 = vst [vmem:[#allocation63_spill] sm:$0xff] %v7879_v56  ;;  %v3668_v39 = vrot.slane %v9087_v6, 5  ;;  %v4358_v15 = vrot.slane %v7331_v19, 5  ;;  %v3674_v48 = vrot.slane %v3672_v46, 5  ;;  %v4361_v7 = vrot.slane %v5471_v23, 5 }
 0x10d   : > { %v7861_v41 = vpop.f32.mrf.mxu0  ;;  %6054 = vmatmul.mubr.msk.bf16.gmra.mxu1 %vm460_vm1, %v5452_v28  ;;  %v3678_v17 = vrot.slane %v9088_v57, 4  ;;  %v1357_v14 = vadd.f32 %v5891_v21, %v7670_v58  ;;  %v3684_v28 = vrot.slane %v3682_v16, 5  ;;  %v3699_v30 = vsel %vm6560_vm7, %v7396_v27, %v7377_v62 }
 0x10e   : > { %v5892_v51 = vpop.f32.mrf.mxu1  ;;  %v3669_v26 = vor.u32 %v3668_v39, %v3665_v22  ;;  %v4359_v57 = vsel %vm6546_vm6, %v5583_v2, %v4358_v15  ;;  %v4360_v50 = vrot.slane %v4358_v15, 4  ;;  %v3706_v23 = vshll.u32 %v5474_v1, 16 }
 0x10f   : > { %v1656_v34 = vpop.f32.mrf.mxu0  ;;  %6088 = vmatmul.mubr.msk.bf16.gmra.mxu0 %vm460_vm1, %v5533_v18  ;;  %v3679_v18 = vor.u32 %v3678_v17, %v3674_v48  ;;  %v7905_v22 = vadd.f32 %v7834_v31, %v1357_v14  ;;  %v9089_v39 = vrot.slane %v7348_v4, 5  ;;  %v9090_v46 = vrot.slane %v7341_v33, 9 }
 0x110   : > { %v1231_v6 = vpop.f32.mrf.mxu1  ;;  %v3670_v56 = vrot.slane %v3669_v26, 4  ;;  %v4362_v21 = vsel %vm6546_vm6, %v4360_v50, %v4361_v7  ;;  %v4368_v27 = vrot.slane %v5474_v1, 5  ;;  %v1355_v16 = vadd.f32 %v1228_v49, %v7677_v13  ;;  %v5477_v49 = vld [vmem:[%s6360_s6 + $0x38] sm:$0x1] }
 0x111   : > { %v7892_v61 = vpop.f32.mrf.mxu0  ;;  %v4366_v62 = vsel %vm6546_vm6, %v9090_v46, %v9089_v39  ;;  %v3680_v2 = vrot.slane %v3679_v18, 4  ;;  %v5600_v15 = vcombine.low %v4359_v57, %v4362_v21  ;;  %v3708_v26 = vrot.slane %v3706_v23, 5 }
 0x112   : > { %v5895_v58 = vpop.f32.mrf.mxu1  ;;  %v3675_v31 = vsel %vm6560_vm7, %v3670_v56, %v3674_v48  ;;  %v4369_v4 = vsel %vm6546_vm6, %v7390_v0, %v4368_v27  ;;  %v7924_v33 = vadd.f32 %v7848_v32, %v1355_v16  ;;  %v1358_v50 = vadd.f32 %v5892_v51, %v7684_v38  ;;  %v5480_v16 = vld [vmem:[%s6360_s6 + $0x44] sm:$0x1] }
 0x113   : > { %v7902_v19 = vpop.f32.mrf.mxu0  ;;  %v1356_v13 = vadd.f32 %v1231_v6, %v7688_v11  ;;  %v3685_v56 = vsel %vm6560_vm7, %v3680_v2, %v3684_v28  ;;  %6127 = vmatprep.mubr.msk.bf16.mxu0 %vm460_vm1, %v5600_v15  ;;  %v3709_v48 = vsel %vm6560_vm7, %v7412_v36, %v3708_v26  ;;  %v5601_v0 = vcombine.low %v4366_v62, %v4369_v4 }
 0x114   : > { %v1244_v14 = vpop.f32.mrf.mxu1  ;;  %v9091_v32 = vshrl.u32 %v7372_v60, 16  ;;  %v5551_v38 = vcombine.low %v3675_v31, %v3685_v56  ;;  %v5552_v11 = vcombine.low %v3699_v30, %v3709_v48  ;;  %v7940_v51 = vadd.f32 %v7861_v41, %v1358_v50 }
 0x115   : > { %v7916_v17 = vpop.f32.mrf.mxu0  ;;  %v7942_v6 = vadd.f32 %v1656_v34, %v1356_v13  ;;  %v9092_v18 = vshll.u32 %v7372_v60, 16  ;;  %v3720_v23 = vshll.u32 %v7383_v3, 16  ;;  %v9093_v21 = vshrl.u32 %v7383_v3, 16 }
 0x116   : > { %v3713_v7 = vrot.slane %v9091_v32, 4  ;;  %v5896_v57 = vpop.f32.mrf.mxu1  ;;  %v3730_v46 = vshll.u32 %v5477_v49, 16  ;;  %6093 = vmatprep.mubr.msk.bf16.mxu1 %vm460_vm1, %v5551_v38  ;;  %v5585_v41 = vrot.slane %v7372_v60, 9  ;;  %v4372_v34 = vrot.slane %v7383_v3, 5 }
 0x117   : > { %v7929_v1 = vpop.f32.mrf.mxu0  ;;  %6128 = vmatmul.mubr.msk.bf16.vlgmr.msra.gmra.mxu0 %vm460_vm1, %v5601_v0  ;;  %v3716_v36 = vrot.slane %v9092_v18, 5  ;;  %v3726_v39 = vrot.slane %v9093_v21, 4  ;;  %v4375_v30 = vrot.slane %v5477_v49, 5  ;;  %v1361_v27 = vadd.f32 %v5895_v58, %v7692_v45  ;;  %6094 = vmatmul.mubr.msk.bf16.vlgmr.msra.gmra.mxu1 %vm460_vm1, %v5552_v11 }
 0x118   : > { %v1247_v62 = vpop.f32.mrf.mxu1  ;;  %v3722_v15 = vrot.slane %v3720_v23, 5  ;;  %v3732_v26 = vrot.slane %v3730_v46, 5  ;;  %v3741_v4 = vor.u32 %v7432_v59, %v7430_v9  ;;  %v4373_v60 = vsel %vm6546_vm6, %v5585_v41, %v4372_v34 }
 0x119   : > { %v7944_v28 = vpop.f32.mrf.mxu0  ;;  %v3717_v2 = vor.u32 %v3716_v36, %v3713_v7  ;;  %v4374_v13 = vrot.slane %v4372_v34, 4  ;;  %v7965_v3 = vadd.f32 %v7892_v61, %v1361_v27  ;;  %v3751_v45 = vor.u32 %v7450_v42, %v7442_v35 }
 0x11a   : > { %v5899_v50 = vpop.f32.mrf.mxu1  ;;  %v3727_v56 = vor.u32 %v3726_v39, %v3722_v15  ;;  %v3742_v48 = vrot.slane %v3741_v4, 4  ;;  %v3754_v0 = vshll.u32 %v5480_v16, 16  ;;  %v9094_v7 = vrot.slane %v7406_v47, 5 }
 0x11b   : > { %v7957_v31 = vpop.f32.mrf.mxu0  ;;  %v3718_v49 = vrot.slane %v3717_v2, 4  ;;  %v4376_v9 = vsel %vm6546_vm6, %v4374_v13, %v4375_v30  ;;  %v3752_v59 = vrot.slane %v3751_v45, 4  ;;  %v9095_v61 = vrot.slane %v7403_v63, 9 }
 0x11c   : > { %v7971_v32 = vpop.f32.mrf.mxu1  ;;  %v9096_v42 = vmov %v9094_v7  ;;  %v3728_v23 = vrot.slane %v3727_v56, 4  ;;  %v5602_v21 = vcombine.low %v4373_v60, %v4376_v9  ;;  %v3747_v39 = vsel %vm6560_vm7, %v3742_v48, %v7442_v35 }
 0x11d   : > { %v7969_v58 = vpop.f32.mrf.mxu0  ;;  %v4380_v38 = vsel %vm6546_vm6, %v9095_v61, %v9094_v7  ;;  %v4381_v11 = vrot.slane %v9096_v42, 4  ;;  %v3723_v36 = vsel %vm6560_vm7, %v3718_v49, %v3722_v15  ;;  %v3756_v63 = vrot.slane %v3754_v0, 5  ;;  %v5483_v15 = vld [vmem:[%s6360_s6 + $0x50] sm:$0x1] }
 0x11e   : > { %v7990_v46 = vpop.f32.mrf.mxu1  ;;  %v4382_v41 = vrot.slane %v5480_v16, 5  ;;  %v1359_v34 = vadd.f32 %v1244_v14, %v7715_v54  ;;  %v1362_v47 = vadd.f32 %v5896_v57, %v7731_v29  ;;  %v3733_v27 = vsel %vm6560_vm7, %v3728_v23, %v3732_v26  ;;  %6131 = vmatprep.mubr.msk.bf16.mxu0 %vm460_vm1, %v5602_v21 }
 0x11f   : > { %v7983_v18 = vpop.f32.mrf.mxu0  ;;  %v1360_v2 = vadd.f32 %v1247_v62, %v7735_v52  ;;  %v9097_v35 = vshrl.u32 %v7427_v20, 16  ;;  %v9098_v60 = vshll.u32 %v7427_v20, 16  ;;  %v5553_v54 = vcombine.low %v3723_v36, %v3733_v27 }
 0x120   : > { %v1263_v13 = vpop.f32.mrf.mxu1  ;;  %v3757_v29 = vsel %vm6560_vm7, %v3752_v59, %v3756_v63  ;;  %v4383_v14 = vsel %vm6546_vm6, %v4381_v11, %v4382_v41  ;;  %v8010_v57 = vadd.f32 %v7902_v19, %v1359_v34  ;;  %v8015_v45 = vadd.f32 %v7916_v17, %v1362_v47  ;;  %v5486_v11 = vld [vmem:[%s6360_s6 + $0x5c] sm:$0x1]  ;;  %v9101_v63 = vld [vmem:[#allocation16_spill] sm:$0xff]  ;;  %v9102_v41 = vld [vmem:[#allocation17_spill] sm:$0xff] }
 0x121   : > { %v7994_v30 = vpop.f32.mrf.mxu0  ;;  %v3761_v4 = vrot.slane %v9097_v35, 4  ;;  %v3764_v16 = vrot.slane %v9098_v60, 5  ;;  %v5554_v52 = vcombine.low %v3747_v39, %v3757_v29  ;;  %v5603_v62 = vcombine.low %v4380_v38, %v4383_v14  ;;  %6097 = vmatprep.mubr.msk.bf16.mxu1 %vm460_vm1, %v5553_v54  ;;  %v9100_v38 = vld [vmem:[#allocation7_spill] sm:$0xff] }
 0x122   : > { %v8018_v49 = vadd.f32 %v7929_v1, %v1360_v2  ;;  %v8020_v56 = vpop.f32.mrf.mxu1  ;;  %v3768_v0 = vshll.u32 %v7437_v53, 16  ;;  %v9099_v19 = vshrl.u32 %v7437_v53, 16  ;;  %v3778_v59 = vshll.u32 %v5483_v15, 16  ;;  %v9103_v2 = vld [vmem:[#allocation19_spill] sm:$0xff] }
 0x123   : > { %v8012_v26 = vpop.f32.mrf.mxu0  ;;  %v3765_v48 = vor.u32 %v3764_v16, %v3761_v4  ;;  %6098 = vmatmul.mubr.msk.bf16.gmra.mxu1 %vm460_vm1, %v5554_v52  ;;  %6132 = vmatmul.mubr.msk.bf16.gmra.mxu0 %vm460_vm1, %v5603_v62  ;;  %v5587_v17 = vrot.slane %v7427_v20, 9  ;;  %v4386_v1 = vrot.slane %v7437_v53, 5  ;;  %v4389_v61 = vrot.slane %v5483_v15, 5  ;;  %v9105_v62 = vld [vmem:[#allocation14_spill] sm:$0xff] }
 0x124   : > { %v3774_v9 = vrot.slane %v9099_v19, 4  ;;  %v1365_v42 = vadd.f32 %v5899_v50, %v9100_v38  ;;  %v8034_v36 = vpop.f32.mrf.mxu1  ;;  %v3770_v21 = vrot.slane %v3768_v0, 5  ;;  %v3780_v39 = vrot.slane %v3778_v59, 5  ;;  %v9104_v50 = vld [vmem:[#allocation21_spill] sm:$0xff] }
 0x125   : > { %v8026_v7 = vpop.f32.mrf.mxu0  ;;  %v3766_v23 = vrot.slane %v3765_v48, 4  ;;  %v3789_v34 = vor.u32 %v9102_v41, %v9101_v63  ;;  %v4387_v27 = vsel %vm6546_vm6, %v5587_v17, %v4386_v1  ;;  %v4388_v20 = vrot.slane %v4386_v1, 4  ;;  %v9107_v48 = vld [vmem:[#allocation13_spill] sm:$0xff] }
 0x126   : > { %v8043_v53 = vadd.f32 %v7944_v28, %v1365_v42  ;;  %v3799_v15 = vor.u32 %v9104_v50, %v9103_v2  ;;  %v8047_v35 = vpop.f32.mrf.mxu1  ;;  %v3775_v60 = vor.u32 %v3774_v9, %v3770_v21  ;;  %v3802_v54 = vshll.u32 %v5486_v11, 16 }
 0x127   : > { %v8038_v47 = vpop.f32.mrf.mxu0  ;;  %v3771_v4 = vsel %vm6560_vm7, %v3766_v23, %v3770_v21  ;;  %v3790_v16 = vrot.slane %v3789_v34, 4  ;;  %v4390_v14 = vsel %vm6546_vm6, %v4388_v20, %v4389_v61  ;;  %v9106_v28 = vrot.slane %v9105_v62, 5  ;;  %v9110_v34 = vld [vmem:[#allocation58_spill] sm:$0xff] }
 0x128   : > { %v3800_v52 = vrot.slane %v3799_v15, 4  ;;  %v9108_v0 = vrot.slane %v9107_v48, 9  ;;  %v8063_v9 = vpop.f32.mrf.mxu1  ;;  %v3776_v1 = vrot.slane %v3775_v60, 4  ;;  %v5604_v38 = vcombine.low %v4387_v27, %v4390_v14  ;;  %v5489_v15 = vld [vmem:[%s6360_s6 + $0x68] sm:$0x1] }
 0x129   : > { %v8051_v29 = vpop.f32.mrf.mxu0  ;;  %v9109_v59 = vmov %v9106_v28  ;;  %v3795_v61 = vsel %vm6560_vm7, %v3790_v16, %v9103_v2  ;;  %v3804_v42 = vrot.slane %v3802_v54, 5  ;;  %v4396_v21 = vrot.slane %v5486_v11, 5  ;;  %v9111_v11 = vld [vmem:[#allocation15_spill] sm:$0xff] }
 0x12a   : > { %v4394_v19 = vsel %vm6546_vm6, %v9108_v0, %v9106_v28  ;;  %v4395_v17 = vrot.slane %v9109_v59, 4  ;;  %v1363_v63 = vadd.f32 %v7971_v32, %v7800_v40  ;;  %v1366_v41 = vadd.f32 %v7990_v46, %v7804_v37  ;;  %v8075_v50 = vpop.f32.mrf.mxu1  ;;  %6135 = vmatprep.mubr.msk.bf16.mxu0 %vm460_vm1, %v5604_v38  ;;  %v9114_v0 = vld [vmem:[#allocation18_spill] sm:$0xff]  ;;  %v6245_v38 = vld [vmem:[%s6360_s6 + $0x60] sm:$0xf] }
 0x12b   : > { %v8068_v23 = vpop.f32.mrf.mxu0  ;;  %v1364_v20 = vadd.f32 %v1263_v13, %v9110_v34  ;;  %v3781_v27 = vsel %vm6560_vm7, %v3776_v1, %v3780_v39  ;;  %v3805_v2 = vsel %vm6560_vm7, %v3800_v52, %v3804_v42  ;;  %v9112_v60 = vshrl.u32 %v9111_v11, 16 }
 0x12c   : > { %v9113_v40 = vshll.u32 %v9111_v11, 16  ;;  %v5555_v46 = vcombine.low %v3771_v4, %v3781_v27  ;;  %v5556_v13 = vcombine.low %v3795_v61, %v3805_v2  ;;  %v4397_v39 = vsel %vm6546_vm6, %v4395_v17, %v4396_v21  ;;  %v8094_v14 = vpop.f32.mrf.mxu1  ;;  %v5492_v61 = vld [vmem:[%s6360_s6 + $0x74] sm:$0x1]  ;;  %v9117_v2 = vld [vmem:[#allocation23_spill] sm:$0xff]  ;;  %v9118_v11 = vld [vmem:[#allocation26_spill] sm:$0xff] }
 0x12d   : > { %v3809_v16 = vrot.slane %v9112_v60, 4  ;;  %v8087_v37 = vpop.f32.mrf.mxu0  ;;  %v8092_v54 = vadd.f32 %v7957_v31, %v1363_v63  ;;  %v5605_v52 = vcombine.low %v4394_v19, %v4397_v39  ;;  %v8097_v62 = vadd.f32 %v7969_v58, %v1366_v41  ;;  %v9116_v41 = vld [vmem:[#allocation10_spill] sm:$0xff] }
 0x12e   : > { %v3812_v32 = vrot.slane %v9113_v40, 5  ;;  %v8100_v28 = vadd.f32 %v7983_v18, %v1364_v20  ;;  %6101 = vmatprep.mubr.msk.bf16.mxu1 %vm460_vm1, %v5555_v46  ;;  %v3816_v59 = vshll.u32 %v9114_v0, 16  ;;  %v9115_v31 = vshrl.u32 %v9114_v0, 16  ;;  %v8110_v42 = vpop.f32.mrf.mxu1  ;;  %v6246_v18 = vld [vmem:[%s6360_s6 + $0x64] sm:$0xf]  ;;  %v9120_v40 = vld [vmem:[#allocation28_spill] sm:$0xff] }
 0x12f   : > { %v8102_v4 = vpop.f32.mrf.mxu0  ;;  %v3826_v1 = vshll.u32 %v5489_v15, 16  ;;  %v5589_v19 = vrot.slane %v6245_v38, 9  ;;  %6102 = vmatmul.mubr.msk.bf16.gmra.mxu1 %vm460_vm1, %v5556_v13  ;;  %6136 = vmatmul.mubr.msk.bf16.gmra.mxu0 %vm460_vm1, %v5605_v52  ;;  %v4400_v21 = vrot.slane %v6246_v18, 5  ;;  %v4403_v63 = vrot.slane %v5489_v15, 5 }
 0x130   : > { %v3813_v48 = vor.u32 %v3812_v32, %v3809_v16  ;;  %v3822_v17 = vrot.slane %v9115_v31, 4  ;;  %v1369_v34 = vadd.f32 %v8020_v56, %v9116_v41  ;;  %v3818_v20 = vrot.slane %v3816_v59, 5  ;;  %v9119_v16 = vld [vmem:[#allocation27_spill] sm:$0xff]  ;;  %v8121_v46 = vpop.f32.mrf.mxu1 }
 0x131   : > { %v3828_v27 = vrot.slane %v3826_v1, 5  ;;  %v3837_v60 = vor.u32 %v9118_v11, %v9117_v2  ;;  %v3847_v32 = vor.u32 %v9120_v40, %v9119_v16  ;;  %v8123_v13 = vpop.f32.mrf.mxu0  ;;  %v4401_v39 = vsel %vm6546_vm6, %v5589_v19, %v4400_v21  ;;  %v9121_v19 = vld [vmem:[#allocation22_spill] sm:$0xff]  ;;  %v9123_v2 = vld [vmem:[#allocation20_spill] sm:$0xff] }
 0x132   : > { %v3814_v58 = vrot.slane %v3813_v48, 4  ;;  %v4402_v52 = vrot.slane %v4400_v21, 4  ;;  %v8128_v15 = vadd.f32 %v7994_v30, %v1369_v34  ;;  %v3850_v56 = vshll.u32 %v5492_v61, 16  ;;  %v8132_v1 = vpop.f32.mrf.mxu1 }
 0x133   : > { %v3823_v0 = vor.u32 %v3822_v17, %v3818_v20  ;;  %v3838_v59 = vrot.slane %v3837_v60, 4  ;;  %v3848_v31 = vrot.slane %v3847_v32, 4  ;;  %v8134_v38 = vpop.f32.mrf.mxu0  ;;  %v9122_v21 = vrot.slane %v9121_v19, 5 }
 0x134   : > { %v3819_v48 = vsel %vm6560_vm7, %v3814_v58, %v3818_v20  ;;  %v4404_v18 = vsel %vm6546_vm6, %v4402_v52, %v4403_v63  ;;  %v3852_v41 = vrot.slane %v3850_v56, 5  ;;  %v9124_v30 = vrot.slane %v9123_v2, 9  ;;  %v8149_v63 = vpop.f32.mrf.mxu1 }
 0x135   : > { %v9125_v58 = vmov %v9122_v21  ;;  %v3824_v20 = vrot.slane %v3823_v0, 4  ;;  %v5606_v11 = vcombine.low %v4401_v39, %v4404_v18  ;;  %v3843_v60 = vsel %vm6560_vm7, %v3838_v59, %v9119_v16  ;;  %v8151_v32 = vpop.f32.mrf.mxu0  ;;  %v5495_v59 = vld [vmem:[%s6360_s6 + $0x80] sm:$0x1] }
 0x136   : > { %v4408_v34 = vsel %vm6546_vm6, %v9124_v30, %v9122_v21  ;;  %v4409_v17 = vrot.slane %v9125_v58, 4  ;;  %v4410_v40 = vrot.slane %v5492_v61, 5  ;;  %v3853_v52 = vsel %vm6560_vm7, %v3848_v31, %v3852_v41  ;;  %v9126_v31 = vld [vmem:[#allocation24_spill] sm:$0xff]  ;;  %v6247_v30 = vld [vmem:[%s6360_s6 + $0x7c] sm:$0xf] }
 0x137   : > { %v1367_v56 = vadd.f32 %v8034_v36, %v7868_v10  ;;  %v1370_v19 = vadd.f32 %v8047_v35, %v7873_v55  ;;  %v1368_v39 = vadd.f32 %v8063_v9, %v7877_v43  ;;  %v3829_v61 = vsel %vm6560_vm7, %v3824_v20, %v3828_v27  ;;  %6139 = vmatprep.mubr.msk.bf16.mxu0 %vm460_vm1, %v5606_v11  ;;  %v8169_v36 = vpop.f32.mrf.mxu1  ;;  %v8177_v27 = vpop.f32.mrf.mxu0 }
 0x138   : > { %v5558_v16 = vcombine.low %v3843_v60, %v3853_v52  ;;  %v4411_v0 = vsel %vm6546_vm6, %v4409_v17, %v4410_v40  ;;  %v9127_v18 = vshrl.u32 %v9126_v31, 16  ;;  %v5557_v55 = vcombine.low %v3819_v48, %v3829_v61  ;;  %v9131_v17 = vld [vmem:[#allocation25_spill] sm:$0xff]  ;;  %v9134_v61 = vld [vmem:[#allocation32_spill] sm:$0xff] }
 0x139   : > { %v5607_v35 = vcombine.low %v4408_v34, %v4411_v0  ;;  %v8172_v43 = vadd.f32 %v8012_v26, %v1367_v56  ;;  %v8175_v9 = vadd.f32 %v8026_v7, %v1370_v19  ;;  %v8180_v41 = vadd.f32 %v8038_v47, %v1368_v39  ;;  %v8187_v20 = vpop.f32.mrf.mxu1  ;;  %v6248_v7 = vld [vmem:[%s6360_s6 + $0x78] sm:$0xf]  ;;  %v9133_v56 = vld [vmem:[#allocation5_spill] sm:$0xff]  ;;  %v5498_v39 = vld [vmem:[%s6360_s6 + $0x8c] sm:$0x1] }
 0x13a   : > { %v3857_v10 = vrot.slane %v9127_v18, 4  ;;  %v9130_v21 = vshll.u32 %v9126_v31, 16  ;;  %v3864_v58 = vshll.u32 %v6247_v30, 16  ;;  %v9132_v48 = vshrl.u32 %v9131_v17, 16  ;;  %6105 = vmatprep.mubr.msk.bf16.mxu1 %vm460_vm1, %v5557_v55  ;;  %v9135_v0 = vld [vmem:[#allocation34_spill] sm:$0xff]  ;;  %v9137_v17 = vld [vmem:[#allocation37_spill] sm:$0xff] }
 0x13b   : > { %9128 = vst [vmem:[#allocation7_spill] sm:$0xff] %v8175_v9  ;;  %9129 = vst [vmem:[#allocation16_spill] sm:$0xff] %v8180_v41  ;;  %6140 = vmatmul.mubr.msk.bf16.gmra.mxu0 %vm460_vm1, %v5607_v35  ;;  %v3874_v26 = vshll.u32 %v5495_v59, 16  ;;  %v5591_v11 = vrot.slane %v6248_v7, 9  ;;  %v4414_v47 = vrot.slane %v6247_v30, 5  ;;  %v4417_v60 = vrot.slane %v5495_v59, 5  ;;  %6106 = vmatmul.mubr.msk.bf16.gmra.mxu1 %vm460_vm1, %v5558_v16  ;;  %v8202_v59 = vpop.f32.mrf.mxu0 }
 0x13c   : > { %v3860_v2 = vrot.slane %v9130_v21, 5  ;;  %v3870_v34 = vrot.slane %v9132_v48, 4  ;;  %v3866_v52 = vrot.slane %v3864_v58, 5  ;;  %v1373_v19 = vadd.f32 %v8075_v50, %v9133_v56  ;;  %v9136_v21 = vld [vmem:[#allocation36_spill] sm:$0xff]  ;;  %v8207_v58 = vpop.f32.mrf.mxu1  ;;  %v9141_v56 = vld [vmem:[#allocation29_spill] sm:$0xff] }
 0x13d   : > { %v3885_v31 = vor.u32 %v9135_v0, %v9134_v61  ;;  %v3876_v18 = vrot.slane %v3874_v26, 5  ;;  %v4415_v55 = vsel %vm6546_vm6, %v5591_v11, %v4414_v47  ;;  %v4416_v35 = vrot.slane %v4414_v47, 4  ;;  %v9139_v11 = vld [vmem:[#allocation30_spill] sm:$0xff] }
 0x13e   : > { %v3861_v40 = vor.u32 %v3860_v2, %v3857_v10  ;;  %v3895_v30 = vor.u32 %v9137_v17, %v9136_v21  ;;  %v3871_v10 = vor.u32 %v3870_v34, %v3866_v52  ;;  %v8205_v2 = vadd.f32 %v8051_v29, %v1373_v19  ;;  %v8217_v34 = vpop.f32.mrf.mxu0 }
 0x13f   : > { %v3886_v50 = vrot.slane %v3885_v31, 4  ;;  %v4418_v48 = vsel %vm6546_vm6, %v4416_v35, %v4417_v60  ;;  %v3898_v7 = vshll.u32 %v5498_v39, 16  ;;  %v9140_v47 = vrot.slane %v9139_v11, 5  ;;  %v8224_v31 = vpop.f32.mrf.mxu1 }
 0x140   : > { %v3862_v16 = vrot.slane %v3861_v40, 4  ;;  %9138 = vst [vmem:[#allocation17_spill] sm:$0xff] %v8205_v2  ;;  %v3896_v26 = vrot.slane %v3895_v30, 4  ;;  %v9142_v61 = vrot.slane %v9141_v56, 9  ;;  %v3872_v40 = vrot.slane %v3871_v10, 4  ;;  %v8230_v2 = vpop.f32.mrf.mxu0 }
 0x141   : > { %v5608_v19 = vcombine.low %v4415_v55, %v4418_v48  ;;  %v3891_v60 = vsel %vm6560_vm7, %v3886_v50, %v9136_v21  ;;  %v3900_v35 = vrot.slane %v3898_v7, 5  ;;  %v9143_v17 = vmov %v9140_v47  ;;  %v9145_v55 = vld [vmem:[#allocation39_spill] sm:$0xff]  ;;  %v5501_v50 = vld [vmem:[%s6360_s6 + $0x98] sm:$0x1]  ;;  %v8242_v11 = vpop.f32.mrf.mxu1 }
 0x142   : > { %v4422_v0 = vsel %vm6546_vm6, %v9142_v61, %v9140_v47  ;;  %v3867_v29 = vsel %vm6560_vm7, %v3862_v16, %v3866_v52  ;;  %v4423_v30 = vrot.slane %v9143_v17, 4  ;;  %v4424_v56 = vrot.slane %v5498_v39, 5  ;;  %v9144_v47 = vld [vmem:[#allocation6_spill] sm:$0xff]  ;;  %v9146_v16 = vld [vmem:[#allocation40_spill] sm:$0xff]  ;;  %v9147_v48 = vld [vmem:[#allocation31_spill] sm:$0xff] }
 0x143   : > { %v1371_v61 = vadd.f32 %v8094_v14, %v9144_v47  ;;  %v3877_v52 = vsel %vm6560_vm7, %v3872_v40, %v3876_v18  ;;  %6143 = vmatprep.mubr.msk.bf16.mxu0 %vm460_vm1, %v5608_v19  ;;  %v1374_v21 = vadd.f32 %v8110_v42, %v9145_v55  ;;  %v1372_v10 = vadd.f32 %v8121_v46, %v9146_v16  ;;  %v8251_v42 = vpop.f32.mrf.mxu0  ;;  %v9155_v16 = vld [vmem:[#allocation41_spill] sm:$0xff] }
 0x144   : > { %v9148_v7 = vshrl.u32 %v9147_v48, 16  ;;  %v5559_v14 = vcombine.low %v3867_v29, %v3877_v52  ;;  %v3901_v17 = vsel %vm6560_vm7, %v3896_v26, %v3900_v35  ;;  %v4425_v18 = vsel %vm6546_vm6, %v4423_v30, %v4424_v56  ;;  %v8259_v26 = vpop.f32.mrf.mxu1  ;;  %v9153_v30 = vld [vmem:[#allocation33_spill] sm:$0xff] }
 0x145   : > { %v8249_v40 = vadd.f32 %v8068_v23, %v1371_v61  ;;  %v5560_v46 = vcombine.low %v3891_v60, %v3901_v17  ;;  %v5609_v19 = vcombine.low %v4422_v0, %v4425_v18  ;;  %v8254_v47 = vadd.f32 %v8087_v37, %v1374_v21  ;;  %v6249_v37 = vld [vmem:[%s6360_s6 + $0x90] sm:$0xf]  ;;  %v6250_v52 = vld [vmem:[%s6360_s6 + $0x94] sm:$0xf]  ;;  %v9156_v18 = vld [vmem:[#allocation42_spill] sm:$0xff] }
 0x146   : > { %v3905_v39 = vrot.slane %v9148_v7, 4  ;;  %v8257_v29 = vadd.f32 %v8102_v4, %v1372_v10  ;;  %6109 = vmatprep.mubr.msk.bf16.mxu1 %vm460_vm1, %v5559_v14  ;;  %v9152_v35 = vshll.u32 %v9147_v48, 16  ;;  %v3912_v56 = vshll.u32 %v9153_v30, 16  ;;  %v5504_v48 = vld [vmem:[%s6360_s6 + $0xa4] sm:$0x1] }
 0x147   : > { %9149 = vst [vmem:[#allocation19_spill] sm:$0xff] %v8249_v40  ;;  %9150 = vst [vmem:[#allocation21_spill] sm:$0xff] %v8254_v47  ;;  %v9154_v61 = vshrl.u32 %v9153_v30, 16  ;;  %v3922_v0 = vshll.u32 %v5501_v50, 16  ;;  %6110 = vmatmul.mubr.msk.bf16.gmra.mxu1 %vm460_vm1, %v5560_v46  ;;  %6144 = vmatmul.mubr.msk.bf16.gmra.mxu0 %vm460_vm1, %v5609_v19  ;;  %v5593_v4 = vrot.slane %v6249_v37, 9  ;;  %v4428_v55 = vrot.slane %v6250_v52, 5 }
 0x148   : > { %9151 = vst [vmem:[#allocation14_spill] sm:$0xff] %v8257_v29  ;;  %v3908_v23 = vrot.slane %v9152_v35, 5  ;;  %v4431_v21 = vrot.slane %v5501_v50, 5  ;;  %v1377_v10 = vadd.f32 %v8132_v1, %v9155_v16  ;;  %v3914_v14 = vrot.slane %v3912_v56, 5  ;;  %v9157_v35 = vld [vmem:[#allocation43_spill] sm:$0xff]  ;;  %v9160_v52 = vld [vmem:[#allocation48_spill] sm:$0xff]  ;;  %v8285_v1 = vpop.f32.mrf.mxu1 }
 0x149   : > { %v3918_v60 = vrot.slane %v9154_v61, 4  ;;  %v3924_v17 = vrot.slane %v3922_v0, 5  ;;  %v3933_v30 = vor.u32 %v9157_v35, %v9156_v18  ;;  %v8276_v61 = vpop.f32.mrf.mxu0  ;;  %v4429_v46 = vsel %vm6546_vm6, %v5593_v4, %v4428_v55  ;;  %v9159_v50 = vld [vmem:[#allocation47_spill] sm:$0xff]  ;;  %v9161_v4 = vld [vmem:[#allocation38_spill] sm:$0xff] }
 0x14a   : > { %v3909_v7 = vor.u32 %v3908_v23, %v3905_v39  ;;  %v4430_v19 = vrot.slane %v4428_v55, 4  ;;  %v8281_v37 = vadd.f32 %v8123_v13, %v1377_v10  ;;  %v3943_v29 = vor.u32 %v9160_v52, %v9159_v50  ;;  %v9163_v47 = vld [vmem:[#allocation35_spill] sm:$0xff] }
 0x14b   : > { %v3919_v23 = vor.u32 %v3918_v60, %v3914_v14  ;;  %v3934_v56 = vrot.slane %v3933_v30, 4  ;;  %v3946_v0 = vshll.u32 %v5504_v48, 16  ;;  %v8287_v16 = vpop.f32.mrf.mxu0  ;;  %v9162_v55 = vrot.slane %v9161_v4, 5  ;;  %v8299_v60 = vpop.f32.mrf.mxu1 }
 0x14c   : > { %9158 = vst [vmem:[#allocation13_spill] sm:$0xff] %v8281_v37  ;;  %v3910_v39 = vrot.slane %v3909_v7, 4  ;;  %v4432_v18 = vsel %vm6546_vm6, %v4430_v19, %v4431_v21  ;;  %v3944_v35 = vrot.slane %v3943_v29, 4  ;;  %v9164_v13 = vrot.slane %v9163_v47, 9 }
 0x14d   : > { %v9165_v52 = vmov %v9162_v55  ;;  %v3920_v37 = vrot.slane %v3919_v23, 4  ;;  %v5610_v40 = vcombine.low %v4429_v46, %v4432_v18  ;;  %v3939_v29 = vsel %vm6560_vm7, %v3934_v56, %v9159_v50  ;;  %v8306_v21 = vpop.f32.mrf.mxu0  ;;  %v8312_v41 = vpop.f32.mrf.mxu1  ;;  %v9168_v46 = vld [vmem:[#allocation50_spill] sm:$0xff]  ;;  %v9169_v23 = vld [vmem:[#allocation45_spill] sm:$0xff] }
 0x14e   : > { %v4436_v10 = vsel %vm6546_vm6, %v9164_v13, %v9162_v55  ;;  %v4437_v7 = vrot.slane %v9165_v52, 4  ;;  %v3915_v30 = vsel %vm6560_vm7, %v3910_v39, %v3914_v14  ;;  %v3948_v47 = vrot.slane %v3946_v0, 5  ;;  %v9166_v55 = vld [vmem:[#allocation44_spill] sm:$0xff]  ;;  %v9167_v13 = vld [vmem:[#allocation49_spill] sm:$0xff] }
 0x14f   : > { %v4438_v19 = vrot.slane %v5504_v48, 5  ;;  %v1375_v4 = vadd.f32 %v8149_v63, %v9166_v55  ;;  %v1378_v52 = vadd.f32 %v8169_v36, %v9167_v13  ;;  %v3925_v14 = vsel %vm6560_vm7, %v3920_v37, %v3924_v17  ;;  %6147 = vmatprep.mubr.msk.bf16.mxu0 %vm460_vm1, %v5610_v40  ;;  %v5507_v39 = vld [vmem:[%s6360_s6 + $0xb0] sm:$0x1]  ;;  %v8331_v40 = vpop.f32.mrf.mxu1 }
 0x150   : > { %v1376_v50 = vadd.f32 %v8187_v20, %v9168_v46  ;;  %v9170_v56 = vshrl.u32 %v9169_v23, 16  ;;  %v9171_v0 = vshll.u32 %v9169_v23, 16  ;;  %v5561_v18 = vcombine.low %v3915_v30, %v3925_v14  ;;  %v8339_v30 = vpop.f32.mrf.mxu0 }
 0x151   : > { %v3949_v36 = vsel %vm6560_vm7, %v3944_v35, %v3948_v47  ;;  %v4439_v55 = vsel %vm6546_vm6, %v4437_v7, %v4438_v19  ;;  %v8329_v17 = vadd.f32 %v8134_v38, %v1375_v4  ;;  %v8334_v13 = vadd.f32 %v8151_v32, %v1378_v52  ;;  %v9175_v7 = vld [vmem:[#allocation46_spill] sm:$0xff]  ;;  %v9177_v52 = vld [vmem:[#allocation51_spill] sm:$0xff] }
 0x152   : > { %v3953_v48 = vrot.slane %v9170_v56, 4  ;;  %v3956_v63 = vrot.slane %v9171_v0, 5  ;;  %v5562_v20 = vcombine.low %v3939_v29, %v3949_v36  ;;  %v5611_v37 = vcombine.low %v4436_v10, %v4439_v55  ;;  %6113 = vmatprep.mubr.msk.bf16.mxu1 %vm460_vm1, %v5561_v18  ;;  %v8345_v29 = vpop.f32.mrf.mxu1  ;;  %v9179_v18 = vld [vmem:[#allocation52_spill] sm:$0xff] }
 0x153   : > { %9172 = vst [vmem:[#allocation58_spill] sm:$0xff] %v8329_v17  ;;  %9173 = vst [vmem:[#allocation15_spill] sm:$0xff] %v8334_v13  ;;  %v8337_v46 = vadd.f32 %v8177_v27, %v1376_v50  ;;  %v3960_v47 = vshll.u32 %v9175_v7, 16  ;;  %v9176_v38 = vshrl.u32 %v9175_v7, 16  ;;  %v3970_v4 = vshll.u32 %v5507_v39, 16 }
 0x154   : > { %v3957_v35 = vor.u32 %v3956_v63, %v3953_v48  ;;  %6114 = vmatmul.mubr.msk.bf16.gmra.mxu1 %vm460_vm1, %v5562_v20  ;;  %6148 = vmatmul.mubr.msk.bf16.gmra.mxu0 %vm460_vm1, %v5611_v37  ;;  %v5595_v32 = vrot.slane %v9169_v23, 9  ;;  %v4442_v27 = vrot.slane %v9175_v7, 5  ;;  %v4445_v10 = vrot.slane %v5507_v39, 5  ;;  %v5510_v50 = vld [vmem:[%s6360_s6 + $0xbc] sm:$0x1]  ;;  %v9178_v63 = vld [vmem:[#allocation9_spill] sm:$0xff]  ;;  %v8356_v55 = vpop.f32.mrf.mxu1 }
 0x155   : > { %9174 = vst [vmem:[#allocation18_spill] sm:$0xff] %v8337_v46  ;;  %v3966_v19 = vrot.slane %v9176_v38, 4  ;;  %v1381_v14 = vadd.f32 %v8207_v58, %v9177_v52  ;;  %v3962_v48 = vrot.slane %v3960_v47, 5  ;;  %v3972_v0 = vrot.slane %v3970_v4, 5  ;;  %v9181_v39 = vld [vmem:[#allocation53_spill] sm:$0xff]  ;;  %v9182_v7 = vld [vmem:[#allocation55_spill] sm:$0xff]  ;;  %v8365_v58 = vpop.f32.mrf.mxu0 }
 0x156   : > { %v3958_v56 = vrot.slane %v3957_v35, 4  ;;  %v3981_v36 = vor.u32 %v9179_v18, %v9178_v63  ;;  %v4443_v20 = vsel %vm6546_vm6, %v5595_v32, %v4442_v27  ;;  %v4444_v37 = vrot.slane %v4442_v27, 4  ;;  %v8369_v63 = vpop.f32.mrf.mxu1  ;;  %v9183_v18 = vld [vmem:[#allocation4_spill] sm:$0xff] }
 0x157   : > { %v8361_v23 = vadd.f32 %v8202_v59, %v1381_v14  ;;  %v3991_v38 = vor.u32 %v9182_v7, %v9181_v39  ;;  %v3967_v47 = vor.u32 %v3966_v19, %v3962_v48  ;;  %v3994_v52 = vshll.u32 %v5510_v50, 16  ;;  %v9185_v14 = vld [vmem:[#allocation3_spill] sm:$0xff]  ;;  %v8381_v19 = vpop.f32.mrf.mxu0 }
 0x158   : > { %v3963_v35 = vsel %vm6560_vm7, %v3958_v56, %v3962_v48  ;;  %v3982_v4 = vrot.slane %v3981_v36, 4  ;;  %v4446_v32 = vsel %vm6546_vm6, %v4444_v37, %v4445_v10  ;;  %v9184_v59 = vrot.slane %v9183_v18, 5 }
 0x159   : > { %9180 = vst [vmem:[#allocation10_spill] sm:$0xff] %v8361_v23  ;;  %v3992_v27 = vrot.slane %v3991_v38, 4  ;;  %v9186_v23 = vrot.slane %v9185_v14, 9  ;;  %v3968_v48 = vrot.slane %v3967_v47, 4  ;;  %v5612_v36 = vcombine.low %v4443_v20, %v4446_v32  ;;  %v8386_v38 = vpop.f32.mrf.mxu1  ;;  %v9188_v14 = vld [vmem:[#allocation56_spill] sm:$0xff]  ;;  %v8394_v9 = vpop.f32.mrf.mxu0 }
 0x15a   : > { %v9187_v46 = vmov %v9184_v59  ;;  %v3987_v10 = vsel %vm6560_vm7, %v3982_v4, %v9181_v39  ;;  %v3996_v37 = vrot.slane %v3994_v52, 5  ;;  %v4452_v13 = vrot.slane %v5510_v50, 5  ;;  %v5513_v50 = vld [vmem:[%s6360_s6 + $0xc8] sm:$0x1] }
 0x15b   : > { %v4450_v7 = vsel %vm6546_vm6, %v9186_v23, %v9184_v59  ;;  %v4451_v56 = vrot.slane %v9187_v46, 4  ;;  %v1379_v17 = vadd.f32 %v8224_v31, %v9188_v14  ;;  %v9189_v23 = vld [vmem:[#allocation57_spill] sm:$0xff]  ;;  %v9190_v59 = vld [vmem:[#allocation59_spill] sm:$0xff]  ;;  %v3973_v20 = vsel %vm6560_vm7, %v3968_v48, %v3972_v0  ;;  %6151 = vmatprep.mubr.msk.bf16.mxu0 %vm460_vm1, %v5612_v36  ;;  %v9191_v47 = vld [vmem:[#allocation8_spill] sm:$0xff]  ;;  %v8406_v32 = vpop.f32.mrf.mxu1  ;;  %v8413_v36 = vpop.f32.mrf.mxu0 }
 0x15c   : > { %v1382_v18 = vadd.f32 %v8242_v11, %v9189_v23  ;;  %v1380_v46 = vadd.f32 %v8259_v26, %v9190_v59  ;;  %v3997_v39 = vsel %vm6560_vm7, %v3992_v27, %v3996_v37  ;;  %v9192_v4 = vshrl.u32 %v9191_v47, 16 }
 0x15d   : > { %v9193_v52 = vshll.u32 %v9191_v47, 16  ;;  %v5563_v26 = vcombine.low %v3963_v35, %v3973_v20  ;;  %v5564_v14 = vcombine.low %v3987_v10, %v3997_v39  ;;  %v4453_v0 = vsel %vm6546_vm6, %v4451_v56, %v4452_v13  ;;  %v9197_v35 = vld [vmem:[#allocation54_spill] sm:$0xff] }
 0x15e   : > { %v4001_v31 = vrot.slane %v9192_v4, 4  ;;  %v8411_v48 = vadd.f32 %v8217_v34, %v1379_v17  ;;  %v5613_v27 = vcombine.low %v4450_v7, %v4453_v0  ;;  %v8416_v37 = vadd.f32 %v8230_v2, %v1382_v18  ;;  %v8421_v4 = vpop.f32.mrf.mxu1  ;;  %v5516_v7 = vld [vmem:[%s6360_s6 + $0xd4] sm:$0x1] }
 0x15f   : > { %v4004_v11 = vrot.slane %v9193_v52, 5  ;;  %v8419_v23 = vadd.f32 %v8251_v42, %v1380_v46  ;;  %6117 = vmatprep.mubr.msk.bf16.mxu1 %vm460_vm1, %v5563_v26  ;;  %v4008_v10 = vshll.u32 %v9197_v35, 16  ;;  %v9198_v13 = vshrl.u32 %v9197_v35, 16  ;;  %v9199_v46 = vld [vmem:[#allocation11_spill] sm:$0xff]  ;;  %v9201_v0 = vld [vmem:[#allocation61_spill] sm:$0xff] }
 0x160   : > { %9194 = vst [vmem:[#allocation23_spill] sm:$0xff] %v8411_v48  ;;  %9195 = vst [vmem:[#allocation26_spill] sm:$0xff] %v8416_v37  ;;  %v4018_v17 = vshll.u32 %v5513_v50, 16  ;;  %v5597_v56 = vrot.slane %v9191_v47, 9  ;;  %6118 = vmatmul.mubr.msk.bf16.gmra.mxu1 %vm460_vm1, %v5564_v14  ;;  %6152 = vmatmul.mubr.msk.bf16.gmra.mxu0 %vm460_vm1, %v5613_v27  ;;  %v4456_v42 = vrot.slane %v9197_v35, 5  ;;  %v4459_v18 = vrot.slane %v5513_v50, 5  ;;  %v5964_v39 = vpop.f32.mrf.mxu1 }
 0x161   : > { %9196 = vst [vmem:[#allocation27_spill] sm:$0xff] %v8419_v23  ;;  %v4005_v59 = vor.u32 %v4004_v11, %v4001_v31  ;;  %v4014_v34 = vrot.slane %v9198_v13, 4  ;;  %v1385_v20 = vadd.f32 %v8285_v1, %v9199_v46  ;;  %v4010_v31 = vrot.slane %v4008_v10, 5  ;;  %v9200_v11 = vld [vmem:[#allocation12_spill] sm:$0xff]  ;;  %v9202_v47 = vld [vmem:[#allocation62_spill] sm:$0xff]  ;;  %v5997_v23 = vpop.f32.mrf.mxu0 }
 0x162   : > { %v4020_v52 = vrot.slane %v4018_v17, 5  ;;  %v4029_v26 = vor.u32 %v9200_v11, %v7852_v5  ;;  %v4039_v13 = vor.u32 %v9202_v47, %v9201_v0  ;;  %v4457_v14 = vsel %vm6546_vm6, %v5597_v56, %v4456_v42  ;;  %v2047_v35 = vpop.f32.mrf.mxu1  ;;  %v9205_v56 = vld [vmem:[#allocation60_spill] sm:$0xff] }
 0x163   : > { %v4006_v2 = vrot.slane %v4005_v59, 4  ;;  %v4458_v27 = vrot.slane %v4456_v42, 4  ;;  %v8441_v59 = vadd.f32 %v8276_v61, %v1385_v20  ;;  %v4042_v50 = vshll.u32 %v5516_v7, 16  ;;  %v2722_v5 = vpop.f32.mrf.mxu0 }
 0x164   : > { %v4015_v10 = vor.u32 %v4014_v34, %v4010_v31  ;;  %v4030_v17 = vrot.slane %v4029_v26, 4  ;;  %v4040_v46 = vrot.slane %v4039_v13, 4  ;;  %v9204_v37 = vrot.slane %v7822_v44, 5  ;;  %v5967_v48 = vpop.f32.mrf.mxu1  ;;  %v9208_v44 = vld [vmem:[#allocation63_spill] sm:$0xff] }
 0x165   : > { %9203 = vst [vmem:[#allocation28_spill] sm:$0xff] %v8441_v59  ;;  %v4011_v1 = vsel %vm6560_vm7, %v4006_v2, %v4010_v31  ;;  %v4460_v11 = vsel %vm6546_vm6, %v4458_v27, %v4459_v18  ;;  %v4044_v47 = vrot.slane %v4042_v50, 5  ;;  %v9206_v42 = vrot.slane %v9205_v56, 9  ;;  %v5998_v18 = vpop.f32.mrf.mxu0 }
 0x166   : > { %v9207_v20 = vmov %v9204_v37  ;;  %v4016_v2 = vrot.slane %v4015_v10, 4  ;;  %v5614_v34 = vcombine.low %v4457_v14, %v4460_v11  ;;  %v4035_v31 = vsel %vm6560_vm7, %v4030_v17, %v9201_v0  ;;  %v2060_v10 = vpop.f32.mrf.mxu1 }
 0x167   : > { %v4464_v61 = vsel %vm6546_vm6, %v9206_v42, %v9204_v37  ;;  %v4465_v59 = vrot.slane %v9207_v20, 4  ;;  %v4466_v26 = vrot.slane %v5516_v7, 5  ;;  %v4045_v13 = vsel %vm6560_vm7, %v4040_v46, %v4044_v47  ;;  %v9209_v47 = vld [vmem:[#allocation7_spill] sm:$0xff] }
 0x168   : > { %v1383_v27 = vadd.f32 %v8299_v60, %v7870_v12  ;;  %v1386_v37 = vadd.f32 %v8312_v41, %v7875_v24  ;;  %v1384_v50 = vadd.f32 %v8331_v40, %v9208_v44  ;;  %v4021_v14 = vsel %vm6560_vm7, %v4016_v2, %v4020_v52  ;;  %6155 = vmatprep.mubr.msk.bf16.mxu0 %vm460_vm1, %v5614_v34  ;;  %v2725_v12 = vpop.f32.mrf.mxu0  ;;  %v5968_v25 = vpop.f32.mrf.mxu1 }
 0x169   : > { %v5566_v7 = vcombine.low %v4035_v31, %v4045_v13  ;;  %v4467_v0 = vsel %vm6546_vm6, %v4465_v59, %v4466_v26  ;;  %v2157_v17 = vadd.f32 %v8345_v29, %v7905_v22  ;;  %v5565_v60 = vcombine.low %v4011_v1, %v4021_v14  ;;  %v9211_v31 = vld [vmem:[#allocation17_spill] sm:$0xff] }
 0x16a   : > { %v5615_v46 = vcombine.low %v4464_v61, %v4467_v0  ;;  %v8474_v24 = vadd.f32 %v8287_v16, %v1383_v27  ;;  %v8477_v41 = vadd.f32 %v8306_v21, %v1386_v37  ;;  %v8480_v40 = vadd.f32 %v8339_v30, %v1384_v50  ;;  %v6001_v29 = vpop.f32.mrf.mxu0  ;;  %v9212_v27 = vld [vmem:[#allocation19_spill] sm:$0xff]  ;;  %v9213_v14 = vld [vmem:[#allocation21_spill] sm:$0xff] }
 0x16b   : > { %v8483_v52 = vadd.f32 %v8365_v58, %v2157_v17  ;;  %v2155_v8 = vadd.f32 %v8356_v55, %v7924_v33  ;;  %v2158_v22 = vadd.f32 %v8369_v63, %v7940_v51  ;;  %6121 = vmatprep.mubr.msk.bf16.mxu1 %vm460_vm1, %v5565_v60  ;;  %v2156_v16 = vadd.f32 %v8386_v38, %v7942_v6  ;;  %v2063_v58 = vpop.f32.mrf.mxu1 }
 0x16c   : > { %6156 = vmatmul.mubr.msk.bf16.gmra.mxu0 %vm460_vm1, %v5615_v46  ;;  %v2161_v21 = vadd.f32 %v8406_v32, %v7965_v3  ;;  %v2159_v30 = vadd.f32 %v8421_v4, %v8010_v57  ;;  %6122 = vmatmul.mubr.msk.bf16.gmra.mxu1 %vm460_vm1, %v5566_v7  ;;  %v2162_v55 = vadd.f32 %v5964_v39, %v8015_v45  ;;  %v2738_v6 = vpop.f32.mrf.mxu0 }
 0x16d   : > { %v8499_v33 = vadd.f32 %v8381_v19, %v2155_v8  ;;  %v8502_v51 = vadd.f32 %v8394_v9, %v2158_v22  ;;  %v2160_v63 = vadd.f32 %v2047_v35, %v8018_v49  ;;  %v8507_v38 = vadd.f32 %v8413_v36, %v2156_v16  ;;  %v5971_v4 = vpop.f32.mrf.mxu1  ;;  %v9215_v22 = vld [vmem:[#allocation13_spill] sm:$0xff] }
 0x16e   : > { %v8509_v3 = vadd.f32 %v5997_v23, %v2161_v21  ;;  %v8511_v57 = vadd.f32 %v2722_v5, %v2159_v30  ;;  %v2165_v32 = vadd.f32 %v5967_v48, %v8043_v53  ;;  %v8514_v19 = vadd.f32 %v5998_v18, %v2162_v55  ;;  %v6002_v49 = vpop.f32.mrf.mxu0 }
 0x16f   : > { %v8516_v59 = vadd.f32 %v2725_v12, %v2160_v63  ;;  %v2163_v9 = vadd.f32 %v2060_v10, %v8092_v54  ;;  %v2166_v45 = vadd.f32 %v5968_v25, %v8097_v62  ;;  %v2164_v36 = vadd.f32 %v2063_v58, %v8100_v28  ;;  %v2076_v35 = vpop.f32.mrf.mxu1  ;;  %v9210_v28 = vld [vmem:[#allocation16_spill] sm:$0xff]  ;;  %v9214_v12 = vld [vmem:[#allocation14_spill] sm:$0xff] }
 0x170   : > { %v8520_v39 = vadd.f32 %v6001_v29, %v2165_v32  ;;  %v2169_v23 = vadd.f32 %v5971_v4, %v8128_v15  ;;  %v2741_v48 = vpop.f32.mrf.mxu0  ;;  %v2167_v5 = vadd.f32 %v2076_v35, %v8172_v43  ;;  %v9216_v58 = vld [vmem:[#allocation58_spill] sm:$0xff]  ;;  %v9217_v4 = vld [vmem:[#allocation15_spill] sm:$0xff] }
 0x171   : > { %v8524_v1 = vadd.f32 %v2738_v6, %v2163_v9  ;;  %v8526_v53 = vadd.f32 %v6002_v49, %v2166_v45  ;;  %v8529_v11 = vadd.f32 %v2741_v48, %v2164_v36  ;;  %v5972_v54 = vpop.f32.mrf.mxu1  ;;  %v9218_v36 = vld [vmem:[#allocation18_spill] sm:$0xff] }
 0x172   : > { %v2170_v62 = vadd.f32 %v5972_v54, %v9209_v47  ;;  %v6005_v56 = vpop.f32.mrf.mxu0 }
 0x173   : > { %v2079_v42 = vpop.f32.mrf.mxu1  ;;  %v8532_v61 = vadd.f32 %v6005_v56, %v2169_v23 }
 0x174   : > { %v2168_v20 = vadd.f32 %v2079_v42, %v9210_v28  ;;  %v2754_v15 = vpop.f32.mrf.mxu0  ;;  %v9220_v42 = vld [vmem:[#allocation23_spill] sm:$0xff] }
 0x175   : > { %v5975_v2 = vpop.f32.mrf.mxu1  ;;  %v8535_v34 = vadd.f32 %v2754_v15, %v2167_v5  ;;  %v9219_v5 = vld [vmem:[#allocation10_spill] sm:$0xff] }
 0x176   : > { %v2173_v26 = vadd.f32 %v5975_v2, %v9211_v31  ;;  %v6006_v18 = vpop.f32.mrf.mxu0  ;;  %v9221_v31 = vld [vmem:[#allocation26_spill] sm:$0xff] }
 0x177   : > { %v2092_v13 = vpop.f32.mrf.mxu1  ;;  %v8538_v43 = vadd.f32 %v6006_v18, %v2170_v62 }
 0x178   : > { %v2171_v37 = vadd.f32 %v2092_v13, %v9212_v27  ;;  %v2757_v44 = vpop.f32.mrf.mxu0 }
 0x179   : > { %v5976_v50 = vpop.f32.mrf.mxu1  ;;  %v8541_v10 = vadd.f32 %v2757_v44, %v2168_v20 }
 0x17a   : > { %v2174_v7 = vadd.f32 %v5976_v50, %v9213_v14  ;;  %v6009_v17 = vpop.f32.mrf.mxu0 }
 0x17b   : > { %v2095_v0 = vpop.f32.mrf.mxu1  ;;  %v8545_v46 = vadd.f32 %v6009_v17, %v2173_v26 }
 0x17c   : > { %v2172_v60 = vadd.f32 %v2095_v0, %v9214_v12  ;;  %v2770_v8 = vpop.f32.mrf.mxu0  ;;  %v9223_v0 = vld [vmem:[#allocation28_spill] sm:$0xff] }
 0x17d   : > { %v5979_v25 = vpop.f32.mrf.mxu1  ;;  %v8548_v16 = vadd.f32 %v2770_v8, %v2171_v37  ;;  %v9222_v37 = vld [vmem:[#allocation27_spill] sm:$0xff] }
 0x17e   : > { %v2177_v29 = vadd.f32 %v5979_v25, %v9215_v22  ;;  %v6010_v30 = vpop.f32.mrf.mxu0 }
 0x17f   : > { %v2108_v21 = vpop.f32.mrf.mxu1  ;;  %v8551_v63 = vadd.f32 %v6010_v30, %v2174_v7 }
 0x180   : > { %v2175_v55 = vadd.f32 %v2108_v21, %v9216_v58  ;;  %v2773_v32 = vpop.f32.mrf.mxu0 }
 0x181   : > { %v5980_v6 = vpop.f32.mrf.mxu1  ;;  %v8554_v45 = vadd.f32 %v2773_v32, %v2172_v60 }
 0x182   : > { %v2178_v9 = vadd.f32 %v5980_v6, %v9217_v4  ;;  %v6013_v48 = vpop.f32.mrf.mxu0 }
 0x183   : > { %v2111_v49 = vpop.f32.mrf.mxu1  ;;  %v8558_v47 = vadd.f32 %v6013_v48, %v2177_v29 }
 0x184   : > { %v2176_v23 = vadd.f32 %v2111_v49, %v9218_v36  ;;  %v2786_v56 = vpop.f32.mrf.mxu0 }
 0x185   : > { %v5983_v35 = vpop.f32.mrf.mxu1  ;;  %v8561_v20 = vadd.f32 %v2786_v56, %v2175_v55 }
 0x186   : > { %v2181_v54 = vadd.f32 %v5983_v35, %v9219_v5  ;;  %v6014_v2 = vpop.f32.mrf.mxu0 }
 0x187   : > { %v2124_v62 = vpop.f32.mrf.mxu1  ;;  %v8564_v18 = vadd.f32 %v6014_v2, %v2178_v9 }
 0x188   : > { %v2179_v28 = vadd.f32 %v2124_v62, %v9220_v42  ;;  %v2789_v27 = vpop.f32.mrf.mxu0 }
 0x189   : > { %v5984_v15 = vpop.f32.mrf.mxu1  ;;  %v8567_v50 = vadd.f32 %v2789_v27, %v2176_v23 }
 0x18a   : > { %v2182_v26 = vadd.f32 %v5984_v15, %v9221_v31  ;;  %v6017_v7 = vpop.f32.mrf.mxu0 }
 0x18b   : > { %v2127_v13 = vpop.f32.mrf.mxu1  ;;  %v8570_v12 = vadd.f32 %v6017_v7, %v2181_v54 }
 0x18c   : > { %v2180_v44 = vadd.f32 %v2127_v13, %v9222_v37  ;;  %v2802_v25 = vpop.f32.mrf.mxu0 }
 0x18d   : > { %v5987_v14 = vpop.f32.mrf.mxu1  ;;  %v8573_v22 = vadd.f32 %v2802_v25, %v2179_v28 }
 0x18e   : > { %v2185_v17 = vadd.f32 %v5987_v14, %v9223_v0  ;;  %v6018_v21 = vpop.f32.mrf.mxu0 }
 0x18f   : > { %v2140_v60 = vpop.f32.mrf.mxu1  ;;  %v8576_v58 = vadd.f32 %v6018_v21, %v2182_v26 }
 0x190   : > { %v2183_v8 = vadd.f32 %v2140_v60, %v8474_v24  ;;  %v2805_v6 = vpop.f32.mrf.mxu0 }
 0x191   : > { %v5988_v29 = vpop.f32.mrf.mxu1  ;;  %v8579_v4 = vadd.f32 %v2805_v6, %v2180_v44 }
 0x192   : > { %v2186_v30 = vadd.f32 %v5988_v29, %v8477_v41  ;;  %v6021_v9 = vpop.f32.mrf.mxu0 }
 0x193   : > { %v2143_v55 = vpop.f32.mrf.mxu1  ;;  %v8581_v49 = vadd.f32 %v6021_v9, %v2185_v17 }
 0x194   : > { %v2184_v32 = vadd.f32 %v2143_v55, %v8480_v40  ;;  %v2818_v36 = vpop.f32.mrf.mxu0 }
 0x195   : > { %v8583_v23 = vadd.f32 %v2818_v36, %v2183_v8  ;;  %v8585_v24 = vpop.f32.mrf.mxu1 }
 0x196   : > { %v6022_v35 = vpop.f32.mrf.mxu0 }
 0x197   : > { %v8587_v48 = vadd.f32 %v6022_v35, %v2186_v30  ;;  %v8589_v41 = vpop.f32.mrf.mxu1 }
 0x198   : > { %v2821_v5 = vpop.f32.mrf.mxu0 }
 0x199   : > { %v8591_v54 = vadd.f32 %v2821_v5, %v2184_v32  ;;  %v8593_v62 = vpop.f32.mrf.mxu1 }
 0x19a   : > { %v8595_v40 = vpop.f32.mrf.mxu0 }
 0x19b   : > { %v8597_v56 = vpop.f32.mrf.mxu1 }
 0x19c   : > { %v8599_v42 = vpop.f32.mrf.mxu0 }
 0x19d   : > { %v8603_v15 = vpop.f32.mrf.mxu1 }
 0x19e   : > { %v8601_v28 = vpop.f32.mrf.mxu0 }
 0x19f   : > { %v8607_v31 = vpop.f32.mrf.mxu1 }
 0x1a0   : > { %v8605_v2 = vpop.f32.mrf.mxu0 }
 0x1a1   : > { %v8611_v13 = vpop.f32.mrf.mxu1 }
 0x1a2   : > { %v8609_v26 = vpop.f32.mrf.mxu0 }
 0x1a3   : > { %v8615_v37 = vpop.f32.mrf.mxu1 }
 0x1a4   : > { %v8613_v27 = vpop.f32.mrf.mxu0 }
 0x1a5   : > { %v6035_v14 = vpop.f32.mrf.mxu1 }
 0x1a6   : > { %v8617_v44 = vpop.f32.mrf.mxu0  ;;  %v3265_v7 = vadd.f32 %v6035_v14, %v8520_v39 }
 0x1a7   : > { %v3160_v17 = vpop.f32.mrf.mxu1 }
 0x1a8   : > { %v8620_v0 = vpop.f32.mrf.mxu0  ;;  %v3263_v60 = vadd.f32 %v3160_v17, %v8524_v1 }
 0x1a9   : > { %v6036_v8 = vpop.f32.mrf.mxu1 }
 0x1aa   : > { %v6069_v25 = vpop.f32.mrf.mxu0  ;;  %v3266_v21 = vadd.f32 %v6036_v8, %v8526_v53 }
 0x1ab   : > { %v8623_v29 = vadd.f32 %v6069_v25, %v3265_v7  ;;  %v3163_v55 = vpop.f32.mrf.mxu1 }
 0x1ac   : > { %v3535_v30 = vpop.f32.mrf.mxu0  ;;  %v3264_v32 = vadd.f32 %v3163_v55, %v8529_v11 }
 0x1ad   : > { %v8626_v6 = vadd.f32 %v3535_v30, %v3263_v60  ;;  %v6039_v36 = vpop.f32.mrf.mxu1 }
 0x1ae   : > { %v6070_v9 = vpop.f32.mrf.mxu0  ;;  %v3269_v35 = vadd.f32 %v6039_v36, %v8532_v61 }
 0x1af   : > { %v8629_v39 = vadd.f32 %v6070_v9, %v3266_v21  ;;  %v3176_v1 = vpop.f32.mrf.mxu1 }
 0x1b0   : > { %v3538_v5 = vpop.f32.mrf.mxu0  ;;  %v3267_v7 = vadd.f32 %v3176_v1, %v8535_v34 }
 0x1b1   : > { %v8632_v14 = vadd.f32 %v3538_v5, %v3264_v32  ;;  %v6040_v53 = vpop.f32.mrf.mxu1 }
 0x1b2   : > { %v6073_v17 = vpop.f32.mrf.mxu0  ;;  %v3270_v60 = vadd.f32 %v6040_v53, %v8538_v43 }
 0x1b3   : > { %v8635_v25 = vadd.f32 %v6073_v17, %v3269_v35  ;;  %v3179_v11 = vpop.f32.mrf.mxu1 }
 0x1b4   : > { %v3551_v8 = vpop.f32.mrf.mxu0  ;;  %v3268_v21 = vadd.f32 %v3179_v11, %v8541_v10 }
 0x1b5   : > { %v8638_v30 = vadd.f32 %v3551_v8, %v3267_v7  ;;  %v6043_v61 = vpop.f32.mrf.mxu1 }
 0x1b6   : > { %v6074_v55 = vpop.f32.mrf.mxu0  ;;  %v3273_v32 = vadd.f32 %v6043_v61, %v8545_v46 }
 0x1b7   : > { %v8641_v9 = vadd.f32 %v6074_v55, %v3270_v60  ;;  %v3192_v34 = vpop.f32.mrf.mxu1 }
 0x1b8   : > { %v3554_v36 = vpop.f32.mrf.mxu0  ;;  %v3271_v35 = vadd.f32 %v3192_v34, %v8548_v16 }
 0x1b9   : > { %v8644_v5 = vadd.f32 %v3554_v36, %v3268_v21  ;;  %v6044_v43 = vpop.f32.mrf.mxu1 }
 0x1ba   : > { %v6077_v1 = vpop.f32.mrf.mxu0  ;;  %v3274_v7 = vadd.f32 %v6044_v43, %v8551_v63 }
 0x1bb   : > { %v8647_v17 = vadd.f32 %v6077_v1, %v3273_v32  ;;  %v3195_v10 = vpop.f32.mrf.mxu1 }
 0x1bc   : > { %v3567_v53 = vpop.f32.mrf.mxu0  ;;  %v3272_v60 = vadd.f32 %v3195_v10, %v8554_v45 }
 0x1bd   : > { %v8650_v8 = vadd.f32 %v3567_v53, %v3271_v35  ;;  %v6047_v46 = vpop.f32.mrf.mxu1 }
 0x1be   : > { %v6078_v11 = vpop.f32.mrf.mxu0  ;;  %v3277_v21 = vadd.f32 %v6047_v46, %v8558_v47 }
 0x1bf   : > { %v8653_v55 = vadd.f32 %v6078_v11, %v3274_v7  ;;  %v3208_v16 = vpop.f32.mrf.mxu1 }
 0x1c0   : > { %v3570_v61 = vpop.f32.mrf.mxu0  ;;  %v3275_v32 = vadd.f32 %v3208_v16, %v8561_v20 }
 0x1c1   : > { %v8656_v36 = vadd.f32 %v3570_v61, %v3272_v60  ;;  %v6048_v63 = vpop.f32.mrf.mxu1 }
 0x1c2   : > { %v6081_v34 = vpop.f32.mrf.mxu0  ;;  %v3278_v35 = vadd.f32 %v6048_v63, %v8564_v18 }
 0x1c3   : > { %v8659_v1 = vadd.f32 %v6081_v34, %v3277_v21  ;;  %v3211_v45 = vpop.f32.mrf.mxu1 }
 0x1c4   : > { %v3583_v43 = vpop.f32.mrf.mxu0  ;;  %v3276_v7 = vadd.f32 %v3211_v45, %v8567_v50 }
 0x1c5   : > { %v8662_v53 = vadd.f32 %v3583_v43, %v3275_v32  ;;  %v6051_v11 = vpop.f32.mrf.mxu1 }
 0x1c6   : > { %v6082_v10 = vpop.f32.mrf.mxu0  ;;  %v3281_v46 = vadd.f32 %v6051_v11, %v8570_v12 }
 0x1c7   : > { %v8665_v47 = vadd.f32 %v6082_v10, %v3278_v35  ;;  %v3224_v61 = vpop.f32.mrf.mxu1 }
 0x1c8   : > { %v3586_v60 = vpop.f32.mrf.mxu0  ;;  %v3279_v16 = vadd.f32 %v3224_v61, %v8573_v22 }
 0x1c9   : > { %v8668_v20 = vadd.f32 %v3586_v60, %v3276_v7  ;;  %v6052_v34 = vpop.f32.mrf.mxu1 }
 0x1ca   : > { %v6085_v21 = vpop.f32.mrf.mxu0  ;;  %v3282_v63 = vadd.f32 %v6052_v34, %v8576_v58 }
 0x1cb   : > { %v8671_v18 = vadd.f32 %v6085_v21, %v3281_v46  ;;  %v3227_v35 = vpop.f32.mrf.mxu1 }
 0x1cc   : > { %v3599_v32 = vpop.f32.mrf.mxu0  ;;  %v3280_v45 = vadd.f32 %v3227_v35, %v8579_v4 }
 0x1cd   : > { %v8674_v50 = vadd.f32 %v3599_v32, %v3279_v16  ;;  %v6055_v11 = vpop.f32.mrf.mxu1 }
 0x1ce   : > { %v6086_v43 = vpop.f32.mrf.mxu0  ;;  %v3285_v22 = vadd.f32 %v6055_v11, %v8581_v49 }
 0x1cf   : > { %v8677_v10 = vadd.f32 %v6086_v43, %v3282_v63  ;;  %v3240_v46 = vpop.f32.mrf.mxu1  ;;  %v3257_v63 = vadd.f32 %v8585_v24, %v8483_v52  ;;  %v3256_v24 = vadd.f32 %v8597_v56, %v8507_v38  ;;  %v3259_v38 = vadd.f32 %v8607_v31, %v8511_v57 }
 0x1d0   : > { %v3602_v12 = vpop.f32.mrf.mxu0  ;;  %v3283_v58 = vadd.f32 %v3240_v46, %v8583_v23 }
 0x1d1   : > { %v8679_v7 = vadd.f32 %v3602_v12, %v3280_v45  ;;  %v6056_v16 = vpop.f32.mrf.mxu1  ;;  %v3255_v12 = vadd.f32 %v8589_v41, %v8499_v33  ;;  %v3634_v31 = vadd.f32 %v8613_v27, %v3259_v38 }
 0x1d2   : > { %v6089_v60 = vpop.f32.mrf.mxu0  ;;  %v3286_v4 = vadd.f32 %v6056_v16, %v8587_v48  ;;  %v3258_v48 = vadd.f32 %v8593_v62, %v8502_v51  ;;  %v3261_v51 = vadd.f32 %v8603_v15, %v8509_v3  ;;  %v8718_v15 = vld [vmem:[%s8891_s2] ss:$0 sm:$0xff] }
 0x1d3   : > { %v8682_v61 = vadd.f32 %v6089_v60, %v3285_v22  ;;  %v3243_v35 = vpop.f32.mrf.mxu1  ;;  %v3632_v22 = vadd.f32 %v8595_v40, %v3257_v63  ;;  %v3630_v52 = vadd.f32 %v8599_v42, %v3255_v12  ;;  %v3631_v40 = vadd.f32 %v8605_v2, %v3256_v24 }
 0x1d4   : > { %v3615_v21 = vpop.f32.mrf.mxu0  ;;  %v3284_v49 = vadd.f32 %v3243_v35, %v8591_v54  ;;  %v3633_v33 = vadd.f32 %v8601_v28, %v3258_v48  ;;  %v3636_v35 = vadd.f32 %v8609_v26, %v3261_v51  ;;  %v3262_v2 = vadd.f32 %v8611_v13, %v8514_v19 }
 0x1d5   : > { %v8685_v34 = vadd.f32 %v3615_v21, %v3283_v58  ;;  %v3260_v26 = vadd.f32 %v8615_v37, %v8516_v59 }
 0x1d6   : > { %v6090_v32 = vpop.f32.mrf.mxu0 }
 0x1d7   : > { %v8690_v43 = vadd.f32 %v6090_v32, %v3286_v4  ;;  %v6095_v60 = vpop.f32.mrf.mxu1  ;;  %v3635_v37 = vadd.f32 %v8620_v0, %v3260_v26 }
 0x1d8   : > { %v3618_v45 = vpop.f32.mrf.mxu0  ;;  %v4310_v54 = vadd.f32 %v6095_v60, %v3632_v22 }
 0x1d9   : > { %v8695_v23 = vadd.f32 %v3618_v45, %v3284_v49  ;;  %v4181_v58 = vpop.f32.mrf.mxu1 }
 0x1da   : > { %v6129_v11 = vpop.f32.mrf.mxu0  ;;  %v4308_v16 = vadd.f32 %v4181_v58, %v3630_v52 }
 0x1db   : > { %v4732_v41 = vadd.f32 %v6129_v11, %v4310_v54  ;;  %v6096_v4 = vpop.f32.mrf.mxu1  ;;  %v3637_v11 = vadd.f32 %v8617_v44, %v3262_v2 }
 0x1dc   : > { %v4603_v46 = vpop.f32.mrf.mxu0  ;;  %v4311_v42 = vadd.f32 %v6096_v4, %v3633_v33 }
 0x1dd   : > { %4765 = vst.msk [vmem:[#allocation2 + $0x10] sm:$0xff] %vm266_vm8, %v4732_v41  ;;  %v4730_v62 = vadd.f32 %v4603_v46, %v4308_v16  ;;  %v4184_v32 = vpop.f32.mrf.mxu1 }
 0x1de   : > { %v6130_v21 = vpop.f32.mrf.mxu0  ;;  %v4309_v28 = vadd.f32 %v4184_v32, %v3631_v40 }
 0x1df   : > { %4763 = vst.msk [vmem:[#allocation2] sm:$0xff] %vm266_vm8, %v4730_v62  ;;  %v4733_v56 = vadd.f32 %v6130_v21, %v4311_v42 }
 0x1e0   : > { %v4606_v63 = vpop.f32.mrf.mxu0 }
 0x1e1   : > { %4766 = vst.msk [vmem:[#allocation2 + $0x18] sm:$0xff] %vm266_vm8, %v4733_v56  ;;  %v4731_v3 = vadd.f32 %v4606_v63, %v4309_v28 }
 0x1e3   : > { %v6099_v49 = vpop.f32.mrf.mxu1  ;;  %v6133_v57 = vpop.f32.mrf.mxu0  ;;  %4764 = vst.msk [vmem:[#allocation2 + $0x8] sm:$0xff] %vm266_vm8, %v4731_v3 }
 0x1e4   : > { %v4314_v45 = vadd.f32 %v6099_v49, %v3636_v35  ;;  %v4800_v12 = vld [vmem:[#allocation2 + $0x10] sm:$0xff] }
 0x1e5   : > { %v4197_v19 = vpop.f32.mrf.mxu1  ;;  %v4619_v13 = vpop.f32.mrf.mxu0  ;;  %v4839_v22 = vadd.f32 %v8718_v15, %v4800_v12 }
 0x1e6   : > { %v4736_v48 = vadd.f32 %v6133_v57, %v4314_v45  ;;  %v4312_v60 = vadd.f32 %v4197_v19, %v3634_v31  ;;  %v4798_v46 = vld [vmem:[#allocation2] sm:$0xff] }
 0x1e7   : > { %v6100_v52 = vpop.f32.mrf.mxu1  ;;  %v6134_v24 = vpop.f32.mrf.mxu0  ;;  %v4871_v27 = vmax.f32 %v4839_v22, 0.0  ;;  %v4837_v54 = vadd.f32 %v8718_v15, %v4798_v46 }
 0x1e8   : > { %4769 = vst.msk [vmem:[#allocation2 + $0x30] sm:$0xff] %vm266_vm8, %v4736_v48  ;;  %v4734_v58 = vadd.f32 %v4619_v13, %v4312_v60  ;;  %v4315_v59 = vadd.f32 %v6100_v52, %v3637_v11  ;;  %v4801_v44 = vld [vmem:[#allocation2 + $0x18] sm:$0xff] }
 0x1e9   : > { %v4200_v21 = vpop.f32.mrf.mxu1  ;;  %v5670_v33 = vpack.c.bf16 %v4871_v27, %v4871_v27  ;;  %v4869_v41 = vmax.f32 %v4837_v54, 0.0  ;;  %v4840_v16 = vadd.f32 %v8718_v15, %v4801_v44  ;;  %v4622_v40 = vpop.f32.mrf.mxu0 }
 0x1ea   : > { %4767 = vst.msk [vmem:[#allocation2 + $0x20] sm:$0xff] %vm266_vm8, %v4734_v58  ;;  %v4737_v4 = vadd.f32 %v6134_v24, %v4315_v59  ;;  %v4799_v51 = vld [vmem:[#allocation2 + $0x8] sm:$0xff]  ;;  %v4313_v0 = vadd.f32 %v4200_v21, %v3635_v37 }
 0x1eb   : > { %5032 = vst.msk [vmem:[%s8733_s12 + $0x8] sm:$0xf] %vm5029_vm9, %v5670_v33  ;;  %v5668_v62 = vpack.c.bf16 %v4869_v41, %v4869_v41  ;;  %v4872_v42 = vmax.f32 %v4840_v16, 0.0  ;;  %v4838_v32 = vadd.f32 %v8718_v15, %v4799_v51 }
 0x1ec   : > { %4770 = vst.msk [vmem:[#allocation2 + $0x38] sm:$0xff] %vm266_vm8, %v4737_v4  ;;  %v4735_v63 = vadd.f32 %v4622_v40, %v4313_v0 }
 0x1ed   : > { %5030 = vst.msk [vmem:[%s8733_s12] sm:$0xf] %vm5029_vm9, %v5668_v62  ;;  %v5671_v38 = vpack.c.bf16 %v4872_v42, %v4872_v42  ;;  %v4870_v56 = vmax.f32 %v4838_v32, 0.0 }
 0x1ee   : > { %4768 = vst.msk [vmem:[#allocation2 + $0x28] sm:$0xff] %vm266_vm8, %v4735_v63 }
 0x1ef   : > { %v6103_v28 = vpop.f32.mrf.mxu1  ;;  %v6137_v35 = vpop.f32.mrf.mxu0  ;;  %v4804_v2 = vld [vmem:[#allocation2 + $0x30] sm:$0xff]  ;;  %5033 = vst.msk [vmem:[%s8733_s12 + $0xc] sm:$0xf] %vm5029_vm9, %v5671_v38  ;;  %v5669_v49 = vpack.c.bf16 %v4870_v56, %v4870_v56 }
 0x1f0   : > { %v4318_v3 = vadd.f32 %v6103_v28, %v8623_v29  ;;  %v4843_v57 = vadd.f32 %v8718_v15, %v4804_v2 }
 0x1f1   : > { %v4213_v31 = vpop.f32.mrf.mxu1  ;;  %v4635_v45 = vpop.f32.mrf.mxu0  ;;  %v4802_v26 = vld [vmem:[#allocation2 + $0x20] sm:$0xff]  ;;  %5031 = vst.msk [vmem:[%s8733_s12 + $0x4] sm:$0xf] %vm5029_vm9, %v5669_v49 }
 0x1f2   : > { %v4740_v12 = vadd.f32 %v6137_v35, %v4318_v3  ;;  %v4316_v19 = vadd.f32 %v4213_v31, %v8626_v6  ;;  %v4875_v13 = vmax.f32 %v4843_v57, 0.0  ;;  %v4841_v11 = vadd.f32 %v8718_v15, %v4802_v26 }
 0x1f3   : > { %v6104_v22 = vpop.f32.mrf.mxu1  ;;  %v6138_v48 = vpop.f32.mrf.mxu0  ;;  %v4805_v29 = vld [vmem:[#allocation2 + $0x38] sm:$0xff] }
 0x1f4   : > { %4773 = vst.msk [vmem:[#allocation2 + $0x50] sm:$0xff] %vm266_vm8, %v4740_v12  ;;  %v4738_v60 = vadd.f32 %v4635_v45, %v4316_v19  ;;  %v4319_v46 = vadd.f32 %v6104_v22, %v8629_v39  ;;  %v5674_v52 = vpack.c.bf16 %v4875_v13, %v4875_v13  ;;  %v4873_v24 = vmax.f32 %v4841_v11, 0.0 }
 0x1f5   : > { %v4844_v27 = vadd.f32 %v8718_v15, %v4805_v29  ;;  %v4216_v6 = vpop.f32.mrf.mxu1  ;;  %v4638_v54 = vpop.f32.mrf.mxu0  ;;  %v4803_v21 = vld [vmem:[#allocation2 + $0x28] sm:$0xff] }
 0x1f6   : > { %4771 = vst.msk [vmem:[#allocation2 + $0x40] sm:$0xff] %vm266_vm8, %v4738_v60  ;;  %v4741_v58 = vadd.f32 %v6138_v48, %v4319_v46  ;;  %v4317_v59 = vadd.f32 %v4216_v6, %v8632_v14  ;;  %v5672_v37 = vpack.c.bf16 %v4873_v24, %v4873_v24  ;;  %v4842_v39 = vadd.f32 %v8718_v15, %v4803_v21 }
 0x1f7   : > { %5036 = vst.msk [vmem:[%s8733_s12 + $0x18] sm:$0xf] %vm5029_vm9, %v5674_v52  ;;  %v4876_v44 = vmax.f32 %v4844_v27, 0.0 }
 0x1f8   : > { %4774 = vst.msk [vmem:[#allocation2 + $0x58] sm:$0xff] %vm266_vm8, %v4741_v58  ;;  %v4739_v33 = vadd.f32 %v4638_v54, %v4317_v59  ;;  %v4874_v4 = vmax.f32 %v4842_v39, 0.0 }
 0x1f9   : > { %5034 = vst.msk [vmem:[%s8733_s12 + $0x10] sm:$0xf] %vm5029_vm9, %v5672_v37  ;;  %v5675_v41 = vpack.c.bf16 %v4876_v44, %v4876_v44 }
 0x1fa   : > { %4772 = vst.msk [vmem:[#allocation2 + $0x48] sm:$0xff] %vm266_vm8, %v4739_v33  ;;  %v5673_v62 = vpack.c.bf16 %v4874_v4, %v4874_v4 }
 0x1fb   : > { %v6141_v16 = vpop.f32.mrf.mxu0  ;;  %v6107_v40 = vpop.f32.mrf.mxu1  ;;  %5037 = vst.msk [vmem:[%s8733_s12 + $0x1c] sm:$0xf] %vm5029_vm9, %v5675_v41  ;;  %v4808_v14 = vld [vmem:[#allocation2 + $0x50] sm:$0xff] }
 0x1fc   : > { %v4322_v51 = vadd.f32 %v6107_v40, %v8635_v25  ;;  %v4847_v42 = vadd.f32 %v8718_v15, %v4808_v14  ;;  %5035 = vst.msk [vmem:[%s8733_s12 + $0x14] sm:$0xf] %vm5029_vm9, %v5673_v62 }
 0x1fd   : > { %v4651_v0 = vpop.f32.mrf.mxu0  ;;  %v4229_v32 = vpop.f32.mrf.mxu1  ;;  %v4806_v63 = vld [vmem:[#allocation2 + $0x40] sm:$0xff] }
 0x1fe   : > { %v4744_v38 = vadd.f32 %v6141_v16, %v4322_v51  ;;  %v4320_v56 = vadd.f32 %v4229_v32, %v8638_v30  ;;  %v4879_v35 = vmax.f32 %v4847_v42, 0.0  ;;  %v4845_v2 = vadd.f32 %v8718_v15, %v4806_v63 }
 0x1ff   : > { %v6142_v28 = vpop.f32.mrf.mxu0  ;;  %v6108_v3 = vpop.f32.mrf.mxu1  ;;  %v4809_v49 = vld [vmem:[#allocation2 + $0x58] sm:$0xff] }
 0x200   : > { %4777 = vst.msk [vmem:[#allocation2 + $0x70] sm:$0xff] %vm266_vm8, %v4744_v38  ;;  %v4742_v25 = vadd.f32 %v4651_v0, %v4320_v56  ;;  %v4323_v57 = vadd.f32 %v6108_v3, %v8641_v9  ;;  %v5678_v31 = vpack.c.bf16 %v4879_v35, %v4879_v35  ;;  %v4877_v45 = vmax.f32 %v4845_v2, 0.0 }
 0x201   : > { %v4848_v26 = vadd.f32 %v8718_v15, %v4809_v49  ;;  %v4232_v30 = vpop.f32.mrf.mxu1  ;;  %v4654_v12 = vpop.f32.mrf.mxu0  ;;  %v4807_v19 = vld [vmem:[#allocation2 + $0x48] sm:$0xff] }
 0x202   : > { %4775 = vst.msk [vmem:[#allocation2 + $0x60] sm:$0xff] %vm266_vm8, %v4742_v25  ;;  %v4745_v13 = vadd.f32 %v6142_v28, %v4323_v57  ;;  %v4321_v11 = vadd.f32 %v4232_v30, %v8644_v5  ;;  %v5676_v22 = vpack.c.bf16 %v4877_v45, %v4877_v45  ;;  %v4846_v9 = vadd.f32 %v8718_v15, %v4807_v19 }
 0x203   : > { %5040 = vst.msk [vmem:[%s8733_s12 + $0x28] sm:$0xf] %vm5029_vm9, %v5678_v31  ;;  %v4880_v48 = vmax.f32 %v4848_v26, 0.0 }
 0x204   : > { %4778 = vst.msk [vmem:[#allocation2 + $0x78] sm:$0xff] %vm266_vm8, %v4745_v13  ;;  %v4743_v29 = vadd.f32 %v4654_v12, %v4321_v11  ;;  %v4878_v46 = vmax.f32 %v4846_v9, 0.0 }
 0x205   : > { %5038 = vst.msk [vmem:[%s8733_s12 + $0x20] sm:$0xf] %vm5029_vm9, %v5676_v22  ;;  %v5679_v60 = vpack.c.bf16 %v4880_v48, %v4880_v48 }
 0x206   : > { %4776 = vst.msk [vmem:[#allocation2 + $0x68] sm:$0xff] %vm266_vm8, %v4743_v29  ;;  %v5677_v27 = vpack.c.bf16 %v4878_v46, %v4878_v46 }
 0x207   : > { %v6111_v52 = vpop.f32.mrf.mxu1  ;;  %v6145_v24 = vpop.f32.mrf.mxu0  ;;  %5041 = vst.msk [vmem:[%s8733_s12 + $0x2c] sm:$0xf] %vm5029_vm9, %v5679_v60  ;;  %v4812_v6 = vld [vmem:[#allocation2 + $0x70] sm:$0xff] }
 0x208   : > { %v4326_v5 = vadd.f32 %v6111_v52, %v8647_v17  ;;  %v4851_v59 = vadd.f32 %v8718_v15, %v4812_v6  ;;  %5039 = vst.msk [vmem:[%s8733_s12 + $0x24] sm:$0xf] %vm5029_vm9, %v5677_v27 }
 0x209   : > { %v4245_v54 = vpop.f32.mrf.mxu1  ;;  %v4667_v58 = vpop.f32.mrf.mxu0  ;;  %v4810_v21 = vld [vmem:[#allocation2 + $0x60] sm:$0xff] }
 0x20a   : > { %v4748_v37 = vadd.f32 %v6145_v24, %v4326_v5  ;;  %v4324_v44 = vadd.f32 %v4245_v54, %v8650_v8  ;;  %v4883_v41 = vmax.f32 %v4851_v59, 0.0  ;;  %v4849_v17 = vadd.f32 %v8718_v15, %v4810_v21 }
 0x20b   : > { %v6112_v39 = vpop.f32.mrf.mxu1  ;;  %v6146_v33 = vpop.f32.mrf.mxu0  ;;  %v4813_v40 = vld [vmem:[#allocation2 + $0x78] sm:$0xff] }
 0x20c   : > { %4781 = vst.msk [vmem:[#allocation2 + $0x90] sm:$0xff] %vm266_vm8, %v4748_v37  ;;  %v4746_v16 = vadd.f32 %v4667_v58, %v4324_v44  ;;  %v4327_v4 = vadd.f32 %v6112_v39, %v8653_v55  ;;  %v5682_v51 = vpack.c.bf16 %v4883_v41, %v4883_v41  ;;  %v4881_v0 = vmax.f32 %v4849_v17, 0.0 }
 0x20d   : > { %v4248_v14 = vpop.f32.mrf.mxu1  ;;  %v4852_v8 = vadd.f32 %v8718_v15, %v4813_v40  ;;  %v4670_v42 = vpop.f32.mrf.mxu0  ;;  %v4811_v32 = vld [vmem:[#allocation2 + $0x68] sm:$0xff] }
 0x20e   : > { %4779 = vst.msk [vmem:[#allocation2 + $0x80] sm:$0xff] %vm266_vm8, %v4746_v16  ;;  %v4749_v62 = vadd.f32 %v6146_v33, %v4327_v4  ;;  %v4325_v63 = vadd.f32 %v4248_v14, %v8656_v36  ;;  %v5680_v38 = vpack.c.bf16 %v4881_v0, %v4881_v0  ;;  %v4850_v55 = vadd.f32 %v8718_v15, %v4811_v32 }
 0x20f   : > { %5044 = vst.msk [vmem:[%s8733_s12 + $0x38] sm:$0xf] %vm5029_vm9, %v5682_v51  ;;  %v4884_v56 = vmax.f32 %v4852_v8, 0.0 }
 0x210   : > { %4782 = vst.msk [vmem:[#allocation2 + $0x98] sm:$0xff] %vm266_vm8, %v4749_v62  ;;  %v4747_v28 = vadd.f32 %v4670_v42, %v4325_v63  ;;  %v4882_v2 = vmax.f32 %v4850_v55, 0.0 }
 0x211   : > { %5042 = vst.msk [vmem:[%s8733_s12 + $0x30] sm:$0xf] %vm5029_vm9, %v5680_v38  ;;  %v5683_v35 = vpack.c.bf16 %v4884_v56, %v4884_v56 }
 0x212   : > { %4780 = vst.msk [vmem:[#allocation2 + $0x88] sm:$0xff] %vm266_vm8, %v4747_v28  ;;  %v5681_v57 = vpack.c.bf16 %v4882_v2, %v4882_v2 }
 0x213   : > { %v4816_v25 = vld [vmem:[#allocation2 + $0x90] sm:$0xff]  ;;  %5045 = vst.msk [vmem:[%s8733_s12 + $0x3c] sm:$0xf] %vm5029_vm9, %v5683_v35 }
 0x214   : > { %v6115_v3 = vpop.f32.mrf.mxu1  ;;  %v6149_v49 = vpop.f32.mrf.mxu0  ;;  %v4855_v31 = vadd.f32 %v8718_v15, %v4816_v25  ;;  %5043 = vst.msk [vmem:[%s8733_s12 + $0x34] sm:$0xf] %vm5029_vm9, %v5681_v57 }
 0x215   : > { %v4330_v36 = vadd.f32 %v6115_v3, %v8659_v1  ;;  %v4814_v30 = vld [vmem:[#allocation2 + $0x80] sm:$0xff] }
 0x216   : > { %v4261_v45 = vpop.f32.mrf.mxu1  ;;  %v4683_v26 = vpop.f32.mrf.mxu0  ;;  %v4887_v13 = vmax.f32 %v4855_v31, 0.0  ;;  %v4853_v11 = vadd.f32 %v8718_v15, %v4814_v30 }
 0x217   : > { %v4752_v12 = vadd.f32 %v6149_v49, %v4330_v36  ;;  %v4328_v19 = vadd.f32 %v4261_v45, %v8662_v53  ;;  %v4817_v1 = vld [vmem:[#allocation2 + $0x98] sm:$0xff] }
 0x218   : > { %v6116_v22 = vpop.f32.mrf.mxu1  ;;  %v6150_v48 = vpop.f32.mrf.mxu0  ;;  %v5686_v60 = vpack.c.bf16 %v4887_v13, %v4887_v13  ;;  %v4885_v46 = vmax.f32 %v4853_v11, 0.0  ;;  %v4856_v52 = vadd.f32 %v8718_v15, %v4817_v1 }
 0x219   : > { %4785 = vst.msk [vmem:[#allocation2 + $0xb0] sm:$0xff] %vm266_vm8, %v4752_v12  ;;  %v4750_v9 = vadd.f32 %v4683_v26, %v4328_v19  ;;  %v4331_v29 = vadd.f32 %v6116_v22, %v8665_v47  ;;  %v4815_v58 = vld [vmem:[#allocation2 + $0x88] sm:$0xff] }
 0x21a   : > { %v4264_v53 = vpop.f32.mrf.mxu1  ;;  %v4686_v27 = vpop.f32.mrf.mxu0  ;;  %5048 = vst.msk [vmem:[%s8733_s12 + $0x48] sm:$0xf] %vm5029_vm9, %v5686_v60  ;;  %v5684_v6 = vpack.c.bf16 %v4885_v46, %v4885_v46  ;;  %v4888_v54 = vmax.f32 %v4856_v52, 0.0  ;;  %v4854_v47 = vadd.f32 %v8718_v15, %v4815_v58 }
 0x21b   : > { %4783 = vst.msk [vmem:[#allocation2 + $0xa0] sm:$0xff] %vm266_vm8, %v4750_v9  ;;  %v4753_v24 = vadd.f32 %v6150_v48, %v4331_v29  ;;  %v4329_v5 = vadd.f32 %v4264_v53, %v8668_v20 }
 0x21c   : > { %5046 = vst.msk [vmem:[%s8733_s12 + $0x40] sm:$0xf] %vm5029_vm9, %v5684_v6  ;;  %v5687_v37 = vpack.c.bf16 %v4888_v54, %v4888_v54  ;;  %v4886_v44 = vmax.f32 %v4854_v47, 0.0 }
 0x21d   : > { %4786 = vst.msk [vmem:[#allocation2 + $0xb8] sm:$0xff] %vm266_vm8, %v4753_v24  ;;  %v4751_v59 = vadd.f32 %v4686_v27, %v4329_v5 }
 0x21e   : > { %5049 = vst.msk [vmem:[%s8733_s12 + $0x4c] sm:$0xf] %vm5029_vm9, %v5687_v37  ;;  %v5685_v41 = vpack.c.bf16 %v4886_v44, %v4886_v44 }
 0x21f   : > { %4784 = vst.msk [vmem:[#allocation2 + $0xa8] sm:$0xff] %vm266_vm8, %v4751_v59 }
 0x220   : > { %v6119_v21 = vpop.f32.mrf.mxu1  ;;  %v6153_v20 = vpop.f32.mrf.mxu0  ;;  %v4820_v39 = vld [vmem:[#allocation2 + $0xb0] sm:$0xff]  ;;  %5047 = vst.msk [vmem:[%s8733_s12 + $0x44] sm:$0xf] %vm5029_vm9, %v5685_v41 }
 0x221   : > { %v4334_v33 = vadd.f32 %v6119_v21, %v8671_v18  ;;  %v4859_v17 = vadd.f32 %v8718_v15, %v4820_v39 }
 0x222   : > { %v4277_v16 = vpop.f32.mrf.mxu1  ;;  %v4699_v4 = vpop.f32.mrf.mxu0  ;;  %v4818_v40 = vld [vmem:[#allocation2 + $0xa0] sm:$0xff] }
 0x223   : > { %v4756_v14 = vadd.f32 %v6153_v20, %v4334_v33  ;;  %v4332_v51 = vadd.f32 %v4277_v16, %v8674_v50  ;;  %v4891_v0 = vmax.f32 %v4859_v17, 0.0  ;;  %v4857_v8 = vadd.f32 %v8718_v15, %v4818_v40 }
 0x224   : > { %v6120_v62 = vpop.f32.mrf.mxu1  ;;  %v6154_v42 = vpop.f32.mrf.mxu0  ;;  %v4821_v32 = vld [vmem:[#allocation2 + $0xb8] sm:$0xff] }
 0x225   : > { %4789 = vst.msk [vmem:[#allocation2 + $0xd0] sm:$0xff] %vm266_vm8, %v4756_v14  ;;  %v4754_v18 = vadd.f32 %v4699_v4, %v4332_v51  ;;  %v4335_v63 = vadd.f32 %v6120_v62, %v8677_v10  ;;  %v5690_v38 = vpack.c.bf16 %v4891_v0, %v4891_v0  ;;  %v4889_v56 = vmax.f32 %v4857_v8, 0.0 }
 0x226   : > { %v4860_v55 = vadd.f32 %v8718_v15, %v4821_v32  ;;  %v4280_v50 = vpop.f32.mrf.mxu1  ;;  %v4702_v28 = vpop.f32.mrf.mxu0  ;;  %v4819_v35 = vld [vmem:[#allocation2 + $0xa8] sm:$0xff] }
 0x227   : > { %4787 = vst.msk [vmem:[#allocation2 + $0xc0] sm:$0xff] %vm266_vm8, %v4754_v18  ;;  %v4757_v2 = vadd.f32 %v6154_v42, %v4335_v63  ;;  %v4333_v3 = vadd.f32 %v4280_v50, %v8679_v7  ;;  %v5688_v49 = vpack.c.bf16 %v4889_v56, %v4889_v56  ;;  %v4858_v10 = vadd.f32 %v8718_v15, %v4819_v35 }
 0x228   : > { %5052 = vst.msk [vmem:[%s8733_s12 + $0x58] sm:$0xf] %vm5029_vm9, %v5690_v38  ;;  %v4892_v25 = vmax.f32 %v4860_v55, 0.0 }
 0x229   : > { %4790 = vst.msk [vmem:[#allocation2 + $0xd8] sm:$0xff] %vm266_vm8, %v4757_v2  ;;  %v4755_v36 = vadd.f32 %v4702_v28, %v4333_v3  ;;  %v4890_v31 = vmax.f32 %v4858_v10, 0.0 }
 0x22a   : > { %5050 = vst.msk [vmem:[%s8733_s12 + $0x50] sm:$0xf] %vm5029_vm9, %v5688_v49  ;;  %v5691_v57 = vpack.c.bf16 %v4892_v25, %v4892_v25 }
 0x22b   : > { %4788 = vst.msk [vmem:[#allocation2 + $0xc8] sm:$0xff] %vm266_vm8, %v4755_v36  ;;  %v5689_v7 = vpack.c.bf16 %v4890_v31, %v4890_v31 }
 0x22c   : > { %v6157_v45 = vpop.f32.mrf.mxu0  ;;  %v6123_v26 = vpop.f32.mrf.mxu1  ;;  %5053 = vst.msk [vmem:[%s8733_s12 + $0x5c] sm:$0xf] %vm5029_vm9, %v5691_v57  ;;  %v4824_v30 = vld [vmem:[#allocation2 + $0xd0] sm:$0xff] }
 0x22d   : > { %v4338_v12 = vadd.f32 %v6123_v26, %v8682_v61  ;;  %v4863_v13 = vadd.f32 %v8718_v15, %v4824_v30  ;;  %5051 = vst.msk [vmem:[%s8733_s12 + $0x54] sm:$0xf] %vm5029_vm9, %v5689_v7 }
 0x22e   : > { %v4715_v19 = vpop.f32.mrf.mxu0  ;;  %v4293_v11 = vpop.f32.mrf.mxu1  ;;  %v4822_v22 = vld [vmem:[#allocation2 + $0xc0] sm:$0xff] }
 0x22f   : > { %v4760_v48 = vadd.f32 %v6157_v45, %v4338_v12  ;;  %v4336_v1 = vadd.f32 %v4293_v11, %v8685_v34  ;;  %v4895_v9 = vmax.f32 %v4863_v13, 0.0  ;;  %v4861_v29 = vadd.f32 %v8718_v15, %v4822_v22 }
 0x230   : > { %v6124_v60 = vpop.f32.mrf.mxu1  ;;  %v6158_v46 = vpop.f32.mrf.mxu0  ;;  %v4825_v52 = vld [vmem:[#allocation2 + $0xd8] sm:$0xff] }
 0x231   : > { %4793 = vst.msk [vmem:[#allocation2 + $0xf0] sm:$0xff] %vm266_vm8, %v4760_v48  ;;  %v4758_v61 = vadd.f32 %v4715_v19, %v4336_v1  ;;  %v4339_v53 = vadd.f32 %v6124_v60, %v8690_v43  ;;  %v5694_v24 = vpack.c.bf16 %v4895_v9, %v4895_v9  ;;  %v4893_v5 = vmax.f32 %v4861_v29, 0.0 }
 0x232   : > { %v4864_v27 = vadd.f32 %v8718_v15, %v4825_v52  ;;  %v4296_v6 = vpop.f32.mrf.mxu1  ;;  %v4823_v34 = vld [vmem:[#allocation2 + $0xc8] sm:$0xff]  ;;  %v4718_v37 = vpop.f32.mrf.mxu0 }
 0x233   : > { %4791 = vst.msk [vmem:[#allocation2 + $0xe0] sm:$0xff] %vm266_vm8, %v4758_v61  ;;  %v4761_v54 = vadd.f32 %v6158_v46, %v4339_v53  ;;  %v4337_v58 = vadd.f32 %v4296_v6, %v8695_v23  ;;  %v5692_v47 = vpack.c.bf16 %v4893_v5, %v4893_v5  ;;  %v4862_v43 = vadd.f32 %v8718_v15, %v4823_v34 }
 0x234   : > { %5056 = vst.msk [vmem:[%s8733_s12 + $0x68] sm:$0xf] %vm5029_vm9, %v5694_v24  ;;  %v4896_v59 = vmax.f32 %v4864_v27, 0.0 }
 0x235   : > { %4794 = vst.msk [vmem:[#allocation2 + $0xf8] sm:$0xff] %vm266_vm8, %v4761_v54  ;;  %v4759_v44 = vadd.f32 %v4718_v37, %v4337_v58  ;;  %v4894_v20 = vmax.f32 %v4862_v43, 0.0 }
 0x236   : > { %5054 = vst.msk [vmem:[%s8733_s12 + $0x60] sm:$0xf] %vm5029_vm9, %v5692_v47  ;;  %v5695_v21 = vpack.c.bf16 %v4896_v59, %v4896_v59 }
 0x237   : > { %4792 = vst.msk [vmem:[#allocation2 + $0xe8] sm:$0xff] %vm266_vm8, %v4759_v44  ;;  %v5693_v23 = vpack.c.bf16 %v4894_v20, %v4894_v20 }
 0x238   : > { %5057 = vst.msk [vmem:[%s8733_s12 + $0x6c] sm:$0xf] %vm5029_vm9, %v5695_v21  ;;  %v4828_v39 = vld [vmem:[#allocation2 + $0xf0] sm:$0xff] }
 0x239   : > { %v4867_v33 = vadd.f32 %v8718_v15, %v4828_v39  ;;  %5055 = vst.msk [vmem:[%s8733_s12 + $0x64] sm:$0xf] %vm5029_vm9, %v5693_v23 }
 0x23a   : > { %v4826_v41 = vld [vmem:[#allocation2 + $0xe0] sm:$0xff] }
 0x23b   : > { %v4899_v17 = vmax.f32 %v4867_v33, 0.0  ;;  %v4865_v16 = vadd.f32 %v8718_v15, %v4826_v41 }
 0x23c   : > { %v4829_v4 = vld [vmem:[#allocation2 + $0xf8] sm:$0xff] }
 0x23d   : > { %v5698_v40 = vpack.c.bf16 %v4899_v17, %v4899_v17  ;;  %v4897_v14 = vmax.f32 %v4865_v16, 0.0  ;;  %v4868_v51 = vadd.f32 %v8718_v15, %v4829_v4 }
 0x23e   : > { %v4827_v0 = vld [vmem:[#allocation2 + $0xe8] sm:$0xff] }
 0x23f   : > { %5060 = vst.msk [vmem:[%s8733_s12 + $0x78] sm:$0xf] %vm5029_vm9, %v5698_v40  ;;  %v5696_v8 = vpack.c.bf16 %v4897_v14, %v4897_v14  ;;  %v4900_v62 = vmax.f32 %v4868_v51, 0.0  ;;  %v4866_v42 = vadd.f32 %v8718_v15, %v4827_v0 }
 0x241   : > { %5058 = vst.msk [vmem:[%s8733_s12 + $0x70] sm:$0xf] %vm5029_vm9, %v5696_v8  ;;  %v5699_v32 = vpack.c.bf16 %v4900_v62, %v4900_v62  ;;  %v4898_v18 = vmax.f32 %v4866_v42, 0.0 }
 0x243   : > { %5061 = vst.msk [vmem:[%s8733_s12 + $0x7c] sm:$0xf] %vm5029_vm9, %v5699_v32  ;;  %v5697_v63 = vpack.c.bf16 %v4898_v18, %v4898_v18 }
 0x245   : > { %5059 = vst.msk [vmem:[%s8733_s12 + $0x74] sm:$0xf] %vm5029_vm9, %v5697_v63 }
 0x246 PF: > { %s13_s14 = sadd.s32 1, %s6273_s14   ;;  %s9224_s12 = smov %s6269_s13 }
 0x247   : > { %p10_p5 = scmp.ge.s32.totalorder %s13_s14, 4   ;;  %s9225_s13 = smov %s9227_s15 }
 0x249   :  { %12 = sbr.rel (!%p10_p5) target bundleno = 2 (0x2), region = 86 }

</bundles_post_ra>
